<compile_context>
chip_gen: v7x
topology: tpu7x:2x2x1
jax: 0.10.0
libtpu: 0.0.40
codegen_flags: <defaults>
</compile_context>

<pallas_src>
import jax
import jax.numpy as jnp
from jax.experimental import pallas as pl
from jax.experimental.pallas import tpu as pltpu

BN_EPS = 1e-5
LANES = 128          # channel lane width; Cout padded to a multiple of this
HALO_ROWS = 4        # image rows of halo per tile (multiple of 4 keeps halo block 8-aligned)
MAX_CONV_ROWS = 1024  # flat (image-row * Wp) positions per conv tile
MAX_BN_ROWS = 4096    # flat positions per BN+ReLU tile (pure elementwise -> bigger tiles)
VMEM_LIMIT = 32 * 1024 * 1024


# ---------------------------------------------------------------------------
# Pallas kernels
# ---------------------------------------------------------------------------
def _make_conv_stats_kernel(rows, wp):
    """rows = th*Wp flattened positions per tile, wp = padded image width."""

    def kernel(xm_ref, xh_ref, w_ref, colmask_ref, out_ref, stats_ref, xs_ref):
        cp = out_ref.shape[1]
        halo = xh_ref.shape[0]

        # Stage main block + vertical halo contiguously in VMEM so every 3x3 tap is a
        # plain static row-offset slice of one buffer (in-VMEM "im2col", no HBM blow-up).
        xs_ref[0:rows, :] = xm_ref[...]
        xs_ref[rows:rows + halo, :] = xh_ref[...]

        # Nine row-offset MXU matmuls; the first tap initializes the accumulator.
        acc = jnp.dot(xs_ref[pl.ds(0, rows), :], w_ref[0],
                      preferred_element_type=jnp.float32)
        for k in range(1, 9):                                # unrolled 3x3 taps
            ky, kx = divmod(k, 3)
            tap = xs_ref[pl.ds(ky * wp + kx, rows), :]       # (rows, Cin)
            acc = acc + jnp.dot(tap, w_ref[k],
                                preferred_element_type=jnp.float32)

        # Zero the padded-width (garbage) columns so they neither pollute the BN
        # statistics nor leak downstream; output stays lane-dense (Cp % 128 == 0).
        acc = acc * colmask_ref[...]
        out_ref[...] = acc

        # Per-block partial BatchNorm statistics (globally reduced in the wrapper).
        stats_ref[0] = jnp.zeros((8, cp), jnp.float32)
        stats_ref[0, 0:1, :] = jnp.sum(acc, axis=0, keepdims=True)
        stats_ref[0, 1:2, :] = jnp.sum(acc * acc, axis=0, keepdims=True)

    return kernel


def _bn_relu_kernel(x_ref, scale_ref, shift_ref, out_ref):
    out_ref[...] = jnp.maximum(x_ref[...] * scale_ref[...] + shift_ref[...], 0.0)


# ---------------------------------------------------------------------------
# Layer wrapper: Conv3x3(pad=1, bias=False) + BatchNorm2d(train stats) + ReLU
# ---------------------------------------------------------------------------
def _pick_row_tile(H, Wp, max_rows=MAX_CONV_ROWS):
    assert H % 8 == 0, "spatial height must be a multiple of 8"
    th = 8
    for cand in range(8, H + 1, 8):
        if H % cand == 0 and cand * Wp <= max_rows:
            th = cand
    return th


def conv3x3_bn_relu(x_nhwc, w9, gamma_p, beta_p, c_out):
    x_nhwc = x_nhwc.astype(jnp.float32)
    N, H, W, Cin = x_nhwc.shape
    Cp = w9.shape[-1]
    assert W % 2 == 0, "width must be even"
    Wp = W + 2
    th = _pick_row_tile(H, Wp)
    hh = HALO_ROWS
    assert th % 8 == 0 and th % hh == 0 and H % th == 0
    assert (hh * Wp) % 8 == 0
    Hp = H + th                    # multiple of th (and of hh), >= H + hh
    nb_h = H // th
    rows = th * Wp
    halo = hh * Wp

    # Zero-padded NHWC -> flat 2-D (rows = N*Hp*Wp, cols = Cin on lanes).
    xp = jnp.pad(x_nhwc, ((0, 0), (1, Hp - H - 1), (1, Wp - W - 1), (0, 0)))
    xflat = xp.reshape(N * Hp * Wp, Cin)

    # Column-validity mask (constant-folded under jit): positions wp in [W, Wp) of every
    # image row are garbage produced by the horizontal taps wrapping into the next row.
    colmask = jnp.tile(jnp.arange(Wp) < W, th).astype(jnp.float32).reshape(rows, 1)

    kernel = _make_conv_stats_kernel(rows=rows, wp=Wp)
    cparams = pltpu.CompilerParams(
        dimension_semantics=("parallel", "parallel"),
        vmem_limit_bytes=VMEM_LIMIT)

    conv_out, stats = pl.pallas_call(
        kernel,
        out_shape=(
            jax.ShapeDtypeStruct((N * H * Wp, Cp), jnp.float32),   # pre-BN conv output
            jax.ShapeDtypeStruct((N * nb_h, 8, Cp), jnp.float32),  # row0=sum, row1=sumsq
        ),
        grid=(N, nb_h),
        in_specs=[
            # main block: th padded image-rows (flattened with width Wp)
            pl.BlockSpec((rows, Cin), lambda n, i: (n * (Hp // th) + i, 0)),
            # halo block: the next hh padded image-rows of the SAME array
            pl.BlockSpec((halo, Cin),
                         lambda n, i: (n * (Hp // hh) + (i + 1) * (th // hh), 0)),
            # conv taps, Cout zero-padded to a multiple of 128 lanes, grid-resident
            pl.BlockSpec((9, Cin, Cp), lambda n, i: (0, 0, 0)),
            pl.BlockSpec((rows, 1), lambda n, i: (0, 0)),
        ],
        out_specs=(
            pl.BlockSpec((rows, Cp), lambda n, i: (n * nb_h + i, 0)),
            pl.BlockSpec((1, 8, Cp), lambda n, i: (n * nb_h + i, 0, 0)),
        ),
        scratch_shapes=[pltpu.VMEM((rows + halo, Cin), jnp.float32)],
        compiler_params=cparams,
    )(xflat, xflat, w9, colmask)

    # Finalize global BatchNorm statistics (tiny: num_blocks x Cp).
    inv_count = 1.0 / float(N * H * W)
    s = stats[:, 0, :].sum(axis=0)
    q = stats[:, 1, :].sum(axis=0)
    mean = s * inv_count
    var = q * inv_count - mean * mean        # biased variance = PyTorch BN train stats
    rstd = jax.lax.rsqrt(var + BN_EPS)
    scale = (gamma_p * rstd).reshape(1, Cp)
    shift = (beta_p - mean * gamma_p * rstd).reshape(1, Cp)

    # Pass 2: memory-bound elementwise normalize + ReLU over the flat conv output.
    # Use larger fused tiles than the conv pass (fewer grid steps, lane-dense stores).
    nb_total = N * nb_h
    merge = 1
    for cand in range(1, nb_total + 1):
        if nb_total % cand == 0 and cand * rows <= MAX_BN_ROWS:
            merge = cand
    bn_rows = merge * rows
    bn_grid = nb_total // merge

    y = pl.pallas_call(
        _bn_relu_kernel,
        out_shape=jax.ShapeDtypeStruct((N * H * Wp, Cp), jnp.float32),
        grid=(bn_grid,),
        in_specs=[
            pl.BlockSpec((bn_rows, Cp), lambda i: (i, 0)),
            pl.BlockSpec((1, Cp), lambda i: (0, 0)),
            pl.BlockSpec((1, Cp), lambda i: (0, 0)),
        ],
        out_specs=pl.BlockSpec((bn_rows, Cp), lambda i: (i, 0)),
        compiler_params=pltpu.CompilerParams(
            dimension_semantics=("parallel",),
            vmem_limit_bytes=VMEM_LIMIT),
    )(conv_out, scale, shift)

    return y.reshape(N, H, Wp, Cp)[:, :, :W, :c_out]


# ---------------------------------------------------------------------------
# Parameter preprocessing (hoisted out of the forward path) and forward pass
# ---------------------------------------------------------------------------
def _round_up(n, m):
    return ((n + m - 1) // m) * m


def _prepare_conv(w_oihw, gamma, beta):
    cout, cin, kh, kw = w_oihw.shape
    assert (kh, kw) == (3, 3)
    cp = _round_up(cout, LANES)
    # PyTorch (Cout, Cin, kh, kw) -> (9, Cin, Cout), then zero-pad Cout to 128-lane multiple.
    w = jnp.transpose(w_oihw, (2, 3, 1, 0)).reshape(9, cin, cout).astype(jnp.float32)
    w = jnp.pad(w, ((0, 0), (0, 0), (0, cp - cout)))
    g = jnp.pad(gamma.astype(jnp.float32), (0, cp - cout))
    b = jnp.pad(beta.astype(jnp.float32), (0, cp - cout))
    return w, g, b


def prepare_double_conv_params(params):
    w1, g1, b1 = _prepare_conv(params["w1"], params["g1"], params["b1"])
    w2, g2, b2 = _prepare_conv(params["w2"], params["g2"], params["b2"])
    return {"w1": w1, "g1": g1, "b1": b1, "c_mid": int(params["w1"].shape[0]),
            "w2": w2, "g2": g2, "b2": b2, "c_out": int(params["w2"].shape[0])}


def double_conv_forward(x_nchw, prepared):
    """DoubleConv.forward: (conv3x3 + BN + ReLU) x 2, NCHW in / NCHW out."""
    x = jnp.transpose(x_nchw, (0, 2, 3, 1))            # NCHW -> NHWC
    x = conv3x3_bn_relu(x, prepared["w1"], prepared["g1"], prepared["b1"],
                        prepared["c_mid"])
    x = conv3x3_bn_relu(x, prepared["w2"], prepared["g2"], prepared["b2"],
                        prepared["c_out"])
    return jnp.transpose(x, (0, 3, 1, 2))              # NHWC -> NCHW


# ---------------------------------------------------------------------------
# Pure-JAX reference (correctness check only)
# ---------------------------------------------------------------------------
def _ref_conv_bn_relu(x_nhwc, w_oihw, gamma, beta):
    y = jax.lax.conv_general_dilated(
        x_nhwc, jnp.transpose(w_oihw, (2, 3, 1, 0)),
        window_strides=(1, 1), padding="SAME",
        dimension_numbers=("NHWC", "HWIO", "NHWC"))
    mean = y.mean(axis=(0, 1, 2))
    var = y.var(axis=(0, 1, 2))
    yn = (y - mean) * jax.lax.rsqrt(var + BN_EPS) * gamma + beta
    return jnp.maximum(yn, 0.0)


def _ref_double_conv(x_nchw, params):
    x = jnp.transpose(x_nchw, (0, 2, 3, 1))
    x = _ref_conv_bn_relu(x, params["w1"], params["g1"], params["b1"])
    x = _ref_conv_bn_relu(x, params["w2"], params["g2"], params["b2"])
    return jnp.transpose(x, (0, 3, 1, 2))


# ---------------------------------------------------------------------------
# Main
# ---------------------------------------------------------------------------
if __name__ == "__main__":
    in_channels, out_channels = 4, 8
    mid_channels = out_channels            # DoubleConv default

    key = jax.random.PRNGKey(0)
    kx_, k1, k2 = jax.random.split(key, 3)

    x = jax.random.normal(kx_, (2, in_channels, 16, 16), dtype=jnp.float32)

    # Deterministic He-style init for the two 3x3 conv weights (bias=False).
    w1 = jax.random.normal(k1, (mid_channels, in_channels, 3, 3), jnp.float32)
    w1 = w1 * jnp.sqrt(2.0 / (in_channels * 9))
    w2 = jax.random.normal(k2, (out_channels, mid_channels, 3, 3), jnp.float32)
    w2 = w2 * jnp.sqrt(2.0 / (mid_channels * 9))

    params = {
        "w1": w1, "g1": jnp.ones((mid_channels,), jnp.float32),
        "b1": jnp.zeros((mid_channels,), jnp.float32),
        "w2": w2, "g2": jnp.ones((out_channels,), jnp.float32),
        "b2": jnp.zeros((out_channels,), jnp.float32),
    }

    prepared = prepare_double_conv_params(params)      # weight reshuffle done once, up front
    fwd = jax.jit(lambda xx: double_conv_forward(xx, prepared))

    out = jax.block_until_ready(fwd(x))
    ref = jax.block_until_ready(_ref_double_conv(x, params))

    assert out.shape == (2, out_channels, 16, 16), out.shape
    assert jnp.allclose(out, ref, atol=1e-3, rtol=1e-3), \
        float(jnp.max(jnp.abs(out - ref)))

    print("KERNEL_OK")
</pallas_src>

<mosaic_0001>
module attributes {stable_mosaic.version = 11 : i64} {
  func.func @kernel(%arg0: i32, %arg1: i32, %arg2: memref<288x4xf32, #tpu.memory_space<vmem>>, %arg3: memref<72x4xf32, #tpu.memory_space<vmem>>, %arg4: memref<9x4x128xf32, #tpu.memory_space<vmem>>, %arg5: memref<288x1xf32, #tpu.memory_space<vmem>>, %arg6: memref<288x128xf32, #tpu.memory_space<vmem>>, %arg7: memref<1x8x128xf32, #tpu.memory_space<vmem>>, %arg8: memref<360x4xf32, #tpu.memory_space<vmem>>) attributes {dimension_semantics = [#tpu.dimension_semantics<parallel>, #tpu.dimension_semantics<parallel>], iteration_bounds = array<i64: 2, 1>, scalar_prefetch = 0 : i64, scratch_operands = 1 : i64, tpu.core_type = #tpu.core_type<tc>, window_params = [{transform_indices = @transform_0, window_bounds = array<i64: 288, 4>}, {transform_indices = @transform_1, window_bounds = array<i64: 72, 4>}, {pipeline_mode = #tpu.pipeline_mode<synchronous>, transform_indices = @transform_2, window_bounds = array<i64: 9, 4, 128>}, {pipeline_mode = #tpu.pipeline_mode<synchronous>, transform_indices = @transform_3, window_bounds = array<i64: 288, 1>}, {transform_indices = @transform_4, window_bounds = array<i64: 288, 128>}, {transform_indices = @transform_5, window_bounds = array<i64: 1, 8, 128>}]} {
    %c0 = arith.constant 0 : index
    %c0_0 = arith.constant 0 : index
    %0 = vector.load %arg2[%c0, %c0_0] : memref<288x4xf32, #tpu.memory_space<vmem>>, vector<288x4xf32>
    %c0_1 = arith.constant 0 : index
    %c0_2 = arith.constant 0 : index
    %1 = vector.load %arg8[%c0_1, %c0_2] : memref<360x4xf32, #tpu.memory_space<vmem>>, vector<288x4xf32>
    tpu.vector_store %arg8[%c0_1, %c0_2], %0 {strides = array<i32>} : memref<360x4xf32, #tpu.memory_space<vmem>>, vector<288x4xf32>,
    %c0_3 = arith.constant 0 : index
    %c0_4 = arith.constant 0 : index
    %2 = vector.load %arg3[%c0_3, %c0_4] : memref<72x4xf32, #tpu.memory_space<vmem>>, vector<72x4xf32>
    %c288 = arith.constant 288 : index
    %c0_5 = arith.constant 0 : index
    %3 = vector.load %arg8[%c288, %c0_5] : memref<360x4xf32, #tpu.memory_space<vmem>>, vector<72x4xf32>
    tpu.vector_store %arg8[%c288, %c0_5], %2 {strides = array<i32>} : memref<360x4xf32, #tpu.memory_space<vmem>>, vector<72x4xf32>,
    %c0_6 = arith.constant 0 : index
    %c0_7 = arith.constant 0 : index
    %4 = vector.load %arg8[%c0_6, %c0_7] : memref<360x4xf32, #tpu.memory_space<vmem>>, vector<288x4xf32>
    %c0_8 = arith.constant 0 : index
    %c0_9 = arith.constant 0 : index
    %c0_10 = arith.constant 0 : index
    %5 = vector.load %arg4[%c0_8, %c0_9, %c0_10] : memref<9x4x128xf32, #tpu.memory_space<vmem>>, vector<1x4x128xf32>
    %6 = vector.shape_cast %5 : vector<1x4x128xf32> to vector<4x128xf32>
    %cst = arith.constant dense<0.000000e+00> : vector<288x128xf32>
    %7 = tpu.matmul %4, %6, %cst {dimension_numbers = #tpu.dot_dimension_numbers<[1], [0], [0], [1], [0, 0, 1, 1], [], []>} : vector<288x4xf32>, vector<4x128xf32>, vector<288x128xf32> -> vector<288x128xf32>
    %c1 = arith.constant 1 : index
    %c0_11 = arith.constant 0 : index
    %8 = vector.load %arg8[%c1, %c0_11] : memref<360x4xf32, #tpu.memory_space<vmem>>, vector<288x4xf32>
    %c1_12 = arith.constant 1 : index
    %c0_13 = arith.constant 0 : index
    %c0_14 = arith.constant 0 : index
    %9 = vector.load %arg4[%c1_12, %c0_13, %c0_14] : memref<9x4x128xf32, #tpu.memory_space<vmem>>, vector<1x4x128xf32>
    %10 = vector.shape_cast %9 : vector<1x4x128xf32> to vector<4x128xf32>
    %cst_15 = arith.constant dense<0.000000e+00> : vector<288x128xf32>
    %11 = tpu.matmul %8, %10, %cst_15 {dimension_numbers = #tpu.dot_dimension_numbers<[1], [0], [0], [1], [0, 0, 1, 1], [], []>} : vector<288x4xf32>, vector<4x128xf32>, vector<288x128xf32> -> vector<288x128xf32>
    %12 = arith.addf %7, %11 : vector<288x128xf32>
    %c2 = arith.constant 2 : index
    %c0_16 = arith.constant 0 : index
    %13 = vector.load %arg8[%c2, %c0_16] : memref<360x4xf32, #tpu.memory_space<vmem>>, vector<288x4xf32>
    %c2_17 = arith.constant 2 : index
    %c0_18 = arith.constant 0 : index
    %c0_19 = arith.constant 0 : index
    %14 = vector.load %arg4[%c2_17, %c0_18, %c0_19] : memref<9x4x128xf32, #tpu.memory_space<vmem>>, vector<1x4x128xf32>
    %15 = vector.shape_cast %14 : vector<1x4x128xf32> to vector<4x128xf32>
    %cst_20 = arith.constant dense<0.000000e+00> : vector<288x128xf32>
    %16 = tpu.matmul %13, %15, %cst_20 {dimension_numbers = #tpu.dot_dimension_numbers<[1], [0], [0], [1], [0, 0, 1, 1], [], []>} : vector<288x4xf32>, vector<4x128xf32>, vector<288x128xf32> -> vector<288x128xf32>
    %17 = arith.addf %12, %16 : vector<288x128xf32>
    %c18 = arith.constant 18 : index
    %c0_21 = arith.constant 0 : index
    %18 = vector.load %arg8[%c18, %c0_21] : memref<360x4xf32, #tpu.memory_space<vmem>>, vector<288x4xf32>
    %c3 = arith.constant 3 : index
    %c0_22 = arith.constant 0 : index
    %c0_23 = arith.constant 0 : index
    %19 = vector.load %arg4[%c3, %c0_22, %c0_23] : memref<9x4x128xf32, #tpu.memory_space<vmem>>, vector<1x4x128xf32>
    %20 = vector.shape_cast %19 : vector<1x4x128xf32> to vector<4x128xf32>
    %cst_24 = arith.constant dense<0.000000e+00> : vector<288x128xf32>
    %21 = tpu.matmul %18, %20, %cst_24 {dimension_numbers = #tpu.dot_dimension_numbers<[1], [0], [0], [1], [0, 0, 1, 1], [], []>} : vector<288x4xf32>, vector<4x128xf32>, vector<288x128xf32> -> vector<288x128xf32>
    %22 = arith.addf %17, %21 : vector<288x128xf32>
    %c19 = arith.constant 19 : index
    %c0_25 = arith.constant 0 : index
    %23 = vector.load %arg8[%c19, %c0_25] : memref<360x4xf32, #tpu.memory_space<vmem>>, vector<288x4xf32>
    %c4 = arith.constant 4 : index
    %c0_26 = arith.constant 0 : index
    %c0_27 = arith.constant 0 : index
    %24 = vector.load %arg4[%c4, %c0_26, %c0_27] : memref<9x4x128xf32, #tpu.memory_space<vmem>>, vector<1x4x128xf32>
    %25 = vector.shape_cast %24 : vector<1x4x128xf32> to vector<4x128xf32>
    %cst_28 = arith.constant dense<0.000000e+00> : vector<288x128xf32>
    %26 = tpu.matmul %23, %25, %cst_28 {dimension_numbers = #tpu.dot_dimension_numbers<[1], [0], [0], [1], [0, 0, 1, 1], [], []>} : vector<288x4xf32>, vector<4x128xf32>, vector<288x128xf32> -> vector<288x128xf32>
    %27 = arith.addf %22, %26 : vector<288x128xf32>
    %c20 = arith.constant 20 : index
    %c0_29 = arith.constant 0 : index
    %28 = vector.load %arg8[%c20, %c0_29] : memref<360x4xf32, #tpu.memory_space<vmem>>, vector<288x4xf32>
    %c5 = arith.constant 5 : index
    %c0_30 = arith.constant 0 : index
    %c0_31 = arith.constant 0 : index
    %29 = vector.load %arg4[%c5, %c0_30, %c0_31] : memref<9x4x128xf32, #tpu.memory_space<vmem>>, vector<1x4x128xf32>
    %30 = vector.shape_cast %29 : vector<1x4x128xf32> to vector<4x128xf32>
    %cst_32 = arith.constant dense<0.000000e+00> : vector<288x128xf32>
    %31 = tpu.matmul %28, %30, %cst_32 {dimension_numbers = #tpu.dot_dimension_numbers<[1], [0], [0], [1], [0, 0, 1, 1], [], []>} : vector<288x4xf32>, vector<4x128xf32>, vector<288x128xf32> -> vector<288x128xf32>
    %32 = arith.addf %27, %31 : vector<288x128xf32>
    %c36 = arith.constant 36 : index
    %c0_33 = arith.constant 0 : index
    %33 = vector.load %arg8[%c36, %c0_33] : memref<360x4xf32, #tpu.memory_space<vmem>>, vector<288x4xf32>
    %c6 = arith.constant 6 : index
    %c0_34 = arith.constant 0 : index
    %c0_35 = arith.constant 0 : index
    %34 = vector.load %arg4[%c6, %c0_34, %c0_35] : memref<9x4x128xf32, #tpu.memory_space<vmem>>, vector<1x4x128xf32>
    %35 = vector.shape_cast %34 : vector<1x4x128xf32> to vector<4x128xf32>
    %cst_36 = arith.constant dense<0.000000e+00> : vector<288x128xf32>
    %36 = tpu.matmul %33, %35, %cst_36 {dimension_numbers = #tpu.dot_dimension_numbers<[1], [0], [0], [1], [0, 0, 1, 1], [], []>} : vector<288x4xf32>, vector<4x128xf32>, vector<288x128xf32> -> vector<288x128xf32>
    %37 = arith.addf %32, %36 : vector<288x128xf32>
    %c37 = arith.constant 37 : index
    %c0_37 = arith.constant 0 : index
    %38 = vector.load %arg8[%c37, %c0_37] : memref<360x4xf32, #tpu.memory_space<vmem>>, vector<288x4xf32>
    %c7 = arith.constant 7 : index
    %c0_38 = arith.constant 0 : index
    %c0_39 = arith.constant 0 : index
    %39 = vector.load %arg4[%c7, %c0_38, %c0_39] : memref<9x4x128xf32, #tpu.memory_space<vmem>>, vector<1x4x128xf32>
    %40 = vector.shape_cast %39 : vector<1x4x128xf32> to vector<4x128xf32>
    %cst_40 = arith.constant dense<0.000000e+00> : vector<288x128xf32>
    %41 = tpu.matmul %38, %40, %cst_40 {dimension_numbers = #tpu.dot_dimension_numbers<[1], [0], [0], [1], [0, 0, 1, 1], [], []>} : vector<288x4xf32>, vector<4x128xf32>, vector<288x128xf32> -> vector<288x128xf32>
    %42 = arith.addf %37, %41 : vector<288x128xf32>
    %c38 = arith.constant 38 : index
    %c0_41 = arith.constant 0 : index
    %43 = vector.load %arg8[%c38, %c0_41] : memref<360x4xf32, #tpu.memory_space<vmem>>, vector<288x4xf32>
    %c8 = arith.constant 8 : index
    %c0_42 = arith.constant 0 : index
    %c0_43 = arith.constant 0 : index
    %44 = vector.load %arg4[%c8, %c0_42, %c0_43] : memref<9x4x128xf32, #tpu.memory_space<vmem>>, vector<1x4x128xf32>
    %45 = vector.shape_cast %44 : vector<1x4x128xf32> to vector<4x128xf32>
    %cst_44 = arith.constant dense<0.000000e+00> : vector<288x128xf32>
    %46 = tpu.matmul %43, %45, %cst_44 {dimension_numbers = #tpu.dot_dimension_numbers<[1], [0], [0], [1], [0, 0, 1, 1], [], []>} : vector<288x4xf32>, vector<4x128xf32>, vector<288x128xf32> -> vector<288x128xf32>
    %47 = arith.addf %42, %46 : vector<288x128xf32>
    %c0_45 = arith.constant 0 : index
    %c0_46 = arith.constant 0 : index
    %48 = vector.load %arg5[%c0_45, %c0_46] : memref<288x1xf32, #tpu.memory_space<vmem>>, vector<288x1xf32>
    %49 = vector.broadcast %48 : vector<288x1xf32> to vector<288x128xf32>
    %50 = arith.mulf %47, %49 : vector<288x128xf32>
    %c0_47 = arith.constant 0 : index
    %c0_48 = arith.constant 0 : index
    %51 = vector.load %arg6[%c0_47, %c0_48] : memref<288x128xf32, #tpu.memory_space<vmem>>, vector<288x128xf32>
    tpu.vector_store %arg6[%c0_47, %c0_48], %50 {strides = array<i32>} : memref<288x128xf32, #tpu.memory_space<vmem>>, vector<288x128xf32>,
    %cst_49 = arith.constant 0.000000e+00 : f32
    %52 = vector.broadcast %cst_49 : f32 to vector<8x128xf32>
    %c0_50 = arith.constant 0 : index
    %c0_51 = arith.constant 0 : index
    %c0_52 = arith.constant 0 : index
    %53 = vector.load %arg7[%c0_50, %c0_51, %c0_52] : memref<1x8x128xf32, #tpu.memory_space<vmem>>, vector<1x8x128xf32>
    %54 = vector.shape_cast %53 : vector<1x8x128xf32> to vector<8x128xf32>
    %55 = vector.shape_cast %52 : vector<8x128xf32> to vector<1x8x128xf32>
    tpu.vector_store %arg7[%c0_50, %c0_51, %c0_52], %55 {strides = array<i32>} : memref<1x8x128xf32, #tpu.memory_space<vmem>>, vector<1x8x128xf32>,
    %cst_53 = arith.constant dense<0.000000e+00> : vector<128xf32>
    %56 = vector.multi_reduction <add>, %50, %cst_53 [0] : vector<288x128xf32> to vector<128xf32>
    %57 = vector.shape_cast %56 : vector<128xf32> to vector<1x128xf32>
    %c0_54 = arith.constant 0 : index
    %c0_55 = arith.constant 0 : index
    %c0_56 = arith.constant 0 : index
    %58 = vector.load %arg7[%c0_54, %c0_55, %c0_56] : memref<1x8x128xf32, #tpu.memory_space<vmem>>, vector<1x1x128xf32>
    %59 = vector.shape_cast %58 : vector<1x1x128xf32> to vector<1x128xf32>
    %60 = vector.shape_cast %57 : vector<1x128xf32> to vector<1x1x128xf32>
    tpu.vector_store %arg7[%c0_54, %c0_55, %c0_56], %60 {strides = array<i32>} : memref<1x8x128xf32, #tpu.memory_space<vmem>>, vector<1x1x128xf32>,
    %61 = arith.mulf %50, %50 : vector<288x128xf32>
    %cst_57 = arith.constant dense<0.000000e+00> : vector<128xf32>
    %62 = vector.multi_reduction <add>, %61, %cst_57 [0] : vector<288x128xf32> to vector<128xf32>
    %63 = vector.shape_cast %62 : vector<128xf32> to vector<1x128xf32>
    %c0_58 = arith.constant 0 : index
    %c1_59 = arith.constant 1 : index
    %c0_60 = arith.constant 0 : index
    %64 = vector.load %arg7[%c0_58, %c1_59, %c0_60] : memref<1x8x128xf32, #tpu.memory_space<vmem>>, vector<1x1x128xf32>
    %65 = vector.shape_cast %64 : vector<1x1x128xf32> to vector<1x128xf32>
    %66 = vector.shape_cast %63 : vector<1x128xf32> to vector<1x1x128xf32>
    tpu.vector_store %arg7[%c0_58, %c1_59, %c0_60], %66 {strides = array<i32>} : memref<1x8x128xf32, #tpu.memory_space<vmem>>, vector<1x1x128xf32>,
    return
  }
  func.func @transform_0(%arg0: i32, %arg1: i32) -> (i32, i32) {
    %c2_i32 = arith.constant 2 : i32
    %0 = arith.muli %arg0, %c2_i32 : i32
    %1 = arith.addi %0, %arg1 : i32
    %c0_i32 = arith.constant 0 : i32
    %c0_i32_0 = arith.constant 0 : i32
    return %1, %c0_i32 : i32, i32
  }
  func.func @transform_1(%arg0: i32, %arg1: i32) -> (i32, i32) {
    %c8_i32 = arith.constant 8 : i32
    %0 = arith.muli %arg0, %c8_i32 : i32
    %c1_i32 = arith.constant 1 : i32
    %1 = arith.addi %arg1, %c1_i32 : i32
    %c4_i32 = arith.constant 4 : i32
    %2 = arith.muli %1, %c4_i32 : i32
    %3 = arith.addi %0, %2 : i32
    %c0_i32 = arith.constant 0 : i32
    %c0_i32_0 = arith.constant 0 : i32
    return %3, %c0_i32 : i32, i32
  }
  func.func @transform_2(%arg0: i32, %arg1: i32) -> (i32, i32, i32) {
    %c0_i32 = arith.constant 0 : i32
    %c0_i32_0 = arith.constant 0 : i32
    %c0_i32_1 = arith.constant 0 : i32
    %c0_i32_2 = arith.constant 0 : i32
    return %c0_i32, %c0_i32_0, %c0_i32_1 : i32, i32, i32
  }
  func.func @transform_3(%arg0: i32, %arg1: i32) -> (i32, i32) {
    %c0_i32 = arith.constant 0 : i32
    %c0_i32_0 = arith.constant 0 : i32
    %c0_i32_1 = arith.constant 0 : i32
    return %c0_i32, %c0_i32_0 : i32, i32
  }
  func.func @transform_4(%arg0: i32, %arg1: i32) -> (i32, i32) {
    %c1_i32 = arith.constant 1 : i32
    %0 = arith.muli %arg0, %c1_i32 : i32
    %1 = arith.addi %0, %arg1 : i32
    %c0_i32 = arith.constant 0 : i32
    %c0_i32_0 = arith.constant 0 : i32
    return %1, %c0_i32 : i32, i32
  }
  func.func @transform_5(%arg0: i32, %arg1: i32) -> (i32, i32, i32) {
    %c1_i32 = arith.constant 1 : i32
    %0 = arith.muli %arg0, %c1_i32 : i32
    %1 = arith.addi %0, %arg1 : i32
    %c0_i32 = arith.constant 0 : i32
    %c0_i32_0 = arith.constant 0 : i32
    %c0_i32_1 = arith.constant 0 : i32
    return %1, %c0_i32, %c0_i32_0 : i32, i32, i32
  }
}

module attributes {stable_mosaic.version = 11 : i64} {
  func.func @_bn_relu_kernel(%arg0: i32, %arg1: memref<576x128xf32, #tpu.memory_space<vmem>>, %arg2: memref<1x128xf32, #tpu.memory_space<vmem>>, %arg3: memref<1x128xf32, #tpu.memory_space<vmem>>, %arg4: memref<576x128xf32, #tpu.memory_space<vmem>>) attributes {dimension_semantics = [#tpu.dimension_semantics<parallel>], iteration_bounds = array<i64: 1>, scalar_prefetch = 0 : i64, scratch_operands = 0 : i64, tpu.core_type = #tpu.core_type<tc>, window_params = [{transform_indices = @transform_0, window_bounds = array<i64: 576, 128>}, {pipeline_mode = #tpu.pipeline_mode<synchronous>, transform_indices = @transform_1, window_bounds = array<i64: 1, 128>}, {pipeline_mode = #tpu.pipeline_mode<synchronous>, transform_indices = @transform_2, window_bounds = array<i64: 1, 128>}, {transform_indices = @transform_3, window_bounds = array<i64: 576, 128>}]} {
    %c0 = arith.constant 0 : index
    %c0_0 = arith.constant 0 : index
    %0 = vector.load %arg1[%c0, %c0_0] : memref<576x128xf32, #tpu.memory_space<vmem>>, vector<576x128xf32>
    %c0_1 = arith.constant 0 : index
    %c0_2 = arith.constant 0 : index
    %1 = vector.load %arg2[%c0_1, %c0_2] : memref<1x128xf32, #tpu.memory_space<vmem>>, vector<1x128xf32>
    %2 = vector.broadcast %1 : vector<1x128xf32> to vector<576x128xf32>
    %3 = arith.mulf %0, %2 : vector<576x128xf32>
    %c0_3 = arith.constant 0 : index
    %c0_4 = arith.constant 0 : index
    %4 = vector.load %arg3[%c0_3, %c0_4] : memref<1x128xf32, #tpu.memory_space<vmem>>, vector<1x128xf32>
    %5 = vector.broadcast %4 : vector<1x128xf32> to vector<576x128xf32>
    %6 = arith.addf %3, %5 : vector<576x128xf32>
    %cst = arith.constant 0.000000e+00 : f32
    %7 = vector.broadcast %cst : f32 to vector<576x128xf32>
    %8 = arith.maximumf %6, %7 : vector<576x128xf32>
    %c0_5 = arith.constant 0 : index
    %c0_6 = arith.constant 0 : index
    %9 = vector.load %arg4[%c0_5, %c0_6] : memref<576x128xf32, #tpu.memory_space<vmem>>, vector<576x128xf32>
    tpu.vector_store %arg4[%c0_5, %c0_6], %8 {strides = array<i32>} : memref<576x128xf32, #tpu.memory_space<vmem>>, vector<576x128xf32>,
    return
  }
  func.func @transform_0(%arg0: i32) -> (i32, i32) {
    %c0_i32 = arith.constant 0 : i32
    %c0_i32_0 = arith.constant 0 : i32
    return %arg0, %c0_i32 : i32, i32
  }
  func.func @transform_1(%arg0: i32) -> (i32, i32) {
    %c0_i32 = arith.constant 0 : i32
    %c0_i32_0 = arith.constant 0 : i32
    %c0_i32_1 = arith.constant 0 : i32
    return %c0_i32, %c0_i32_0 : i32, i32
  }
  func.func @transform_2(%arg0: i32) -> (i32, i32) {
    %c0_i32 = arith.constant 0 : i32
    %c0_i32_0 = arith.constant 0 : i32
    %c0_i32_1 = arith.constant 0 : i32
    return %c0_i32, %c0_i32_0 : i32, i32
  }
  func.func @transform_3(%arg0: i32) -> (i32, i32) {
    %c0_i32 = arith.constant 0 : i32
    %c0_i32_0 = arith.constant 0 : i32
    return %arg0, %c0_i32 : i32, i32
  }
}

module attributes {stable_mosaic.version = 11 : i64} {
  func.func @kernel(%arg0: i32, %arg1: i32, %arg2: memref<288x8xf32, #tpu.memory_space<vmem>>, %arg3: memref<72x8xf32, #tpu.memory_space<vmem>>, %arg4: memref<9x8x128xf32, #tpu.memory_space<vmem>>, %arg5: memref<288x1xf32, #tpu.memory_space<vmem>>, %arg6: memref<288x128xf32, #tpu.memory_space<vmem>>, %arg7: memref<1x8x128xf32, #tpu.memory_space<vmem>>, %arg8: memref<360x8xf32, #tpu.memory_space<vmem>>) attributes {dimension_semantics = [#tpu.dimension_semantics<parallel>, #tpu.dimension_semantics<parallel>], iteration_bounds = array<i64: 2, 1>, scalar_prefetch = 0 : i64, scratch_operands = 1 : i64, tpu.core_type = #tpu.core_type<tc>, window_params = [{transform_indices = @transform_0, window_bounds = array<i64: 288, 8>}, {transform_indices = @transform_1, window_bounds = array<i64: 72, 8>}, {pipeline_mode = #tpu.pipeline_mode<synchronous>, transform_indices = @transform_2, window_bounds = array<i64: 9, 8, 128>}, {pipeline_mode = #tpu.pipeline_mode<synchronous>, transform_indices = @transform_3, window_bounds = array<i64: 288, 1>}, {transform_indices = @transform_4, window_bounds = array<i64: 288, 128>}, {transform_indices = @transform_5, window_bounds = array<i64: 1, 8, 128>}]} {
    %c0 = arith.constant 0 : index
    %c0_0 = arith.constant 0 : index
    %0 = vector.load %arg2[%c0, %c0_0] : memref<288x8xf32, #tpu.memory_space<vmem>>, vector<288x8xf32>
    %c0_1 = arith.constant 0 : index
    %c0_2 = arith.constant 0 : index
    %1 = vector.load %arg8[%c0_1, %c0_2] : memref<360x8xf32, #tpu.memory_space<vmem>>, vector<288x8xf32>
    tpu.vector_store %arg8[%c0_1, %c0_2], %0 {strides = array<i32>} : memref<360x8xf32, #tpu.memory_space<vmem>>, vector<288x8xf32>,
    %c0_3 = arith.constant 0 : index
    %c0_4 = arith.constant 0 : index
    %2 = vector.load %arg3[%c0_3, %c0_4] : memref<72x8xf32, #tpu.memory_space<vmem>>, vector<72x8xf32>
    %c288 = arith.constant 288 : index
    %c0_5 = arith.constant 0 : index
    %3 = vector.load %arg8[%c288, %c0_5] : memref<360x8xf32, #tpu.memory_space<vmem>>, vector<72x8xf32>
    tpu.vector_store %arg8[%c288, %c0_5], %2 {strides = array<i32>} : memref<360x8xf32, #tpu.memory_space<vmem>>, vector<72x8xf32>,
    %c0_6 = arith.constant 0 : index
    %c0_7 = arith.constant 0 : index
    %4 = vector.load %arg8[%c0_6, %c0_7] : memref<360x8xf32, #tpu.memory_space<vmem>>, vector<288x8xf32>
    %c0_8 = arith.constant 0 : index
    %c0_9 = arith.constant 0 : index
    %c0_10 = arith.constant 0 : index
    %5 = vector.load %arg4[%c0_8, %c0_9, %c0_10] : memref<9x8x128xf32, #tpu.memory_space<vmem>>, vector<1x8x128xf32>
    %6 = vector.shape_cast %5 : vector<1x8x128xf32> to vector<8x128xf32>
    %cst = arith.constant dense<0.000000e+00> : vector<288x128xf32>
    %7 = tpu.matmul %4, %6, %cst {dimension_numbers = #tpu.dot_dimension_numbers<[1], [0], [0], [1], [0, 0, 1, 1], [], []>} : vector<288x8xf32>, vector<8x128xf32>, vector<288x128xf32> -> vector<288x128xf32>
    %c1 = arith.constant 1 : index
    %c0_11 = arith.constant 0 : index
    %8 = vector.load %arg8[%c1, %c0_11] : memref<360x8xf32, #tpu.memory_space<vmem>>, vector<288x8xf32>
    %c1_12 = arith.constant 1 : index
    %c0_13 = arith.constant 0 : index
    %c0_14 = arith.constant 0 : index
    %9 = vector.load %arg4[%c1_12, %c0_13, %c0_14] : memref<9x8x128xf32, #tpu.memory_space<vmem>>, vector<1x8x128xf32>
    %10 = vector.shape_cast %9 : vector<1x8x128xf32> to vector<8x128xf32>
    %cst_15 = arith.constant dense<0.000000e+00> : vector<288x128xf32>
    %11 = tpu.matmul %8, %10, %cst_15 {dimension_numbers = #tpu.dot_dimension_numbers<[1], [0], [0], [1], [0, 0, 1, 1], [], []>} : vector<288x8xf32>, vector<8x128xf32>, vector<288x128xf32> -> vector<288x128xf32>
    %12 = arith.addf %7, %11 : vector<288x128xf32>
    %c2 = arith.constant 2 : index
    %c0_16 = arith.constant 0 : index
    %13 = vector.load %arg8[%c2, %c0_16] : memref<360x8xf32, #tpu.memory_space<vmem>>, vector<288x8xf32>
    %c2_17 = arith.constant 2 : index
    %c0_18 = arith.constant 0 : index
    %c0_19 = arith.constant 0 : index
    %14 = vector.load %arg4[%c2_17, %c0_18, %c0_19] : memref<9x8x128xf32, #tpu.memory_space<vmem>>, vector<1x8x128xf32>
    %15 = vector.shape_cast %14 : vector<1x8x128xf32> to vector<8x128xf32>
    %cst_20 = arith.constant dense<0.000000e+00> : vector<288x128xf32>
    %16 = tpu.matmul %13, %15, %cst_20 {dimension_numbers = #tpu.dot_dimension_numbers<[1], [0], [0], [1], [0, 0, 1, 1], [], []>} : vector<288x8xf32>, vector<8x128xf32>, vector<288x128xf32> -> vector<288x128xf32>
    %17 = arith.addf %12, %16 : vector<288x128xf32>
    %c18 = arith.constant 18 : index
    %c0_21 = arith.constant 0 : index
    %18 = vector.load %arg8[%c18, %c0_21] : memref<360x8xf32, #tpu.memory_space<vmem>>, vector<288x8xf32>
    %c3 = arith.constant 3 : index
    %c0_22 = arith.constant 0 : index
    %c0_23 = arith.constant 0 : index
    %19 = vector.load %arg4[%c3, %c0_22, %c0_23] : memref<9x8x128xf32, #tpu.memory_space<vmem>>, vector<1x8x128xf32>
    %20 = vector.shape_cast %19 : vector<1x8x128xf32> to vector<8x128xf32>
    %cst_24 = arith.constant dense<0.000000e+00> : vector<288x128xf32>
    %21 = tpu.matmul %18, %20, %cst_24 {dimension_numbers = #tpu.dot_dimension_numbers<[1], [0], [0], [1], [0, 0, 1, 1], [], []>} : vector<288x8xf32>, vector<8x128xf32>, vector<288x128xf32> -> vector<288x128xf32>
    %22 = arith.addf %17, %21 : vector<288x128xf32>
    %c19 = arith.constant 19 : index
    %c0_25 = arith.constant 0 : index
    %23 = vector.load %arg8[%c19, %c0_25] : memref<360x8xf32, #tpu.memory_space<vmem>>, vector<288x8xf32>
    %c4 = arith.constant 4 : index
    %c0_26 = arith.constant 0 : index
    %c0_27 = arith.constant 0 : index
    %24 = vector.load %arg4[%c4, %c0_26, %c0_27] : memref<9x8x128xf32, #tpu.memory_space<vmem>>, vector<1x8x128xf32>
    %25 = vector.shape_cast %24 : vector<1x8x128xf32> to vector<8x128xf32>
    %cst_28 = arith.constant dense<0.000000e+00> : vector<288x128xf32>
    %26 = tpu.matmul %23, %25, %cst_28 {dimension_numbers = #tpu.dot_dimension_numbers<[1], [0], [0], [1], [0, 0, 1, 1], [], []>} : vector<288x8xf32>, vector<8x128xf32>, vector<288x128xf32> -> vector<288x128xf32>
    %27 = arith.addf %22, %26 : vector<288x128xf32>
    %c20 = arith.constant 20 : index
    %c0_29 = arith.constant 0 : index
    %28 = vector.load %arg8[%c20, %c0_29] : memref<360x8xf32, #tpu.memory_space<vmem>>, vector<288x8xf32>
    %c5 = arith.constant 5 : index
    %c0_30 = arith.constant 0 : index
    %c0_31 = arith.constant 0 : index
    %29 = vector.load %arg4[%c5, %c0_30, %c0_31] : memref<9x8x128xf32, #tpu.memory_space<vmem>>, vector<1x8x128xf32>
    %30 = vector.shape_cast %29 : vector<1x8x128xf32> to vector<8x128xf32>
    %cst_32 = arith.constant dense<0.000000e+00> : vector<288x128xf32>
    %31 = tpu.matmul %28, %30, %cst_32 {dimension_numbers = #tpu.dot_dimension_numbers<[1], [0], [0], [1], [0, 0, 1, 1], [], []>} : vector<288x8xf32>, vector<8x128xf32>, vector<288x128xf32> -> vector<288x128xf32>
    %32 = arith.addf %27, %31 : vector<288x128xf32>
    %c36 = arith.constant 36 : index
    %c0_33 = arith.constant 0 : index
    %33 = vector.load %arg8[%c36, %c0_33] : memref<360x8xf32, #tpu.memory_space<vmem>>, vector<288x8xf32>
    %c6 = arith.constant 6 : index
    %c0_34 = arith.constant 0 : index
    %c0_35 = arith.constant 0 : index
    %34 = vector.load %arg4[%c6, %c0_34, %c0_35] : memref<9x8x128xf32, #tpu.memory_space<vmem>>, vector<1x8x128xf32>
    %35 = vector.shape_cast %34 : vector<1x8x128xf32> to vector<8x128xf32>
    %cst_36 = arith.constant dense<0.000000e+00> : vector<288x128xf32>
    %36 = tpu.matmul %33, %35, %cst_36 {dimension_numbers = #tpu.dot_dimension_numbers<[1], [0], [0], [1], [0, 0, 1, 1], [], []>} : vector<288x8xf32>, vector<8x128xf32>, vector<288x128xf32> -> vector<288x128xf32>
    %37 = arith.addf %32, %36 : vector<288x128xf32>
    %c37 = arith.constant 37 : index
    %c0_37 = arith.constant 0 : index
    %38 = vector.load %arg8[%c37, %c0_37] : memref<360x8xf32, #tpu.memory_space<vmem>>, vector<288x8xf32>
    %c7 = arith.constant 7 : index
    %c0_38 = arith.constant 0 : index
    %c0_39 = arith.constant 0 : index
    %39 = vector.load %arg4[%c7, %c0_38, %c0_39] : memref<9x8x128xf32, #tpu.memory_space<vmem>>, vector<1x8x128xf32>
    %40 = vector.shape_cast %39 : vector<1x8x128xf32> to vector<8x128xf32>
    %cst_40 = arith.constant dense<0.000000e+00> : vector<288x128xf32>
    %41 = tpu.matmul %38, %40, %cst_40 {dimension_numbers = #tpu.dot_dimension_numbers<[1], [0], [0], [1], [0, 0, 1, 1], [], []>} : vector<288x8xf32>, vector<8x128xf32>, vector<288x128xf32> -> vector<288x128xf32>
    %42 = arith.addf %37, %41 : vector<288x128xf32>
    %c38 = arith.constant 38 : index
    %c0_41 = arith.constant 0 : index
    %43 = vector.load %arg8[%c38, %c0_41] : memref<360x8xf32, #tpu.memory_space<vmem>>, vector<288x8xf32>
    %c8 = arith.constant 8 : index
    %c0_42 = arith.constant 0 : index
    %c0_43 = arith.constant 0 : index
    %44 = vector.load %arg4[%c8, %c0_42, %c0_43] : memref<9x8x128xf32, #tpu.memory_space<vmem>>, vector<1x8x128xf32>
    %45 = vector.shape_cast %44 : vector<1x8x128xf32> to vector<8x128xf32>
    %cst_44 = arith.constant dense<0.000000e+00> : vector<288x128xf32>
    %46 = tpu.matmul %43, %45, %cst_44 {dimension_numbers = #tpu.dot_dimension_numbers<[1], [0], [0], [1], [0, 0, 1, 1], [], []>} : vector<288x8xf32>, vector<8x128xf32>, vector<288x128xf32> -> vector<288x128xf32>
    %47 = arith.addf %42, %46 : vector<288x128xf32>
    %c0_45 = arith.constant 0 : index
    %c0_46 = arith.constant 0 : index
    %48 = vector.load %arg5[%c0_45, %c0_46] : memref<288x1xf32, #tpu.memory_space<vmem>>, vector<288x1xf32>
    %49 = vector.broadcast %48 : vector<288x1xf32> to vector<288x128xf32>
    %50 = arith.mulf %47, %49 : vector<288x128xf32>
    %c0_47 = arith.constant 0 : index
    %c0_48 = arith.constant 0 : index
    %51 = vector.load %arg6[%c0_47, %c0_48] : memref<288x128xf32, #tpu.memory_space<vmem>>, vector<288x128xf32>
    tpu.vector_store %arg6[%c0_47, %c0_48], %50 {strides = array<i32>} : memref<288x128xf32, #tpu.memory_space<vmem>>, vector<288x128xf32>,
    %cst_49 = arith.constant 0.000000e+00 : f32
    %52 = vector.broadcast %cst_49 : f32 to vector<8x128xf32>
    %c0_50 = arith.constant 0 : index
    %c0_51 = arith.constant 0 : index
    %c0_52 = arith.constant 0 : index
    %53 = vector.load %arg7[%c0_50, %c0_51, %c0_52] : memref<1x8x128xf32, #tpu.memory_space<vmem>>, vector<1x8x128xf32>
    %54 = vector.shape_cast %53 : vector<1x8x128xf32> to vector<8x128xf32>
    %55 = vector.shape_cast %52 : vector<8x128xf32> to vector<1x8x128xf32>
    tpu.vector_store %arg7[%c0_50, %c0_51, %c0_52], %55 {strides = array<i32>} : memref<1x8x128xf32, #tpu.memory_space<vmem>>, vector<1x8x128xf32>,
    %cst_53 = arith.constant dense<0.000000e+00> : vector<128xf32>
    %56 = vector.multi_reduction <add>, %50, %cst_53 [0] : vector<288x128xf32> to vector<128xf32>
    %57 = vector.shape_cast %56 : vector<128xf32> to vector<1x128xf32>
    %c0_54 = arith.constant 0 : index
    %c0_55 = arith.constant 0 : index
    %c0_56 = arith.constant 0 : index
    %58 = vector.load %arg7[%c0_54, %c0_55, %c0_56] : memref<1x8x128xf32, #tpu.memory_space<vmem>>, vector<1x1x128xf32>
    %59 = vector.shape_cast %58 : vector<1x1x128xf32> to vector<1x128xf32>
    %60 = vector.shape_cast %57 : vector<1x128xf32> to vector<1x1x128xf32>
    tpu.vector_store %arg7[%c0_54, %c0_55, %c0_56], %60 {strides = array<i32>} : memref<1x8x128xf32, #tpu.memory_space<vmem>>, vector<1x1x128xf32>,
    %61 = arith.mulf %50, %50 : vector<288x128xf32>
    %cst_57 = arith.constant dense<0.000000e+00> : vector<128xf32>
    %62 = vector.multi_reduction <add>, %61, %cst_57 [0] : vector<288x128xf32> to vector<128xf32>
    %63 = vector.shape_cast %62 : vector<128xf32> to vector<1x128xf32>
    %c0_58 = arith.constant 0 : index
    %c1_59 = arith.constant 1 : index
    %c0_60 = arith.constant 0 : index
    %64 = vector.load %arg7[%c0_58, %c1_59, %c0_60] : memref<1x8x128xf32, #tpu.memory_space<vmem>>, vector<1x1x128xf32>
    %65 = vector.shape_cast %64 : vector<1x1x128xf32> to vector<1x128xf32>
    %66 = vector.shape_cast %63 : vector<1x128xf32> to vector<1x1x128xf32>
    tpu.vector_store %arg7[%c0_58, %c1_59, %c0_60], %66 {strides = array<i32>} : memref<1x8x128xf32, #tpu.memory_space<vmem>>, vector<1x1x128xf32>,
    return
  }
  func.func @transform_0(%arg0: i32, %arg1: i32) -> (i32, i32) {
    %c2_i32 = arith.constant 2 : i32
    %0 = arith.muli %arg0, %c2_i32 : i32
    %1 = arith.addi %0, %arg1 : i32
    %c0_i32 = arith.constant 0 : i32
    %c0_i32_0 = arith.constant 0 : i32
    return %1, %c0_i32 : i32, i32
  }
  func.func @transform_1(%arg0: i32, %arg1: i32) -> (i32, i32) {
    %c8_i32 = arith.constant 8 : i32
    %0 = arith.muli %arg0, %c8_i32 : i32
    %c1_i32 = arith.constant 1 : i32
    %1 = arith.addi %arg1, %c1_i32 : i32
    %c4_i32 = arith.constant 4 : i32
    %2 = arith.muli %1, %c4_i32 : i32
    %3 = arith.addi %0, %2 : i32
    %c0_i32 = arith.constant 0 : i32
    %c0_i32_0 = arith.constant 0 : i32
    return %3, %c0_i32 : i32, i32
  }
  func.func @transform_2(%arg0: i32, %arg1: i32) -> (i32, i32, i32) {
    %c0_i32 = arith.constant 0 : i32
    %c0_i32_0 = arith.constant 0 : i32
    %c0_i32_1 = arith.constant 0 : i32
    %c0_i32_2 = arith.constant 0 : i32
    return %c0_i32, %c0_i32_0, %c0_i32_1 : i32, i32, i32
  }
  func.func @transform_3(%arg0: i32, %arg1: i32) -> (i32, i32) {
    %c0_i32 = arith.constant 0 : i32
    %c0_i32_0 = arith.constant 0 : i32
    %c0_i32_1 = arith.constant 0 : i32
    return %c0_i32, %c0_i32_0 : i32, i32
  }
  func.func @transform_4(%arg0: i32, %arg1: i32) -> (i32, i32) {
    %c1_i32 = arith.constant 1 : i32
    %0 = arith.muli %arg0, %c1_i32 : i32
    %1 = arith.addi %0, %arg1 : i32
    %c0_i32 = arith.constant 0 : i32
    %c0_i32_0 = arith.constant 0 : i32
    return %1, %c0_i32 : i32, i32
  }
  func.func @transform_5(%arg0: i32, %arg1: i32) -> (i32, i32, i32) {
    %c1_i32 = arith.constant 1 : i32
    %0 = arith.muli %arg0, %c1_i32 : i32
    %1 = arith.addi %0, %arg1 : i32
    %c0_i32 = arith.constant 0 : i32
    %c0_i32_0 = arith.constant 0 : i32
    %c0_i32_1 = arith.constant 0 : i32
    return %1, %c0_i32, %c0_i32_0 : i32, i32, i32
  }
}

</mosaic_0001>

<bundles_post_ra>
// kernel: _lambda_.5
= control target key start
LH: loop header
LB: loop body
LE: loop exit
PB: predicated region body
PF: predicated region fallthrough
CT: control target
= control target key end

     0   :  { %s1000_s0 = inlined_call_operand.vmem [shape: f32[576,128], index: 0, kind: input, shape index: {}]   ;;  %s1001_s1 = inlined_call_operand.vmem [shape: f32[1,128], index: 1, kind: input, shape index: {}]   ;;  %s1002_s2 = inlined_call_operand.vmem [shape: f32[1,128], index: 2, kind: input, shape index: {}]   ;;  %s1003_s3 = inlined_call_operand.vmem [shape: f32[576,128], index: 3, kind: output, shape index: {}]  }
   0x1   :  { %v14_v0 = vld [vmem:[%s1000_s0] sm:$0xff]  ;;  %v15_v4 = vld [vmem:[%s1000_s0 + $0x8] sm:$0xff]  ;;  %v16_v5 = vld [vmem:[%s1000_s0 + $0x10] sm:$0xff] }
   0x2   :  { %v420_v1 = vld [vmem:[%s1001_s1] ss:$0 sm:$0xff]  ;;  %v17_v6 = vld [vmem:[%s1000_s0 + $0x18] sm:$0xff]  ;;  %v19_v11 = vld [vmem:[%s1000_s0 + $0x28] sm:$0xff] }
   0x3   :  { %v425_v2 = vld [vmem:[%s1002_s2] ss:$0 sm:$0xff]  ;;  %v93_v3 = vmul.f32 %v420_v1, %v14_v0  ;;  %v94_v7 = vmul.f32 %v420_v1, %v15_v4  ;;  %v95_v8 = vmul.f32 %v420_v1, %v16_v5  ;;  %v96_v9 = vmul.f32 %v420_v1, %v17_v6  ;;  %v20_v12 = vld [vmem:[%s1000_s0 + $0x30] sm:$0xff]  ;;  %v21_v17 = vld [vmem:[%s1000_s0 + $0x38] sm:$0xff] }
   0x4   :  { %v18_v10 = vld [vmem:[%s1000_s0 + $0x20] sm:$0xff]  ;;  %v98_v15 = vmul.f32 %v420_v1, %v19_v11  ;;  %v99_v16 = vmul.f32 %v420_v1, %v20_v12  ;;  %v100_v21 = vmul.f32 %v420_v1, %v21_v17  ;;  %v23_v27 = vld [vmem:[%s1000_s0 + $0x48] sm:$0xff]  ;;  %v24_v28 = vld [vmem:[%s1000_s0 + $0x50] sm:$0xff] }
   0x5   :  { %v172_v13 = vadd.f32 %v425_v2, %v93_v3  ;;  %v97_v14 = vmul.f32 %v420_v1, %v18_v10  ;;  %v173_v18 = vadd.f32 %v425_v2, %v94_v7  ;;  %v174_v19 = vadd.f32 %v425_v2, %v95_v8  ;;  %v22_v22 = vld [vmem:[%s1000_s0 + $0x40] sm:$0xff]  ;;  %v25_v29 = vld [vmem:[%s1000_s0 + $0x58] sm:$0xff]  ;;  %v27_v35 = vld [vmem:[%s1000_s0 + $0x68] sm:$0xff] }
   0x6   :  { %v175_v20 = vadd.f32 %v425_v2, %v96_v9  ;;  %v177_v25 = vadd.f32 %v425_v2, %v98_v15  ;;  %v178_v26 = vadd.f32 %v425_v2, %v99_v16  ;;  %v179_v33 = vadd.f32 %v425_v2, %v100_v21  ;;  %v26_v34 = vld [vmem:[%s1000_s0 + $0x60] sm:$0xff]  ;;  %v28_v36 = vld [vmem:[%s1000_s0 + $0x70] sm:$0xff]  ;;  %v29_v41 = vld [vmem:[%s1000_s0 + $0x78] sm:$0xff] }
   0x7   :  { %v244_v23 = vmax.f32 %v172_v13, 0.0  ;;  %v176_v24 = vadd.f32 %v425_v2, %v97_v14  ;;  %v245_v30 = vmax.f32 %v173_v18, 0.0  ;;  %v246_v31 = vmax.f32 %v174_v19, 0.0  ;;  %v30_v54 = vld [vmem:[%s1000_s0 + $0x80] sm:$0xff]  ;;  %v31_v59 = vld [vmem:[%s1000_s0 + $0x88] sm:$0xff]  ;;  %v32_v60 = vld [vmem:[%s1000_s0 + $0x90] sm:$0xff] }
   0x8   :  { %v247_v32 = vmax.f32 %v175_v20, 0.0  ;;  %v249_v38 = vmax.f32 %v177_v25, 0.0  ;;  %v250_v39 = vmax.f32 %v178_v26, 0.0  ;;  %v101_v40 = vmul.f32 %v420_v1, %v22_v22  ;;  %v33_v61 = vld [vmem:[%s1000_s0 + $0x98] sm:$0xff]  ;;  %v34_v4 = vld [vmem:[%s1000_s0 + $0xa0] sm:$0xff]  ;;  %v35_v5 = vld [vmem:[%s1000_s0 + $0xa8] sm:$0xff] }
   0x9   :  { %316 = vst [vmem:[%s1003_s3] sm:$0xff] %v244_v23  ;;  %v248_v37 = vmax.f32 %v176_v24, 0.0  ;;  %317 = vst [vmem:[%s1003_s3 + $0x8] sm:$0xff] %v245_v30  ;;  %v251_v42 = vmax.f32 %v179_v33, 0.0  ;;  %v102_v43 = vmul.f32 %v420_v1, %v23_v27  ;;  %v103_v44 = vmul.f32 %v420_v1, %v24_v28  ;;  %v36_v6 = vld [vmem:[%s1000_s0 + $0xb0] sm:$0xff]  ;;  %v37_v11 = vld [vmem:[%s1000_s0 + $0xb8] sm:$0xff] }
   0xa   :  { %318 = vst [vmem:[%s1003_s3 + $0x10] sm:$0xff] %v246_v31  ;;  %319 = vst [vmem:[%s1003_s3 + $0x18] sm:$0xff] %v247_v32  ;;  %v104_v45 = vmul.f32 %v420_v1, %v25_v29  ;;  %v180_v46 = vadd.f32 %v425_v2, %v101_v40  ;;  %v105_v47 = vmul.f32 %v420_v1, %v26_v34  ;;  %v38_v24 = vld [vmem:[%s1000_s0 + $0xc0] sm:$0xff]  ;;  %v39_v29 = vld [vmem:[%s1000_s0 + $0xc8] sm:$0xff] }
   0xb   :  { %320 = vst [vmem:[%s1003_s3 + $0x20] sm:$0xff] %v248_v37  ;;  %321 = vst [vmem:[%s1003_s3 + $0x28] sm:$0xff] %v249_v38  ;;  %v106_v48 = vmul.f32 %v420_v1, %v27_v35  ;;  %v107_v49 = vmul.f32 %v420_v1, %v28_v36  ;;  %v181_v50 = vadd.f32 %v425_v2, %v102_v43  ;;  %v40_v30 = vld [vmem:[%s1000_s0 + $0xd0] sm:$0xff]  ;;  %v41_v31 = vld [vmem:[%s1000_s0 + $0xd8] sm:$0xff] }
   0xc   :  { %322 = vst [vmem:[%s1003_s3 + $0x30] sm:$0xff] %v250_v39  ;;  %323 = vst [vmem:[%s1003_s3 + $0x38] sm:$0xff] %v251_v42  ;;  %v182_v51 = vadd.f32 %v425_v2, %v103_v44  ;;  %v183_v52 = vadd.f32 %v425_v2, %v104_v45  ;;  %v108_v53 = vmul.f32 %v420_v1, %v29_v41  ;;  %v252_v55 = vmax.f32 %v180_v46, 0.0  ;;  %v42_v36 = vld [vmem:[%s1000_s0 + $0xe0] sm:$0xff]  ;;  %v43_v37 = vld [vmem:[%s1000_s0 + $0xe8] sm:$0xff] }
   0xd   :  { %v184_v56 = vadd.f32 %v425_v2, %v105_v47  ;;  %v185_v57 = vadd.f32 %v425_v2, %v106_v48  ;;  %v186_v58 = vadd.f32 %v425_v2, %v107_v49  ;;  %v253_v62 = vmax.f32 %v181_v50, 0.0  ;;  %v44_v38 = vld [vmem:[%s1000_s0 + $0xf0] sm:$0xff]  ;;  %v45_v43 = vld [vmem:[%s1000_s0 + $0xf8] sm:$0xff] }
   0xe   :  { %v254_v63 = vmax.f32 %v182_v51, 0.0  ;;  %v255_v0 = vmax.f32 %v183_v52, 0.0  ;;  %v187_v3 = vadd.f32 %v425_v2, %v108_v53  ;;  %324 = vst [vmem:[%s1003_s3 + $0x40] sm:$0xff] %v252_v55  ;;  %v109_v10 = vmul.f32 %v420_v1, %v30_v54 }
   0xf   :  { %v256_v7 = vmax.f32 %v184_v56, 0.0  ;;  %v257_v8 = vmax.f32 %v185_v57, 0.0  ;;  %v258_v9 = vmax.f32 %v186_v58, 0.0  ;;  %325 = vst [vmem:[%s1003_s3 + $0x48] sm:$0xff] %v253_v62  ;;  %v110_v13 = vmul.f32 %v420_v1, %v31_v59  ;;  %v46_v56 = vld [vmem:[%s1000_s0 + $0x100] sm:$0xff]  ;;  %v48_v62 = vld [vmem:[%s1000_s0 + $0x110] sm:$0xff] }
  0x10   :  { %326 = vst [vmem:[%s1003_s3 + $0x50] sm:$0xff] %v254_v63  ;;  %327 = vst [vmem:[%s1003_s3 + $0x58] sm:$0xff] %v255_v0  ;;  %v259_v12 = vmax.f32 %v187_v3, 0.0  ;;  %v111_v14 = vmul.f32 %v420_v1, %v32_v60  ;;  %v112_v15 = vmul.f32 %v420_v1, %v33_v61  ;;  %v188_v16 = vadd.f32 %v425_v2, %v109_v10  ;;  %v47_v61 = vld [vmem:[%s1000_s0 + $0x108] sm:$0xff]  ;;  %v49_v63 = vld [vmem:[%s1000_s0 + $0x118] sm:$0xff] }
  0x11   :  { %328 = vst [vmem:[%s1003_s3 + $0x60] sm:$0xff] %v256_v7  ;;  %329 = vst [vmem:[%s1003_s3 + $0x68] sm:$0xff] %v257_v8  ;;  %v113_v17 = vmul.f32 %v420_v1, %v34_v4  ;;  %v114_v18 = vmul.f32 %v420_v1, %v35_v5  ;;  %v115_v19 = vmul.f32 %v420_v1, %v36_v6  ;;  %v50_v6 = vld [vmem:[%s1000_s0 + $0x120] sm:$0xff]  ;;  %v51_v7 = vld [vmem:[%s1000_s0 + $0x128] sm:$0xff] }
  0x12   :  { %330 = vst [vmem:[%s1003_s3 + $0x70] sm:$0xff] %v258_v9  ;;  %331 = vst [vmem:[%s1003_s3 + $0x78] sm:$0xff] %v259_v12  ;;  %v189_v20 = vadd.f32 %v425_v2, %v110_v13  ;;  %v190_v21 = vadd.f32 %v425_v2, %v111_v14  ;;  %v191_v22 = vadd.f32 %v425_v2, %v112_v15  ;;  %v260_v25 = vmax.f32 %v188_v16, 0.0  ;;  %v52_v8 = vld [vmem:[%s1000_s0 + $0x130] sm:$0xff]  ;;  %v53_v13 = vld [vmem:[%s1000_s0 + $0x138] sm:$0xff] }
  0x13   :  { %v116_v23 = vmul.f32 %v420_v1, %v37_v11  ;;  %v192_v26 = vadd.f32 %v425_v2, %v113_v17  ;;  %v193_v27 = vadd.f32 %v425_v2, %v114_v18  ;;  %v194_v28 = vadd.f32 %v425_v2, %v115_v19 }
  0x14   :  { %v261_v32 = vmax.f32 %v189_v20, 0.0  ;;  %v262_v33 = vmax.f32 %v190_v21, 0.0  ;;  %v263_v34 = vmax.f32 %v191_v22, 0.0  ;;  %332 = vst [vmem:[%s1003_s3 + $0x80] sm:$0xff] %v260_v25  ;;  %v117_v42 = vmul.f32 %v420_v1, %v38_v24 }
  0x15   :  { %v195_v35 = vadd.f32 %v425_v2, %v116_v23  ;;  %v264_v39 = vmax.f32 %v192_v26, 0.0  ;;  %v265_v40 = vmax.f32 %v193_v27, 0.0  ;;  %v266_v41 = vmax.f32 %v194_v28, 0.0  ;;  %v54_v26 = vld [vmem:[%s1000_s0 + $0x140] sm:$0xff] }
  0x16   :  { %333 = vst [vmem:[%s1003_s3 + $0x88] sm:$0xff] %v261_v32  ;;  %334 = vst [vmem:[%s1003_s3 + $0x90] sm:$0xff] %v262_v33  ;;  %v118_v45 = vmul.f32 %v420_v1, %v39_v29  ;;  %v119_v46 = vmul.f32 %v420_v1, %v40_v30  ;;  %v120_v47 = vmul.f32 %v420_v1, %v41_v31  ;;  %v55_v31 = vld [vmem:[%s1000_s0 + $0x148] sm:$0xff]  ;;  %v56_v32 = vld [vmem:[%s1000_s0 + $0x150] sm:$0xff] }
  0x17   :  { %335 = vst [vmem:[%s1003_s3 + $0x98] sm:$0xff] %v263_v34  ;;  %v267_v44 = vmax.f32 %v195_v35, 0.0  ;;  %336 = vst [vmem:[%s1003_s3 + $0xa0] sm:$0xff] %v264_v39  ;;  %v196_v48 = vadd.f32 %v425_v2, %v117_v42  ;;  %v121_v49 = vmul.f32 %v420_v1, %v42_v36  ;;  %v122_v50 = vmul.f32 %v420_v1, %v43_v37  ;;  %v57_v33 = vld [vmem:[%s1000_s0 + $0x158] sm:$0xff]  ;;  %v59_v39 = vld [vmem:[%s1000_s0 + $0x168] sm:$0xff] }
  0x18   :  { %337 = vst [vmem:[%s1003_s3 + $0xa8] sm:$0xff] %v265_v40  ;;  %338 = vst [vmem:[%s1003_s3 + $0xb0] sm:$0xff] %v266_v41  ;;  %v123_v51 = vmul.f32 %v420_v1, %v44_v38  ;;  %v197_v52 = vadd.f32 %v425_v2, %v118_v45  ;;  %v198_v53 = vadd.f32 %v425_v2, %v119_v46  ;;  %v58_v38 = vld [vmem:[%s1000_s0 + $0x160] sm:$0xff]  ;;  %v60_v40 = vld [vmem:[%s1000_s0 + $0x170] sm:$0xff] }
  0x19   :  { %339 = vst [vmem:[%s1003_s3 + $0xb8] sm:$0xff] %v267_v44  ;;  %v199_v54 = vadd.f32 %v425_v2, %v120_v47  ;;  %v124_v55 = vmul.f32 %v420_v1, %v45_v43  ;;  %v268_v57 = vmax.f32 %v196_v48, 0.0  ;;  %v200_v58 = vadd.f32 %v425_v2, %v121_v49  ;;  %v61_v45 = vld [vmem:[%s1000_s0 + $0x178] sm:$0xff] }
  0x1a   :  { %v201_v59 = vadd.f32 %v425_v2, %v122_v50  ;;  %v202_v60 = vadd.f32 %v425_v2, %v123_v51  ;;  %v269_v0 = vmax.f32 %v197_v52, 0.0  ;;  %v270_v3 = vmax.f32 %v198_v53, 0.0 }
  0x1b   :  { %v271_v4 = vmax.f32 %v199_v54, 0.0  ;;  %v203_v5 = vadd.f32 %v425_v2, %v124_v55  ;;  %340 = vst [vmem:[%s1003_s3 + $0xc0] sm:$0xff] %v268_v57  ;;  %v272_v9 = vmax.f32 %v200_v58, 0.0  ;;  %v125_v12 = vmul.f32 %v420_v1, %v46_v56  ;;  %v62_v58 = vld [vmem:[%s1000_s0 + $0x180] sm:$0xff] }
  0x1c   :  { %v273_v10 = vmax.f32 %v201_v59, 0.0  ;;  %v274_v11 = vmax.f32 %v202_v60, 0.0  ;;  %341 = vst [vmem:[%s1003_s3 + $0xc8] sm:$0xff] %v269_v0  ;;  %342 = vst [vmem:[%s1003_s3 + $0xd0] sm:$0xff] %v270_v3  ;;  %v126_v15 = vmul.f32 %v420_v1, %v47_v61  ;;  %v127_v16 = vmul.f32 %v420_v1, %v48_v62  ;;  %v64_v0 = vld [vmem:[%s1000_s0 + $0x190] sm:$0xff]  ;;  %v65_v3 = vld [vmem:[%s1000_s0 + $0x198] sm:$0xff] }
  0x1d   :  { %343 = vst [vmem:[%s1003_s3 + $0xd8] sm:$0xff] %v271_v4  ;;  %v275_v14 = vmax.f32 %v203_v5, 0.0  ;;  %v128_v17 = vmul.f32 %v420_v1, %v49_v63  ;;  %344 = vst [vmem:[%s1003_s3 + $0xe0] sm:$0xff] %v272_v9  ;;  %v204_v18 = vadd.f32 %v425_v2, %v125_v12  ;;  %v129_v19 = vmul.f32 %v420_v1, %v50_v6  ;;  %v63_v63 = vld [vmem:[%s1000_s0 + $0x188] sm:$0xff] }
  0x1e   :  { %345 = vst [vmem:[%s1003_s3 + $0xe8] sm:$0xff] %v273_v10  ;;  %346 = vst [vmem:[%s1003_s3 + $0xf0] sm:$0xff] %v274_v11  ;;  %v130_v20 = vmul.f32 %v420_v1, %v51_v7  ;;  %v131_v21 = vmul.f32 %v420_v1, %v52_v8  ;;  %v205_v22 = vadd.f32 %v425_v2, %v126_v15  ;;  %v66_v8 = vld [vmem:[%s1000_s0 + $0x1a0] sm:$0xff]  ;;  %v67_v9 = vld [vmem:[%s1000_s0 + $0x1a8] sm:$0xff] }
  0x1f   :  { %347 = vst [vmem:[%s1003_s3 + $0xf8] sm:$0xff] %v275_v14  ;;  %v206_v23 = vadd.f32 %v425_v2, %v127_v16  ;;  %v207_v24 = vadd.f32 %v425_v2, %v128_v17  ;;  %v132_v25 = vmul.f32 %v420_v1, %v53_v13  ;;  %v276_v27 = vmax.f32 %v204_v18, 0.0  ;;  %v68_v10 = vld [vmem:[%s1000_s0 + $0x1b0] sm:$0xff]  ;;  %v69_v15 = vld [vmem:[%s1000_s0 + $0x1b8] sm:$0xff] }
  0x20   :  { %v208_v28 = vadd.f32 %v425_v2, %v129_v19  ;;  %v209_v29 = vadd.f32 %v425_v2, %v130_v20  ;;  %v210_v30 = vadd.f32 %v425_v2, %v131_v21  ;;  %v277_v34 = vmax.f32 %v205_v22, 0.0 }
  0x21   :  { %v278_v35 = vmax.f32 %v206_v23, 0.0  ;;  %v279_v36 = vmax.f32 %v207_v24, 0.0  ;;  %v211_v37 = vadd.f32 %v425_v2, %v132_v25  ;;  %348 = vst [vmem:[%s1003_s3 + $0x100] sm:$0xff] %v276_v27  ;;  %v133_v44 = vmul.f32 %v420_v1, %v54_v26 }
  0x22   :  { %v280_v41 = vmax.f32 %v208_v28, 0.0  ;;  %v281_v42 = vmax.f32 %v209_v29, 0.0  ;;  %v282_v43 = vmax.f32 %v210_v30, 0.0  ;;  %349 = vst [vmem:[%s1003_s3 + $0x108] sm:$0xff] %v277_v34  ;;  %v134_v47 = vmul.f32 %v420_v1, %v55_v31  ;;  %v70_v28 = vld [vmem:[%s1000_s0 + $0x1c0] sm:$0xff]  ;;  %v72_v34 = vld [vmem:[%s1000_s0 + $0x1d0] sm:$0xff] }
  0x23   :  { %350 = vst [vmem:[%s1003_s3 + $0x110] sm:$0xff] %v278_v35  ;;  %351 = vst [vmem:[%s1003_s3 + $0x118] sm:$0xff] %v279_v36  ;;  %v283_v46 = vmax.f32 %v211_v37, 0.0  ;;  %v135_v48 = vmul.f32 %v420_v1, %v56_v32  ;;  %v136_v49 = vmul.f32 %v420_v1, %v57_v33  ;;  %v212_v50 = vadd.f32 %v425_v2, %v133_v44  ;;  %v71_v33 = vld [vmem:[%s1000_s0 + $0x1c8] sm:$0xff]  ;;  %v73_v35 = vld [vmem:[%s1000_s0 + $0x1d8] sm:$0xff] }
  0x24   :  { %352 = vst [vmem:[%s1003_s3 + $0x120] sm:$0xff] %v280_v41  ;;  %353 = vst [vmem:[%s1003_s3 + $0x128] sm:$0xff] %v281_v42  ;;  %v137_v51 = vmul.f32 %v420_v1, %v58_v38  ;;  %v138_v52 = vmul.f32 %v420_v1, %v59_v39  ;;  %v139_v53 = vmul.f32 %v420_v1, %v60_v40  ;;  %v74_v40 = vld [vmem:[%s1000_s0 + $0x1e0] sm:$0xff]  ;;  %v75_v41 = vld [vmem:[%s1000_s0 + $0x1e8] sm:$0xff] }
  0x25   :  { %354 = vst [vmem:[%s1003_s3 + $0x130] sm:$0xff] %v282_v43  ;;  %355 = vst [vmem:[%s1003_s3 + $0x138] sm:$0xff] %v283_v46  ;;  %v213_v54 = vadd.f32 %v425_v2, %v134_v47  ;;  %v214_v55 = vadd.f32 %v425_v2, %v135_v48  ;;  %v215_v56 = vadd.f32 %v425_v2, %v136_v49  ;;  %v284_v59 = vmax.f32 %v212_v50, 0.0  ;;  %v76_v42 = vld [vmem:[%s1000_s0 + $0x1f0] sm:$0xff]  ;;  %v77_v47 = vld [vmem:[%s1000_s0 + $0x1f8] sm:$0xff] }
  0x26   :  { %v140_v57 = vmul.f32 %v420_v1, %v61_v45  ;;  %v216_v60 = vadd.f32 %v425_v2, %v137_v51  ;;  %v217_v61 = vadd.f32 %v425_v2, %v138_v52  ;;  %v218_v62 = vadd.f32 %v425_v2, %v139_v53 }
  0x27   :  { %v285_v4 = vmax.f32 %v213_v54, 0.0  ;;  %v286_v5 = vmax.f32 %v214_v55, 0.0  ;;  %v287_v6 = vmax.f32 %v215_v56, 0.0  ;;  %356 = vst [vmem:[%s1003_s3 + $0x140] sm:$0xff] %v284_v59  ;;  %v141_v14 = vmul.f32 %v420_v1, %v62_v58 }
  0x28   :  { %v219_v7 = vadd.f32 %v425_v2, %v140_v57  ;;  %v288_v11 = vmax.f32 %v216_v60, 0.0  ;;  %v289_v12 = vmax.f32 %v217_v61, 0.0  ;;  %v290_v13 = vmax.f32 %v218_v62, 0.0  ;;  %v78_v60 = vld [vmem:[%s1000_s0 + $0x200] sm:$0xff] }
  0x29   :  { %357 = vst [vmem:[%s1003_s3 + $0x148] sm:$0xff] %v285_v4  ;;  %358 = vst [vmem:[%s1003_s3 + $0x150] sm:$0xff] %v286_v5  ;;  %v142_v17 = vmul.f32 %v420_v1, %v63_v63  ;;  %v143_v18 = vmul.f32 %v420_v1, %v64_v0  ;;  %v144_v19 = vmul.f32 %v420_v1, %v65_v3  ;;  %v79_v3 = vld [vmem:[%s1000_s0 + $0x208] sm:$0xff]  ;;  %v80_v4 = vld [vmem:[%s1000_s0 + $0x210] sm:$0xff] }
  0x2a   :  { %359 = vst [vmem:[%s1003_s3 + $0x158] sm:$0xff] %v287_v6  ;;  %v291_v16 = vmax.f32 %v219_v7, 0.0  ;;  %360 = vst [vmem:[%s1003_s3 + $0x160] sm:$0xff] %v288_v11  ;;  %v220_v20 = vadd.f32 %v425_v2, %v141_v14  ;;  %v145_v21 = vmul.f32 %v420_v1, %v66_v8  ;;  %v146_v22 = vmul.f32 %v420_v1, %v67_v9  ;;  %v81_v5 = vld [vmem:[%s1000_s0 + $0x218] sm:$0xff]  ;;  %v83_v11 = vld [vmem:[%s1000_s0 + $0x228] sm:$0xff] }
  0x2b   :  { %361 = vst [vmem:[%s1003_s3 + $0x168] sm:$0xff] %v289_v12  ;;  %362 = vst [vmem:[%s1003_s3 + $0x170] sm:$0xff] %v290_v13  ;;  %v147_v23 = vmul.f32 %v420_v1, %v68_v10  ;;  %v221_v24 = vadd.f32 %v425_v2, %v142_v17  ;;  %v222_v25 = vadd.f32 %v425_v2, %v143_v18  ;;  %v82_v10 = vld [vmem:[%s1000_s0 + $0x220] sm:$0xff]  ;;  %v84_v12 = vld [vmem:[%s1000_s0 + $0x230] sm:$0xff] }
  0x2c   :  { %363 = vst [vmem:[%s1003_s3 + $0x178] sm:$0xff] %v291_v16  ;;  %v223_v26 = vadd.f32 %v425_v2, %v144_v19  ;;  %v148_v27 = vmul.f32 %v420_v1, %v69_v15  ;;  %v292_v29 = vmax.f32 %v220_v20, 0.0  ;;  %v224_v30 = vadd.f32 %v425_v2, %v145_v21  ;;  %v85_v17 = vld [vmem:[%s1000_s0 + $0x238] sm:$0xff] }
  0x2d   :  { %v225_v31 = vadd.f32 %v425_v2, %v146_v22  ;;  %v226_v32 = vadd.f32 %v425_v2, %v147_v23  ;;  %v293_v36 = vmax.f32 %v221_v24, 0.0  ;;  %v294_v37 = vmax.f32 %v222_v25, 0.0 }
  0x2e   :  { %v295_v38 = vmax.f32 %v223_v26, 0.0  ;;  %v227_v39 = vadd.f32 %v425_v2, %v148_v27  ;;  %364 = vst [vmem:[%s1003_s3 + $0x180] sm:$0xff] %v292_v29  ;;  %v296_v43 = vmax.f32 %v224_v30, 0.0  ;;  %v149_v46 = vmul.f32 %v420_v1, %v70_v28 }
  0x2f   :  { %v297_v44 = vmax.f32 %v225_v31, 0.0  ;;  %v298_v45 = vmax.f32 %v226_v32, 0.0  ;;  %365 = vst [vmem:[%s1003_s3 + $0x188] sm:$0xff] %v293_v36  ;;  %366 = vst [vmem:[%s1003_s3 + $0x190] sm:$0xff] %v294_v37  ;;  %v150_v49 = vmul.f32 %v420_v1, %v71_v33  ;;  %v151_v50 = vmul.f32 %v420_v1, %v72_v34 }
  0x30   :  { %367 = vst [vmem:[%s1003_s3 + $0x198] sm:$0xff] %v295_v38  ;;  %v299_v48 = vmax.f32 %v227_v39, 0.0  ;;  %v152_v51 = vmul.f32 %v420_v1, %v73_v35  ;;  %368 = vst [vmem:[%s1003_s3 + $0x1a0] sm:$0xff] %v296_v43  ;;  %v228_v52 = vadd.f32 %v425_v2, %v149_v46  ;;  %v153_v53 = vmul.f32 %v420_v1, %v74_v40 }
  0x31   :  { %369 = vst [vmem:[%s1003_s3 + $0x1a8] sm:$0xff] %v297_v44  ;;  %370 = vst [vmem:[%s1003_s3 + $0x1b0] sm:$0xff] %v298_v45  ;;  %v154_v54 = vmul.f32 %v420_v1, %v75_v41  ;;  %v155_v55 = vmul.f32 %v420_v1, %v76_v42  ;;  %v229_v56 = vadd.f32 %v425_v2, %v150_v49 }
  0x32   :  { %371 = vst [vmem:[%s1003_s3 + $0x1b8] sm:$0xff] %v299_v48  ;;  %v230_v57 = vadd.f32 %v425_v2, %v151_v50  ;;  %v231_v58 = vadd.f32 %v425_v2, %v152_v51  ;;  %v156_v59 = vmul.f32 %v420_v1, %v77_v47  ;;  %v300_v61 = vmax.f32 %v228_v52, 0.0 }
  0x33   :  { %v232_v62 = vadd.f32 %v425_v2, %v153_v53  ;;  %v233_v63 = vadd.f32 %v425_v2, %v154_v54  ;;  %v234_v0 = vadd.f32 %v425_v2, %v155_v55  ;;  %v301_v6 = vmax.f32 %v229_v56, 0.0 }
  0x34   :  { %v302_v7 = vmax.f32 %v230_v57, 0.0  ;;  %v303_v8 = vmax.f32 %v231_v58, 0.0  ;;  %v235_v9 = vadd.f32 %v425_v2, %v156_v59  ;;  %372 = vst [vmem:[%s1003_s3 + $0x1c0] sm:$0xff] %v300_v61  ;;  %v157_v16 = vmul.f32 %v420_v1, %v78_v60 }
  0x35   :  { %v304_v13 = vmax.f32 %v232_v62, 0.0  ;;  %v305_v14 = vmax.f32 %v233_v63, 0.0  ;;  %v306_v15 = vmax.f32 %v234_v0, 0.0  ;;  %373 = vst [vmem:[%s1003_s3 + $0x1c8] sm:$0xff] %v301_v6  ;;  %v158_v19 = vmul.f32 %v420_v1, %v79_v3 }
  0x36   :  { %374 = vst [vmem:[%s1003_s3 + $0x1d0] sm:$0xff] %v302_v7  ;;  %375 = vst [vmem:[%s1003_s3 + $0x1d8] sm:$0xff] %v303_v8  ;;  %v307_v18 = vmax.f32 %v235_v9, 0.0  ;;  %v159_v20 = vmul.f32 %v420_v1, %v80_v4  ;;  %v160_v21 = vmul.f32 %v420_v1, %v81_v5  ;;  %v236_v22 = vadd.f32 %v425_v2, %v157_v16 }
  0x37   :  { %376 = vst [vmem:[%s1003_s3 + $0x1e0] sm:$0xff] %v304_v13  ;;  %377 = vst [vmem:[%s1003_s3 + $0x1e8] sm:$0xff] %v305_v14  ;;  %v161_v23 = vmul.f32 %v420_v1, %v82_v10  ;;  %v162_v24 = vmul.f32 %v420_v1, %v83_v11  ;;  %v163_v25 = vmul.f32 %v420_v1, %v84_v12 }
  0x38   :  { %378 = vst [vmem:[%s1003_s3 + $0x1f0] sm:$0xff] %v306_v15  ;;  %379 = vst [vmem:[%s1003_s3 + $0x1f8] sm:$0xff] %v307_v18  ;;  %v237_v26 = vadd.f32 %v425_v2, %v158_v19  ;;  %v238_v27 = vadd.f32 %v425_v2, %v159_v20  ;;  %v239_v28 = vadd.f32 %v425_v2, %v160_v21  ;;  %v308_v30 = vmax.f32 %v236_v22, 0.0 }
  0x39   :  { %v164_v29 = vmul.f32 %v420_v1, %v85_v17  ;;  %v240_v31 = vadd.f32 %v425_v2, %v161_v23  ;;  %v241_v32 = vadd.f32 %v425_v2, %v162_v24  ;;  %v242_v33 = vadd.f32 %v425_v2, %v163_v25 }
  0x3a   :  { %v309_v34 = vmax.f32 %v237_v26, 0.0  ;;  %v310_v35 = vmax.f32 %v238_v27, 0.0  ;;  %v311_v36 = vmax.f32 %v239_v28, 0.0  ;;  %380 = vst [vmem:[%s1003_s3 + $0x200] sm:$0xff] %v308_v30 }
  0x3b   :  { %v243_v37 = vadd.f32 %v425_v2, %v164_v29  ;;  %v312_v38 = vmax.f32 %v240_v31, 0.0  ;;  %v313_v39 = vmax.f32 %v241_v32, 0.0  ;;  %v314_v40 = vmax.f32 %v242_v33, 0.0 }
  0x3c   :  { %381 = vst [vmem:[%s1003_s3 + $0x208] sm:$0xff] %v309_v34  ;;  %382 = vst [vmem:[%s1003_s3 + $0x210] sm:$0xff] %v310_v35 }
  0x3d   :  { %383 = vst [vmem:[%s1003_s3 + $0x218] sm:$0xff] %v311_v36  ;;  %v315_v1 = vmax.f32 %v243_v37, 0.0  ;;  %384 = vst [vmem:[%s1003_s3 + $0x220] sm:$0xff] %v312_v38 }
  0x3e   :  { %385 = vst [vmem:[%s1003_s3 + $0x228] sm:$0xff] %v313_v39  ;;  %386 = vst [vmem:[%s1003_s3 + $0x230] sm:$0xff] %v314_v40 }
  0x3f   :  { %387 = vst [vmem:[%s1003_s3 + $0x238] sm:$0xff] %v315_v1 }

// kernel: _lambda_.4
= control target key start
LH: loop header
LB: loop body
LE: loop exit
PB: predicated region body
PF: predicated region fallthrough
CT: control target
= control target key end

     0   :  { %s6308_s18 = smov 0   ;;  %s6310_s19 = smov 0   ;;  %s7354_s0 = inlined_call_operand.vmem [shape: f32[1152,4], index: 0, kind: input, shape index: {}, may-alias: {0,1}]   ;;  %s7355_s1 = inlined_call_operand.vmem [shape: f32[1152,4], index: 1, kind: input, shape index: {}, may-alias: {0,1}]   ;;  %s7356_s2 = inlined_call_operand.vmem [shape: f32[9,4,128], index: 2, kind: input, shape index: {}]   ;;  %s7357_s3 = inlined_call_operand.vmem [shape: f32[288,1], index: 3, kind: input, shape index: {}]   ;;  %s7358_s4 = inlined_call_operand.vmem [shape: f32[576,128], index: 4, kind: output, shape index: {0}]   ;;  %s7359_s5 = inlined_call_operand.vmem [shape: f32[2,8,128], index: 5, kind: output, shape index: {1}]  }
   0x1   :  { %s6312_s20 = smov 0  }
   0x2 LB: > { %s28_s21 = sadd.s32 1, %s6270_s19  ;;  %p4745_p0 = scmp.ge.s32.totalorder %s6274_s20, 1  ;;  %s6274_s20 = sphi %s6312_s20, %s16_s20   ;;  %s6270_s19 = sphi %s6310_s19, %s7361_s19   ;;  %s6266_s18 = sphi %s6308_s18, %s7360_s18  }
   0x3   : > { %p30_p1 = scmp.ge.s32.totalorder %s28_s21, 2  ;;  %p242_p2 = scmp.lt.s32.totalorder %s6274_s20, 3 }
   0x5   : > { %s7363_s21 = smov (%p30_p1, %s28_s21), 0  ;;  %p243_p3 = pnand %p4745_p0, %p242_p2 }
   0x6   : > { %v4753_v0 = vld [vmem:[%s7356_s2 + $0x4] sm:$0xf] (!%p243_p3)  ;;  %vm599_vm0 = vcmask (!%p243_p3), 1043456   ;;  %v6334_v1 = vld [vmem:[%s7356_s2 + $0x10] sm:$0xf] (!%p243_p3)  ;;  %s4747_s26 = smul.u32 (!%p243_p3), 72, %s6266_s18 }
   0x7   : > { %246 = sbr.rel (%p243_p3) target bundleno = 587 (0x24b), region = 36  ;;  %5429 = vmatprep.subr.msk.mxu1 (!%p243_p3), %vm599_vm0, %v4753_v0  ;;  %5653 = vmatprep.subr.msk.mxu0 (!%p243_p3), %vm599_vm0, %v6334_v1  ;;  %v6343_v2 = vld [vmem:[%s7356_s2] sm:$0xf] (!%p243_p3)  ;;  %v6348_v3 = vld [vmem:[%s7356_s2 + $0x14] sm:$0xf] (!%p243_p3)  ;;  %vm361_vm1 = vcmask (!%p243_p3), 31744  }
   0x8   : > { %5430 = vmatpush3.msk.msra.mxu1 (!%p243_p3), %vm599_vm0, %v4753_v0  ;;  %5654 = vmatpush3.msk.msra.mxu0 (!%p243_p3), %vm599_vm0, %v6334_v1  ;;  %p290_p4 = scmp.lt.s32.totalorder (!%p243_p3), %s4747_s26, 143  ;;  %s4749_s10 = sshll.u32 (!%p243_p3), %s6266_s18, 3  ;;  %v6419_v35 = vld [vmem:[%s7356_s2 + $0x18] sm:$0xf] (!%p243_p3)  ;;  %v6429_v37 = vld [vmem:[%s7356_s2 + $0x8] sm:$0xf] (!%p243_p3) }
   0x9   : > { %5485 = vmatprep.subr.msk.mxu1 (!%p243_p3), %vm599_vm0, %v6343_v2  ;;  %5709 = vmatprep.subr.msk.mxu0 (!%p243_p3), %vm599_vm0, %v6348_v3  ;;  %s6421_s13 = sadd.s32 (!%p243_p3), 4, %s4749_s10  ;;  %p320_p6 = scmp.lt.s32.totalorder (!%p243_p3), %s6266_s18, 1 }
   0xa   : > { %s301_s16 = smul.u32 (!%p243_p3), 9, %s6421_s13 }
   0xc   : > { %p302_p5 = scmp.lt.s32.totalorder (!%p243_p3), %s301_s16, 143 }
   0xe   : > { %s7365_s26 = smov (!%p290_p4, %s4747_s26), 143  ;;  %s7367_s16 = smov (!%p302_p5, %s301_s16), 143 }
   0xf   : > { %s4748_s6 = sshll.u32 %s7365_s26, 3  ;;  %s4750_s17 = sshll.u32 %s7367_s16, 3 }
  0x10   : > { %s6360_s9 = scalar_lea.vmem %s7354_s0, %s4748_s6  ;;  %s6475_s24 = scalar_lea.vmem %s7355_s1, %s4750_s17 }
  0x11   : > { %v325_v4 = vld [vmem:[%s6360_s9] sm:$0xff]  ;;  %v326_v5 = vld [vmem:[%s6360_s9 + $0x8] sm:$0xff]  ;;  %v327_v6 = vld [vmem:[%s6360_s9 + $0x10] sm:$0xff]  ;;  %s321_s17 = scalar_select %p320_p6, %s6266_s18, 1 }
  0x12   : > { %362 = vst.msk [vmem:[#allocation2] sm:$0xff] %vm361_vm1, %v325_v4  ;;  %363 = vst.msk [vmem:[#allocation2 + $0x8] sm:$0xff] %vm361_vm1, %v326_v5  ;;  %v328_v7 = vld [vmem:[%s6360_s9 + $0x18] sm:$0xff]  ;;  %v329_v8 = vld [vmem:[%s6360_s9 + $0x20] sm:$0xff]  ;;  %s312_s26 = smul.u32 36, %s6266_s18 }
  0x13   : > { %364 = vst.msk [vmem:[#allocation2 + $0x10] sm:$0xff] %vm361_vm1, %v327_v6  ;;  %v330_v9 = vld [vmem:[%s6360_s9 + $0x28] sm:$0xff]  ;;  %365 = vst.msk [vmem:[#allocation2 + $0x18] sm:$0xff] %vm361_vm1, %v328_v7  ;;  %v331_v10 = vld [vmem:[%s6360_s9 + $0x30] sm:$0xff]  ;;  %s4752_s22 = sshll.u32 %s321_s17, 3 }
  0x14   : > { %366 = vst.msk [vmem:[#allocation2 + $0x20] sm:$0xff] %vm361_vm1, %v329_v8  ;;  %367 = vst.msk [vmem:[#allocation2 + $0x28] sm:$0xff] %vm361_vm1, %v330_v9  ;;  %v332_v11 = vld [vmem:[%s6360_s9 + $0x38] sm:$0xff]  ;;  %v333_v12 = vld [vmem:[%s6360_s9 + $0x40] sm:$0xff]  ;;  %s7220_s25 = scalar_lea.vmem %s7359_s5, %s4752_s22  ;;  %p313_p7 = scmp.lt.s32.totalorder %s312_s26, 71 }
  0x15   : > { %368 = vst.msk [vmem:[#allocation2 + $0x30] sm:$0xff] %vm361_vm1, %v331_v10  ;;  %369 = vst.msk [vmem:[#allocation2 + $0x38] sm:$0xff] %vm361_vm1, %v332_v11  ;;  %v334_v13 = vld [vmem:[%s6360_s9 + $0x48] sm:$0xff]  ;;  %v335_v14 = vld [vmem:[%s6360_s9 + $0x50] sm:$0xff] }
  0x16   : > { %370 = vst.msk [vmem:[#allocation2 + $0x40] sm:$0xff] %vm361_vm1, %v333_v12  ;;  %v336_v15 = vld [vmem:[%s6360_s9 + $0x58] sm:$0xff]  ;;  %371 = vst.msk [vmem:[#allocation2 + $0x48] sm:$0xff] %vm361_vm1, %v334_v13  ;;  %v337_v16 = vld [vmem:[%s6360_s9 + $0x60] sm:$0xff]  ;;  %s7369_s26 = smov (!%p313_p7, %s312_s26), 71 }
  0x17   : > { %372 = vst.msk [vmem:[#allocation2 + $0x50] sm:$0xff] %vm361_vm1, %v335_v14  ;;  %373 = vst.msk [vmem:[#allocation2 + $0x58] sm:$0xff] %vm361_vm1, %v336_v15  ;;  %v338_v17 = vld [vmem:[%s6360_s9 + $0x68] sm:$0xff]  ;;  %v339_v18 = vld [vmem:[%s6360_s9 + $0x70] sm:$0xff]  ;;  %s4751_s18 = sshll.u32 %s7369_s26, 3 }
  0x18   : > { %374 = vst.msk [vmem:[#allocation2 + $0x60] sm:$0xff] %vm361_vm1, %v337_v16  ;;  %375 = vst.msk [vmem:[#allocation2 + $0x68] sm:$0xff] %vm361_vm1, %v338_v17  ;;  %v340_v19 = vld [vmem:[%s6360_s9 + $0x78] sm:$0xff]  ;;  %v341_v20 = vld [vmem:[%s6360_s9 + $0x80] sm:$0xff]  ;;  %s7259_s29 = scalar_lea.vmem %s7358_s4, %s4751_s18 }
  0x19   : > { %376 = vst.msk [vmem:[#allocation2 + $0x70] sm:$0xff] %vm361_vm1, %v339_v18  ;;  %v342_v21 = vld [vmem:[%s6360_s9 + $0x88] sm:$0xff]  ;;  %377 = vst.msk [vmem:[#allocation2 + $0x78] sm:$0xff] %vm361_vm1, %v340_v19  ;;  %v343_v22 = vld [vmem:[%s6360_s9 + $0x90] sm:$0xff] }
  0x1a   : > { %378 = vst.msk [vmem:[#allocation2 + $0x80] sm:$0xff] %vm361_vm1, %v341_v20  ;;  %379 = vst.msk [vmem:[#allocation2 + $0x88] sm:$0xff] %vm361_vm1, %v342_v21  ;;  %v344_v23 = vld [vmem:[%s6360_s9 + $0x98] sm:$0xff]  ;;  %v345_v24 = vld [vmem:[%s6360_s9 + $0xa0] sm:$0xff] }
  0x1b   : > { %380 = vst.msk [vmem:[#allocation2 + $0x90] sm:$0xff] %vm361_vm1, %v343_v22  ;;  %381 = vst.msk [vmem:[#allocation2 + $0x98] sm:$0xff] %vm361_vm1, %v344_v23  ;;  %v346_v25 = vld [vmem:[%s6360_s9 + $0xa8] sm:$0xff]  ;;  %v347_v26 = vld [vmem:[%s6360_s9 + $0xb0] sm:$0xff] }
  0x1c   : > { %382 = vst.msk [vmem:[#allocation2 + $0xa0] sm:$0xff] %vm361_vm1, %v345_v24  ;;  %v348_v27 = vld [vmem:[%s6360_s9 + $0xb8] sm:$0xff]  ;;  %v453_v28 = vld [vmem:[#allocation2 + $0x1] sm:$0xff]  ;;  %v454_v29 = vld [vmem:[#allocation2 + $0x9] sm:$0xff] }
  0x1d   : > { %383 = vst.msk [vmem:[#allocation2 + $0xa8] sm:$0xff] %vm361_vm1, %v346_v25  ;;  %384 = vst.msk [vmem:[#allocation2 + $0xb0] sm:$0xff] %vm361_vm1, %v347_v26  ;;  %v349_v30 = vld [vmem:[%s6360_s9 + $0xc0] sm:$0xff]  ;;  %5431 = vmatprep.mubr.msk.f32.mxu1 %vm361_vm1, %v453_v28  ;;  %v2064_v31 = vld [vmem:[#allocation2 + $0x13] sm:$0xff] }
  0x1e   : > { %385 = vst.msk [vmem:[#allocation2 + $0xb8] sm:$0xff] %vm361_vm1, %v348_v27  ;;  %v2065_v32 = vld [vmem:[#allocation2 + $0x1b] sm:$0xff]  ;;  %v455_v33 = vld [vmem:[#allocation2 + $0x11] sm:$0xff]  ;;  %386 = vst.msk [vmem:[#allocation2 + $0xc0] sm:$0xff] %vm361_vm1, %v349_v30  ;;  %5655 = vmatprep.mubr.msk.f32.mxu0 %vm361_vm1, %v2064_v31  ;;  %5432 = vmatmul.mubr.msk.f32.vlgmr.msra.gmra.mrb[0].mxu1 %vm361_vm1, %v454_v29 }
  0x1f   : > { %v2066_v34 = vld [vmem:[#allocation2 + $0x23] sm:$0xff]  ;;  %5486 = vmatpush3.msk.msra.mxu1 %vm599_vm0, %v6343_v2  ;;  %5656 = vmatmul.mubr.msk.f32.vlgmr.msra.gmra.mrb[0].mxu0 %vm361_vm1, %v2065_v32  ;;  %v456_v36 = vld [vmem:[#allocation2 + $0x19] sm:$0xff]  ;;  %v2067_v38 = vld [vmem:[#allocation2 + $0x2b] sm:$0xff] }
  0x20   : > { %5710 = vmatpush3.msk.msra.mxu0 %vm599_vm0, %v6348_v3  ;;  %5434 = vmatprep.mubr.msk.f32.mxu1 %vm361_vm1, %v455_v33  ;;  %v457_v39 = vld [vmem:[#allocation2 + $0x21] sm:$0xff]  ;;  %v2068_v40 = vld [vmem:[#allocation2 + $0x33] sm:$0xff]  ;;  %v458_v41 = vld [vmem:[#allocation2 + $0x29] sm:$0xff] }
  0x21   : > { %5658 = vmatprep.mubr.msk.f32.mxu0 %vm361_vm1, %v2066_v34  ;;  %5765 = vmatprep.subr.msk.mxu0 %vm599_vm0, %v6419_v35  ;;  %v2069_v42 = vld [vmem:[#allocation2 + $0x3b] sm:$0xff]  ;;  %v459_v43 = vld [vmem:[#allocation2 + $0x31] sm:$0xff]  ;;  %v2070_v44 = vld [vmem:[#allocation2 + $0x43] sm:$0xff] }
  0x22   : > { %5435 = vmatmul.mubr.msk.f32.gmra.mrb[2].mxu1 %vm361_vm1, %v456_v36  ;;  %5541 = vmatprep.subr.msk.mxu1 %vm599_vm0, %v6429_v37  ;;  %v460_v45 = vld [vmem:[#allocation2 + $0x39] sm:$0xff]  ;;  %v2071_v46 = vld [vmem:[#allocation2 + $0x4b] sm:$0xff]  ;;  %v461_v47 = vld [vmem:[#allocation2 + $0x41] sm:$0xff] }
  0x23   : > { %5659 = vmatmul.mubr.msk.f32.gmra.mrb[2].mxu0 %vm361_vm1, %v2067_v38  ;;  %5437 = vmatprep.mubr.msk.f32.mxu1 %vm361_vm1, %v457_v39  ;;  %v2072_v48 = vld [vmem:[#allocation2 + $0x53] sm:$0xff]  ;;  %v462_v49 = vld [vmem:[#allocation2 + $0x49] sm:$0xff]  ;;  %v2073_v50 = vld [vmem:[#allocation2 + $0x5b] sm:$0xff] }
  0x24   : > { %5661 = vmatprep.mubr.msk.f32.mxu0 %vm361_vm1, %v2068_v40  ;;  %v463_v51 = vld [vmem:[#allocation2 + $0x51] sm:$0xff]  ;;  %v350_v52 = vld [vmem:[%s6360_s9 + $0xc8] sm:$0xff]  ;;  %v353_v56 = vld [vmem:[%s6360_s9 + $0xe0] sm:$0xff] }
  0x25   : > { %v2074_v53 = vld [vmem:[#allocation2 + $0x63] sm:$0xff]  ;;  %387 = vst.msk [vmem:[#allocation2 + $0xc8] sm:$0xff] %vm361_vm1, %v350_v52  ;;  %v351_v54 = vld [vmem:[%s6360_s9 + $0xd0] sm:$0xff]  ;;  %v352_v55 = vld [vmem:[%s6360_s9 + $0xd8] sm:$0xff] }
  0x26   : > { %5438 = vmatmul.mubr.msk.f32.gmra.mrb[4].mxu1 %vm361_vm1, %v458_v41  ;;  %388 = vst.msk [vmem:[#allocation2 + $0xd0] sm:$0xff] %vm361_vm1, %v351_v54  ;;  %389 = vst.msk [vmem:[#allocation2 + $0xd8] sm:$0xff] %vm361_vm1, %v352_v55  ;;  %v464_v57 = vld [vmem:[#allocation2 + $0x59] sm:$0xff]  ;;  %v354_v58 = vld [vmem:[%s6360_s9 + $0xe8] sm:$0xff] }
  0x27   : > { %5662 = vmatmul.mubr.msk.f32.gmra.mrb[4].mxu0 %vm361_vm1, %v2069_v42  ;;  %5440 = vmatprep.mubr.msk.f32.mxu1 %vm361_vm1, %v459_v43  ;;  %390 = vst.msk [vmem:[#allocation2 + $0xe0] sm:$0xff] %vm361_vm1, %v353_v56  ;;  %v355_v59 = vld [vmem:[%s6360_s9 + $0xf0] sm:$0xff]  ;;  %v465_v61 = vld [vmem:[#allocation2 + $0x61] sm:$0xff]  ;;  %391 = vst.msk [vmem:[#allocation2 + $0xe8] sm:$0xff] %vm361_vm1, %v354_v58 }
  0x28   : > { %5664 = vmatprep.mubr.msk.f32.mxu0 %vm361_vm1, %v2070_v44  ;;  %v2075_v60 = vld [vmem:[#allocation2 + $0x6b] sm:$0xff]  ;;  %392 = vst.msk [vmem:[#allocation2 + $0xf0] sm:$0xff] %vm361_vm1, %v355_v59  ;;  %v356_v62 = vld [vmem:[%s6360_s9 + $0xf8] sm:$0xff]  ;;  %v357_v0 = vld [vmem:[%s6360_s9 + $0x100] sm:$0xff] }
  0x29   : > { %v2076_v63 = vld [vmem:[#allocation2 + $0x73] sm:$0xff]  ;;  %393 = vst.msk [vmem:[#allocation2 + $0xf8] sm:$0xff] %vm361_vm1, %v356_v62  ;;  %v358_v2 = vld [vmem:[%s6360_s9 + $0x108] sm:$0xff]  ;;  %394 = vst.msk [vmem:[#allocation2 + $0x100] sm:$0xff] %vm361_vm1, %v357_v0 }
  0x2a   : > { %5441 = vmatmul.mubr.msk.f32.gmra.mrb[6].mxu1 %vm361_vm1, %v460_v45  ;;  %v466_v3 = vld [vmem:[#allocation2 + $0x69] sm:$0xff]  ;;  %395 = vst.msk [vmem:[#allocation2 + $0x108] sm:$0xff] %vm361_vm1, %v358_v2  ;;  %v2077_v5 = vld [vmem:[#allocation2 + $0x7b] sm:$0xff]  ;;  %v467_v8 = vld [vmem:[#allocation2 + $0x71] sm:$0xff] }
  0x2b   : > { %5665 = vmatmul.mubr.msk.f32.gmra.mrb[6].mxu0 %vm361_vm1, %v2071_v46  ;;  %5443 = vmatprep.mubr.msk.f32.mxu1 %vm361_vm1, %v461_v47  ;;  %v359_v4 = vld [vmem:[%s6360_s9 + $0x110] sm:$0xff]  ;;  %v360_v6 = vld [vmem:[%s6360_s9 + $0x118] sm:$0xff]  ;;  %v398_v7 = vld [vmem:[%s6475_s24] sm:$0xff] }
  0x2c   : > { %5667 = vmatprep.mubr.msk.f32.mxu0 %vm361_vm1, %v2072_v48  ;;  %396 = vst.msk [vmem:[#allocation2 + $0x110] sm:$0xff] %vm361_vm1, %v359_v4  ;;  %397 = vst.msk [vmem:[#allocation2 + $0x118] sm:$0xff] %vm361_vm1, %v360_v6  ;;  %v2078_v9 = vld [vmem:[#allocation2 + $0x83] sm:$0xff]  ;;  %v468_v10 = vld [vmem:[#allocation2 + $0x79] sm:$0xff] }
  0x2d   : > { %407 = vst.msk [vmem:[#allocation2 + $0x120] sm:$0xff] %vm361_vm1, %v398_v7  ;;  %v2079_v11 = vld [vmem:[#allocation2 + $0x8b] sm:$0xff]  ;;  %v469_v12 = vld [vmem:[#allocation2 + $0x81] sm:$0xff]  ;;  %v2080_v13 = vld [vmem:[#allocation2 + $0x93] sm:$0xff] }
  0x2e   : > { %5444 = vmatmul.mubr.msk.f32.gmra.mrb[8].mxu1 %vm361_vm1, %v462_v49  ;;  %v470_v14 = vld [vmem:[#allocation2 + $0x89] sm:$0xff]  ;;  %v2081_v15 = vld [vmem:[#allocation2 + $0x9b] sm:$0xff]  ;;  %v471_v16 = vld [vmem:[#allocation2 + $0x91] sm:$0xff] }
  0x2f   : > { %5668 = vmatmul.mubr.msk.f32.gmra.mrb[8].mxu0 %vm361_vm1, %v2073_v50  ;;  %5446 = vmatprep.mubr.msk.f32.mxu1 %vm361_vm1, %v463_v51  ;;  %v2494_v17 = vld [vmem:[#allocation2 + $0x14] sm:$0xff]  ;;  %v2495_v19 = vld [vmem:[#allocation2 + $0x1c] sm:$0xff]  ;;  %v6504_v21 = vld [vmem:[#allocation2 + $0x24] sm:$0xff] }
  0x30   : > { %5670 = vmatprep.mubr.msk.f32.mxu0 %vm361_vm1, %v2074_v53  ;;  %v472_v18 = vld [vmem:[#allocation2 + $0x99] sm:$0xff]  ;;  %v473_v20 = vld [vmem:[#allocation2 + $0xa1] sm:$0xff]  ;;  %v474_v23 = vld [vmem:[#allocation2 + $0xa9] sm:$0xff] }
  0x31   : > { %v6510_v22 = vld [vmem:[%s7356_s2 + $0x1c] sm:$0xf]  ;;  %v6518_v24 = vld [vmem:[#allocation2 + $0x2c] sm:$0xff]  ;;  %v6521_v27 = vld [vmem:[#allocation2 + $0x34] sm:$0xff] }
  0x32   : > { %5447 = vmatmul.mubr.msk.f32.gmra.mrb[10].mxu1 %vm361_vm1, %v464_v57  ;;  %v475_v25 = vld [vmem:[#allocation2 + $0xb1] sm:$0xff]  ;;  %v399_v26 = vld [vmem:[%s6475_s24 + $0x8] sm:$0xff]  ;;  %v476_v29 = vld [vmem:[#allocation2 + $0xb9] sm:$0xff] }
  0x33   : > { %5671 = vmatmul.mubr.msk.f32.gmra.mrb[10].mxu0 %vm361_vm1, %v2075_v60  ;;  %5449 = vmatprep.mubr.msk.f32.mxu1 %vm361_vm1, %v465_v61  ;;  %408 = vst.msk [vmem:[#allocation2 + $0x128] sm:$0xff] %vm361_vm1, %v399_v26  ;;  %v400_v28 = vld [vmem:[%s6475_s24 + $0x10] sm:$0xff]  ;;  %v6534_v30 = vld [vmem:[#allocation2 + $0x3c] sm:$0xff]  ;;  %v6536_v32 = vld [vmem:[#allocation2 + $0x44] sm:$0xff] }
  0x34   : > { %5673 = vmatprep.mubr.msk.f32.mxu0 %vm361_vm1, %v2076_v63  ;;  %409 = vst.msk [vmem:[#allocation2 + $0x130] sm:$0xff] %vm361_vm1, %v400_v28  ;;  %v477_v31 = vld [vmem:[#allocation2 + $0xc1] sm:$0xff]  ;;  %v478_v33 = vld [vmem:[#allocation2 + $0xc9] sm:$0xff]  ;;  %v6546_v36 = vld [vmem:[#allocation2 + $0x54] sm:$0xff] }
  0x35   : > { %v6544_v34 = vld [vmem:[#allocation2 + $0x4c] sm:$0xff]  ;;  %v480_v38 = vld [vmem:[#allocation2 + $0xd9] sm:$0xff]  ;;  %v481_v40 = vld [vmem:[#allocation2 + $0xe1] sm:$0xff] }
  0x36   : > { %5450 = vmatmul.mubr.msk.f32.gmra.mrb[12].mxu1 %vm361_vm1, %v466_v3  ;;  %v6554_v39 = vld [vmem:[#allocation2 + $0x5c] sm:$0xff]  ;;  %v6556_v41 = vld [vmem:[#allocation2 + $0x64] sm:$0xff]  ;;  %v6567_v45 = vld [vmem:[#allocation2 + $0x6c] sm:$0xff] }
  0x37   : > { %5674 = vmatmul.mubr.msk.f32.gmra.mrb[12].mxu0 %vm361_vm1, %v2077_v5  ;;  %5452 = vmatprep.mubr.msk.f32.mxu1 %vm361_vm1, %v467_v8  ;;  %v401_v42 = vld [vmem:[%s6475_s24 + $0x18] sm:$0xff]  ;;  %v482_v43 = vld [vmem:[#allocation2 + $0xe9] sm:$0xff]  ;;  %v402_v44 = vld [vmem:[%s6475_s24 + $0x20] sm:$0xff] }
  0x38   : > { %5676 = vmatprep.mubr.msk.f32.mxu0 %vm361_vm1, %v2078_v9  ;;  %410 = vst.msk [vmem:[#allocation2 + $0x138] sm:$0xff] %vm361_vm1, %v401_v42  ;;  %v483_v46 = vld [vmem:[#allocation2 + $0xf1] sm:$0xff]  ;;  %411 = vst.msk [vmem:[#allocation2 + $0x140] sm:$0xff] %vm361_vm1, %v402_v44  ;;  %v484_v48 = vld [vmem:[#allocation2 + $0xf9] sm:$0xff] }
  0x39   : > { %v6570_v47 = vld [vmem:[#allocation2 + $0x74] sm:$0xff]  ;;  %v6578_v49 = vld [vmem:[#allocation2 + $0x7c] sm:$0xff]  ;;  %v6580_v51 = vld [vmem:[#allocation2 + $0x84] sm:$0xff] }
  0x3a   : > { %5453 = vmatmul.mubr.msk.f32.gmra.mrb[14].mxu1 %vm361_vm1, %v468_v10  ;;  %v485_v50 = vld [vmem:[#allocation2 + $0x101] sm:$0xff]  ;;  %v486_v52 = vld [vmem:[#allocation2 + $0x109] sm:$0xff]  ;;  %v487_v54 = vld [vmem:[#allocation2 + $0x111] sm:$0xff] }
  0x3b   : > { %5677 = vmatmul.mubr.msk.f32.gmra.mrb[14].mxu0 %vm361_vm1, %v2079_v11  ;;  %5455 = vmatprep.mubr.msk.f32.mxu1 %vm361_vm1, %v469_v12  ;;  %v6588_v53 = vld [vmem:[#allocation2 + $0x8c] sm:$0xff]  ;;  %v6590_v55 = vld [vmem:[#allocation2 + $0x94] sm:$0xff]  ;;  %v6598_v57 = vld [vmem:[#allocation2 + $0x9c] sm:$0xff] }
  0x3c   : > { %5679 = vmatprep.mubr.msk.f32.mxu0 %vm361_vm1, %v2080_v13  ;;  %v488_v56 = vld [vmem:[#allocation2 + $0x119] sm:$0xff]  ;;  %v6600_v59 = vld [vmem:[#allocation2 + $0xa4] sm:$0xff]  ;;  %v6608_v61 = vld [vmem:[#allocation2 + $0xac] sm:$0xff] }
  0x3d   : > { %v416_v58 = vld [vmem:[#allocation2] sm:$0xff]  ;;  %v417_v60 = vld [vmem:[#allocation2 + $0x8] sm:$0xff]  ;;  %v418_v62 = vld [vmem:[#allocation2 + $0x10] sm:$0xff] }
  0x3e   : > { %5456 = vmatmul.mubr.msk.f32.gmra.mrb[16].mxu1 %vm361_vm1, %v470_v14  ;;  %v6610_v63 = vld [vmem:[#allocation2 + $0xb4] sm:$0xff]  ;;  %v6616_v0 = vld [vmem:[%s7356_s2 + $0xc] sm:$0xf]  ;;  %v6625_v3 = vld [vmem:[#allocation2 + $0xbc] sm:$0xff] }
  0x3f   : > { %5680 = vmatmul.mubr.msk.f32.gmra.mrb[16].mxu0 %vm361_vm1, %v2081_v15  ;;  %5458 = vmatprep.mubr.msk.f32.mxu1 %vm361_vm1, %v471_v16  ;;  %v419_v2 = vld [vmem:[#allocation2 + $0x18] sm:$0xff]  ;;  %v420_v4 = vld [vmem:[#allocation2 + $0x20] sm:$0xff]  ;;  %v6637_v6 = vld [vmem:[#allocation2 + $0xcc] sm:$0xff] }
  0x40   : > { %5711 = vmatprep.mubr.msk.f32.mxu0 %vm361_vm1, %v2494_v17  ;;  %v6627_v5 = vld [vmem:[#allocation2 + $0xc4] sm:$0xff]  ;;  %v422_v7 = vld [vmem:[#allocation2 + $0x30] sm:$0xff]  ;;  %v423_v9 = vld [vmem:[#allocation2 + $0x38] sm:$0xff] }
  0x41   : > { %v6639_v8 = vld [vmem:[#allocation2 + $0xd4] sm:$0xff]  ;;  %v6647_v10 = vld [vmem:[#allocation2 + $0xdc] sm:$0xff]  ;;  %v6649_v12 = vld [vmem:[#allocation2 + $0xe4] sm:$0xff] }
  0x42   : > { %5459 = vmatmul.mubr.msk.f32.gmra.mrb[18].mxu1 %vm361_vm1, %v472_v18  ;;  %v424_v11 = vld [vmem:[#allocation2 + $0x40] sm:$0xff]  ;;  %v425_v13 = vld [vmem:[#allocation2 + $0x48] sm:$0xff]  ;;  %v426_v15 = vld [vmem:[#allocation2 + $0x50] sm:$0xff] }
  0x43   : > { %5712 = vmatmul.mubr.msk.f32.vlgmr.msra.gmra.mrb[0].mxu0 %vm361_vm1, %v2495_v19  ;;  %5461 = vmatprep.mubr.msk.f32.mxu1 %vm361_vm1, %v473_v20  ;;  %v6657_v14 = vld [vmem:[#allocation2 + $0xec] sm:$0xff]  ;;  %v6659_v16 = vld [vmem:[#allocation2 + $0xf4] sm:$0xff]  ;;  %v6667_v18 = vld [vmem:[#allocation2 + $0xfc] sm:$0xff] }
  0x44   : > { %5766 = vmatpush3.msk.msra.mxu0 %vm599_vm0, %v6419_v35  ;;  %5714 = vmatprep.mubr.msk.f32.mxu0 %vm361_vm1, %v6504_v21  ;;  %v479_v35 = vld [vmem:[#allocation2 + $0xd1] sm:$0xff]  ;;  %v428_v19 = vld [vmem:[#allocation2 + $0x60] sm:$0xff] }
  0x45   : > { %5821 = vmatprep.subr.msk.mxu0 %vm599_vm0, %v6510_v22  ;;  %v427_v17 = vld [vmem:[#allocation2 + $0x58] sm:$0xff]  ;;  %v6669_v20 = vld [vmem:[#allocation2 + $0x104] sm:$0xff]  ;;  %v430_v26 = vld [vmem:[#allocation2 + $0x70] sm:$0xff] }
  0x46   : > { %5462 = vmatmul.mubr.msk.f32.gmra.mrb[20].mxu1 %vm361_vm1, %v474_v23  ;;  %v429_v23 = vld [vmem:[#allocation2 + $0x68] sm:$0xff]  ;;  %v6679_v28 = vld [vmem:[#allocation2 + $0x114] sm:$0xff]  ;;  %v436_v44 = vld [vmem:[#allocation2 + $0xa0] sm:$0xff] }
  0x47   : > { %5715 = vmatmul.mubr.msk.f32.gmra.mrb[2].mxu0 %vm361_vm1, %v6518_v24  ;;  %5464 = vmatprep.mubr.msk.f32.mxu1 %vm361_vm1, %v475_v25  ;;  %v6677_v25 = vld [vmem:[#allocation2 + $0x10c] sm:$0xff] }
  0x48   : > { %5717 = vmatprep.mubr.msk.f32.mxu0 %vm361_vm1, %v6521_v27  ;;  %v434_v42 = vld [vmem:[#allocation2 + $0x90] sm:$0xff] }
  0x4a   : > { %5465 = vmatmul.mubr.msk.f32.gmra.mrb[22].mxu1 %vm361_vm1, %v476_v29  ;;  %v431_v29 = vld [vmem:[#allocation2 + $0x78] sm:$0xff] }
  0x4b   : > { %5718 = vmatmul.mubr.msk.f32.gmra.mrb[4].mxu0 %vm361_vm1, %v6534_v30  ;;  %5467 = vmatprep.mubr.msk.f32.mxu1 %vm361_vm1, %v477_v31  ;;  %v6687_v31 = vld [vmem:[#allocation2 + $0x11c] sm:$0xff] }
  0x4c   : > { %5720 = vmatprep.mubr.msk.f32.mxu0 %vm361_vm1, %v6536_v32 }
  0x4e   : > { %5468 = vmatmul.mubr.msk.f32.gmra.mrb[24].mxu1 %vm361_vm1, %v478_v33  ;;  %v432_v33 = vld [vmem:[#allocation2 + $0x80] sm:$0xff] }
  0x4f   : > { %5721 = vmatmul.mubr.msk.f32.gmra.mrb[6].mxu0 %vm361_vm1, %v6544_v34  ;;  %5470 = vmatprep.mubr.msk.f32.mxu1 %vm361_vm1, %v479_v35  ;;  %v6689_v35 = vld [vmem:[#allocation2 + $0x124] sm:$0xff] }
  0x50   : > { %5723 = vmatprep.mubr.msk.f32.mxu0 %vm361_vm1, %v6546_v36 }
  0x52   : > { %5471 = vmatmul.mubr.msk.f32.gmra.mrb[26].mxu1 %vm361_vm1, %v480_v38  ;;  %v433_v38 = vld [vmem:[#allocation2 + $0x88] sm:$0xff] }
  0x53   : > { %5724 = vmatmul.mubr.msk.f32.gmra.mrb[8].mxu0 %vm361_vm1, %v6554_v39  ;;  %5473 = vmatprep.mubr.msk.f32.mxu1 %vm361_vm1, %v481_v40  ;;  %v6697_v40 = vld [vmem:[#allocation2 + $0x12c] sm:$0xff] }
  0x54   : > { %5726 = vmatprep.mubr.msk.f32.mxu0 %vm361_vm1, %v6556_v41 }
  0x56   : > { %5474 = vmatmul.mubr.msk.f32.gmra.mrb[28].mxu1 %vm361_vm1, %v482_v43  ;;  %v435_v43 = vld [vmem:[#allocation2 + $0x98] sm:$0xff] }
  0x57   : > { %5727 = vmatmul.mubr.msk.f32.gmra.mrb[10].mxu0 %vm361_vm1, %v6567_v45  ;;  %5476 = vmatprep.mubr.msk.f32.mxu1 %vm361_vm1, %v483_v46  ;;  %v6709_v46 = vld [vmem:[%s7356_s2 + $0x20] sm:$0xf] }
  0x58   : > { %5729 = vmatprep.mubr.msk.f32.mxu0 %vm361_vm1, %v6570_v47 }
  0x5a   : > { %5477 = vmatmul.mubr.msk.f32.gmra.mrb[30].mxu1 %vm361_vm1, %v484_v48  ;;  %v437_v48 = vld [vmem:[#allocation2 + $0xa8] sm:$0xff] }
  0x5b   : > { %5730 = vmatmul.mubr.msk.f32.gmra.mrb[12].mxu0 %vm361_vm1, %v6578_v49  ;;  %5479 = vmatprep.mubr.msk.f32.mxu1 %vm361_vm1, %v485_v50  ;;  %v440_v50 = vld [vmem:[#allocation2 + $0xc0] sm:$0xff] }
  0x5c   : > { %5732 = vmatprep.mubr.msk.f32.mxu0 %vm361_vm1, %v6580_v51 }
  0x5e   : > { %5480 = vmatmul.mubr.msk.f32.gmra.mrb[32].mxu1 %vm361_vm1, %v486_v52  ;;  %v6276_v52 = vmov 0  }
  0x5f   : > { %5733 = vmatmul.mubr.msk.f32.gmra.mrb[14].mxu0 %vm361_vm1, %v6588_v53  ;;  %5482 = vmatprep.mubr.msk.f32.mxu1 %vm361_vm1, %v487_v54  ;;  %v4214_v54 = vld [vmem:[%s7357_s3] sm:$0xff] }
  0x60   : > { %5735 = vmatprep.mubr.msk.f32.mxu0 %vm361_vm1, %v6590_v55  ;;  %6249 = vset.pattern.permute.xlu0 %v6276_v52 }
  0x61   : > { %6250 = vset.pattern.permute.xlu1 %v6276_v52  ;;  %4252 = vperm.xlu0 %6249, %v4214_v54   ;;  %v4239_v52 = vld [vmem:[%s7357_s3 + $0xc8] sm:$0xff] }
  0x62   : > { %5483 = vmatmul.mubr.msk.f32.gmra.mrb[34].mxu1 %vm361_vm1, %v488_v56  ;;  %v6778_v56 = vld [vmem:[#allocation2 + $0x1a] sm:$0xff]  ;;  %v3363_v54 = vld [vmem:[#allocation2 + $0x6d] sm:$0xff] }
  0x63   : > { %5736 = vmatmul.mubr.msk.f32.gmra.mrb[16].mxu0 %vm361_vm1, %v6598_v57  ;;  %5487 = vmatprep.mubr.msk.f32.mxu1 %vm361_vm1, %v416_v58  ;;  %v4215_v58 = vld [vmem:[%s7357_s3 + $0x8] sm:$0xff] }
  0x64   : > { %5738 = vmatprep.mubr.msk.f32.mxu0 %vm361_vm1, %v6600_v59 }
  0x65   : > { %4257 = vperm.xlu0 %6249, %v4215_v58   ;;  %v3364_v58 = vld [vmem:[#allocation2 + $0x75] sm:$0xff] }
  0x66   : > { %5488 = vmatmul.mubr.msk.f32.vlgmr.msra.gmra.mrb[0].mxu1 %vm361_vm1, %v417_v60  ;;  %v6800_v60 = vld [vmem:[#allocation2 + $0x2a] sm:$0xff] }
  0x67   : > { %5542 = vmatpush3.msk.msra.mxu1 %vm599_vm0, %v6429_v37  ;;  %5739 = vmatmul.mubr.msk.f32.gmra.mrb[18].mxu0 %vm361_vm1, %v6608_v61  ;;  %v421_v37 = vld [vmem:[#allocation2 + $0x28] sm:$0xff] }
  0x68   : > { %5490 = vmatprep.mubr.msk.f32.mxu1 %vm361_vm1, %v418_v62  ;;  %5741 = vmatprep.mubr.msk.f32.mxu0 %vm361_vm1, %v6610_v63  ;;  %v6810_v62 = vld [vmem:[#allocation2 + $0x32] sm:$0xff] }
  0x69   : > { %5597 = vmatprep.subr.msk.mxu1 %vm599_vm0, %v6616_v0 }
  0x6a   : > { %5491 = vmatmul.mubr.msk.f32.gmra.mrb[2].mxu1 %vm361_vm1, %v419_v2  ;;  %v4220_v2 = vld [vmem:[%s7357_s3 + $0x30] sm:$0xff] }
  0x6b   : > { %5742 = vmatmul.mubr.msk.f32.gmra.mrb[20].mxu0 %vm361_vm1, %v6625_v3  ;;  %5493 = vmatprep.mubr.msk.f32.mxu1 %vm361_vm1, %v420_v4  ;;  %v6836_v4 = vld [vmem:[#allocation2 + $0x4a] sm:$0xff] }
  0x6c   : > { %5744 = vmatprep.mubr.msk.f32.mxu0 %vm361_vm1, %v6627_v5 }
  0x6e   : > { %5494 = vmatmul.mubr.msk.f32.gmra.mrb[4].mxu1 %vm361_vm1, %v421_v37  ;;  %v4222_v37 = vld [vmem:[%s7357_s3 + $0x40] sm:$0xff] }
  0x6f   : > { %5745 = vmatmul.mubr.msk.f32.gmra.mrb[22].mxu0 %vm361_vm1, %v6637_v6  ;;  %5496 = vmatprep.mubr.msk.f32.mxu1 %vm361_vm1, %v422_v7  ;;  %v6854_v7 = vld [vmem:[#allocation2 + $0x5a] sm:$0xff] }
  0x70   : > { %5747 = vmatprep.mubr.msk.f32.mxu0 %vm361_vm1, %v6639_v8 }
  0x72   : > { %5497 = vmatmul.mubr.msk.f32.gmra.mrb[6].mxu1 %vm361_vm1, %v423_v9  ;;  %v4224_v9 = vld [vmem:[%s7357_s3 + $0x50] sm:$0xff] }
  0x73   : > { %5748 = vmatmul.mubr.msk.f32.gmra.mrb[24].mxu0 %vm361_vm1, %v6647_v10  ;;  %5499 = vmatprep.mubr.msk.f32.mxu1 %vm361_vm1, %v424_v11  ;;  %v6872_v11 = vld [vmem:[#allocation2 + $0x6a] sm:$0xff] }
  0x74   : > { %5750 = vmatprep.mubr.msk.f32.mxu0 %vm361_vm1, %v6649_v12 }
  0x76   : > { %5500 = vmatmul.mubr.msk.f32.gmra.mrb[8].mxu1 %vm361_vm1, %v425_v13  ;;  %v4226_v13 = vld [vmem:[%s7357_s3 + $0x60] sm:$0xff] }
  0x77   : > { %5751 = vmatmul.mubr.msk.f32.gmra.mrb[26].mxu0 %vm361_vm1, %v6657_v14  ;;  %5502 = vmatprep.mubr.msk.f32.mxu1 %vm361_vm1, %v426_v15  ;;  %v6890_v15 = vld [vmem:[#allocation2 + $0x7a] sm:$0xff] }
  0x78   : > { %5753 = vmatprep.mubr.msk.f32.mxu0 %vm361_vm1, %v6659_v16 }
  0x7a   : > { %5503 = vmatmul.mubr.msk.f32.gmra.mrb[10].mxu1 %vm361_vm1, %v427_v17  ;;  %v4228_v17 = vld [vmem:[%s7357_s3 + $0x70] sm:$0xff] }
  0x7b   : > { %5754 = vmatmul.mubr.msk.f32.gmra.mrb[28].mxu0 %vm361_vm1, %v6667_v18  ;;  %5505 = vmatprep.mubr.msk.f32.mxu1 %vm361_vm1, %v428_v19  ;;  %v2958_v19 = vld [vmem:[#allocation2 + $0x134] sm:$0xff] }
  0x7c   : > { %5756 = vmatprep.mubr.msk.f32.mxu0 %vm361_vm1, %v6669_v20 }
  0x7e   : > { %5506 = vmatmul.mubr.msk.f32.gmra.mrb[12].mxu1 %vm361_vm1, %v429_v23  ;;  %v4229_v23 = vld [vmem:[%s7357_s3 + $0x78] sm:$0xff] }
  0x7f   : > { %5757 = vmatmul.mubr.msk.f32.gmra.mrb[30].mxu0 %vm361_vm1, %v6677_v25  ;;  %5508 = vmatprep.mubr.msk.f32.mxu1 %vm361_vm1, %v430_v26  ;;  %v2959_v26 = vld [vmem:[#allocation2 + $0x13c] sm:$0xff] }
  0x80   : > { %5759 = vmatprep.mubr.msk.f32.mxu0 %vm361_vm1, %v6679_v28 }
  0x82   : > { %5509 = vmatmul.mubr.msk.f32.gmra.mrb[14].mxu1 %vm361_vm1, %v431_v29  ;;  %v3354_v29 = vld [vmem:[#allocation2 + $0x25] sm:$0xff] }
  0x83   : > { %5760 = vmatmul.mubr.msk.f32.gmra.mrb[32].mxu0 %vm361_vm1, %v6687_v31  ;;  %5511 = vmatprep.mubr.msk.f32.mxu1 %vm361_vm1, %v432_v33  ;;  %v4231_v33 = vld [vmem:[%s7357_s3 + $0x88] sm:$0xff] }
  0x84   : > { %5762 = vmatprep.mubr.msk.f32.mxu0 %vm361_vm1, %v6689_v35 }
  0x86   : > { %5512 = vmatmul.mubr.msk.f32.gmra.mrb[16].mxu1 %vm361_vm1, %v433_v38  ;;  %v3355_v38 = vld [vmem:[#allocation2 + $0x2d] sm:$0xff] }
  0x87   : > { %5763 = vmatmul.mubr.msk.f32.gmra.mrb[34].mxu0 %vm361_vm1, %v6697_v40  ;;  %5514 = vmatprep.mubr.msk.f32.mxu1 %vm361_vm1, %v434_v42  ;;  %v3356_v42 = vld [vmem:[#allocation2 + $0x35] sm:$0xff] }
  0x88   : > { %5767 = vmatprep.mubr.msk.f32.mxu0 %vm361_vm1, %v6504_v21  ;;  %v438_v21 = vld [vmem:[#allocation2 + $0xb0] sm:$0xff] }
  0x8a   : > { %5515 = vmatmul.mubr.msk.f32.gmra.mrb[18].mxu1 %vm361_vm1, %v435_v43  ;;  %v6940_v43 = vld [vmem:[#allocation2 + $0xaa] sm:$0xff] }
  0x8b   : > { %5768 = vmatmul.mubr.msk.f32.vlgmr.msra.gmra.mrb[0].mxu0 %vm361_vm1, %v6518_v24  ;;  %5517 = vmatprep.mubr.msk.f32.mxu1 %vm361_vm1, %v436_v44  ;;  %v439_v24 = vld [vmem:[#allocation2 + $0xb8] sm:$0xff] }
  0x8c   : > { %5822 = vmatpush3.msk.msra.mxu0 %vm599_vm0, %v6510_v22  ;;  %5770 = vmatprep.mubr.msk.f32.mxu0 %vm361_vm1, %v6521_v27  ;;  %v441_v22 = vld [vmem:[#allocation2 + $0xc8] sm:$0xff]  ;;  %v442_v27 = vld [vmem:[#allocation2 + $0xd0] sm:$0xff]  ;;  %v4233_v44 = vld [vmem:[%s7357_s3 + $0x98] sm:$0xff] }
  0x8d   : > { %5877 = vmatprep.subr.msk.mxu0 %vm599_vm0, %v6709_v46 }
  0x8e   : > { %5518 = vmatmul.mubr.msk.f32.gmra.mrb[20].mxu1 %vm361_vm1, %v437_v48  ;;  %v4234_v48 = vld [vmem:[%s7357_s3 + $0xa0] sm:$0xff] }
  0x8f   : > { %5771 = vmatmul.mubr.msk.f32.gmra.mrb[2].mxu0 %vm361_vm1, %v6534_v30  ;;  %5520 = vmatprep.mubr.msk.f32.mxu1 %vm361_vm1, %v438_v21  ;;  %v443_v30 = vld [vmem:[#allocation2 + $0xd8] sm:$0xff] }
  0x90   : > { %5773 = vmatprep.mubr.msk.f32.mxu0 %vm361_vm1, %v6536_v32  ;;  %v444_v32 = vld [vmem:[#allocation2 + $0xe0] sm:$0xff] }
  0x91   : > { %v3357_v21 = vld [vmem:[#allocation2 + $0x3d] sm:$0xff] }
  0x92   : > { %5521 = vmatmul.mubr.msk.f32.gmra.mrb[22].mxu1 %vm361_vm1, %v439_v24  ;;  %v6951_v24 = vld [vmem:[#allocation2 + $0xb2] sm:$0xff] }
  0x93   : > { %5774 = vmatmul.mubr.msk.f32.gmra.mrb[4].mxu0 %vm361_vm1, %v6544_v34  ;;  %5523 = vmatprep.mubr.msk.f32.mxu1 %vm361_vm1, %v440_v50  ;;  %v445_v34 = vld [vmem:[#allocation2 + $0xe8] sm:$0xff] }
  0x94   : > { %5776 = vmatprep.mubr.msk.f32.mxu0 %vm361_vm1, %v6546_v36  ;;  %v446_v36 = vld [vmem:[#allocation2 + $0xf0] sm:$0xff]  ;;  %v3358_v50 = vld [vmem:[#allocation2 + $0x45] sm:$0xff] }
  0x96   : > { %5524 = vmatmul.mubr.msk.f32.gmra.mrb[24].mxu1 %vm361_vm1, %v441_v22  ;;  %v6958_v22 = vld [vmem:[#allocation2 + $0xba] sm:$0xff] }
  0x97   : > { %5777 = vmatmul.mubr.msk.f32.gmra.mrb[6].mxu0 %vm361_vm1, %v6554_v39  ;;  %5526 = vmatprep.mubr.msk.f32.mxu1 %vm361_vm1, %v442_v27  ;;  %v447_v39 = vld [vmem:[#allocation2 + $0xf8] sm:$0xff]  ;;  %v4236_v27 = vld [vmem:[%s7357_s3 + $0xb0] sm:$0xff] }
  0x98   : > { %5779 = vmatprep.mubr.msk.f32.mxu0 %vm361_vm1, %v6556_v41  ;;  %v448_v41 = vld [vmem:[#allocation2 + $0x100] sm:$0xff] }
  0x9a   : > { %5527 = vmatmul.mubr.msk.f32.gmra.mrb[26].mxu1 %vm361_vm1, %v443_v30  ;;  %v3359_v30 = vld [vmem:[#allocation2 + $0x4d] sm:$0xff] }
  0x9b   : > { %5780 = vmatmul.mubr.msk.f32.gmra.mrb[8].mxu0 %vm361_vm1, %v6567_v45  ;;  %5529 = vmatprep.mubr.msk.f32.mxu1 %vm361_vm1, %v444_v32  ;;  %v449_v45 = vld [vmem:[#allocation2 + $0x108] sm:$0xff] }
  0x9c   : > { %5782 = vmatprep.mubr.msk.f32.mxu0 %vm361_vm1, %v6570_v47  ;;  %v450_v47 = vld [vmem:[#allocation2 + $0x110] sm:$0xff]  ;;  %v6967_v32 = vld [vmem:[#allocation2 + $0xc2] sm:$0xff] }
  0x9e   : > { %5530 = vmatmul.mubr.msk.f32.gmra.mrb[28].mxu1 %vm361_vm1, %v445_v34  ;;  %v3360_v34 = vld [vmem:[#allocation2 + $0x55] sm:$0xff] }
  0x9f   : > { %5783 = vmatmul.mubr.msk.f32.gmra.mrb[10].mxu0 %vm361_vm1, %v6578_v49  ;;  %5532 = vmatprep.mubr.msk.f32.mxu1 %vm361_vm1, %v446_v36  ;;  %v451_v49 = vld [vmem:[#allocation2 + $0x118] sm:$0xff]  ;;  %v6974_v36 = vld [vmem:[#allocation2 + $0xca] sm:$0xff] }
  0xa0   : > { %5785 = vmatprep.mubr.msk.f32.mxu0 %vm361_vm1, %v6580_v51  ;;  %v1204_v51 = vld [vmem:[#allocation2 + $0x2] sm:$0xff] }
  0xa2   : > { %5533 = vmatmul.mubr.msk.f32.gmra.mrb[30].mxu1 %vm361_vm1, %v447_v39  ;;  %v4237_v39 = vld [vmem:[%s7357_s3 + $0xb8] sm:$0xff] }
  0xa3   : > { %5786 = vmatmul.mubr.msk.f32.gmra.mrb[12].mxu0 %vm361_vm1, %v6588_v53  ;;  %5535 = vmatprep.mubr.msk.f32.mxu1 %vm361_vm1, %v448_v41  ;;  %v1205_v53 = vld [vmem:[#allocation2 + $0xa] sm:$0xff]  ;;  %v4238_v41 = vld [vmem:[%s7357_s3 + $0xc0] sm:$0xff] }
  0xa4   : > { %5788 = vmatprep.mubr.msk.f32.mxu0 %vm361_vm1, %v6590_v55  ;;  %v6771_v55 = vld [vmem:[#allocation2 + $0x12] sm:$0xff] }
  0xa6   : > { %5536 = vmatmul.mubr.msk.f32.gmra.mrb[32].mxu1 %vm361_vm1, %v449_v45  ;;  %v3361_v45 = vld [vmem:[#allocation2 + $0x5d] sm:$0xff] }
  0xa7   : > { %5789 = vmatmul.mubr.msk.f32.gmra.mrb[14].mxu0 %vm361_vm1, %v6598_v57  ;;  %5538 = vmatprep.mubr.msk.f32.mxu1 %vm361_vm1, %v450_v47  ;;  %v4216_v57 = vld [vmem:[%s7357_s3 + $0x10] sm:$0xff] }
  0xa8   : > { %5791 = vmatprep.mubr.msk.f32.mxu0 %vm361_vm1, %v6600_v59  ;;  %v6790_v59 = vld [vmem:[#allocation2 + $0x22] sm:$0xff]  ;;  %4262 = vperm.xlu1 %6250, %v4216_v57   ;;  %v6983_v47 = vld [vmem:[#allocation2 + $0xd2] sm:$0xff] }
  0xa9   : > { %v6999_v57 = vld [vmem:[#allocation2 + $0xe2] sm:$0xff] }
  0xaa   : > { %5539 = vmatmul.mubr.msk.f32.gmra.mrb[34].mxu1 %vm361_vm1, %v451_v49  ;;  %v3362_v49 = vld [vmem:[#allocation2 + $0x65] sm:$0xff] }
  0xab   : > { %5792 = vmatmul.mubr.msk.f32.gmra.mrb[16].mxu0 %vm361_vm1, %v6608_v61  ;;  %5543 = vmatprep.mubr.msk.f32.mxu1 %vm361_vm1, %v1204_v51  ;;  %v4217_v61 = vld [vmem:[%s7357_s3 + $0x18] sm:$0xff] }
  0xac   : > { %5794 = vmatprep.mubr.msk.f32.mxu0 %vm361_vm1, %v6610_v63  ;;  %4267 = vperm.xlu1 %6250, %v4217_v61   ;;  %v6818_v63 = vld [vmem:[#allocation2 + $0x3a] sm:$0xff] }
  0xad   : > { %v6990_v51 = vld [vmem:[#allocation2 + $0xda] sm:$0xff] }
  0xae   : > { %5544 = vmatmul.mubr.msk.f32.vlgmr.msra.gmra.mrb[0].mxu1 %vm361_vm1, %v1205_v53  ;;  %v4240_v53 = vld [vmem:[%s7357_s3 + $0xd0] sm:$0xff]  ;;  %v4241_v61 = vld [vmem:[%s7357_s3 + $0xd8] sm:$0xff] }
  0xaf   : > { %5598 = vmatpush3.msk.msra.mxu1 %vm599_vm0, %v6616_v0  ;;  %5795 = vmatmul.mubr.msk.f32.gmra.mrb[18].mxu0 %vm361_vm1, %v6625_v3  ;;  %v4219_v0 = vld [vmem:[%s7357_s3 + $0x28] sm:$0xff] }
  0xb0   : > { %5546 = vmatprep.mubr.msk.f32.mxu1 %vm361_vm1, %v6771_v55  ;;  %5797 = vmatprep.mubr.msk.f32.mxu0 %vm361_vm1, %v6627_v5  ;;  %v6828_v3 = vld [vmem:[#allocation2 + $0x42] sm:$0xff]  ;;  %v4221_v5 = vld [vmem:[%s7357_s3 + $0x38] sm:$0xff] }
  0xb1   : > { %5933 = vmatprep.subr.msk.mxu1 %vm599_vm0, %v6334_v1  ;;  %v4218_v1 = vld [vmem:[%s7357_s3 + $0x20] sm:$0xff]  ;;  %4277 = vperm.xlu1 %6250, %v4219_v0  }
  0xb2   : > { %5547 = vmatmul.mubr.msk.f32.gmra.mrb[2].mxu1 %vm361_vm1, %v6778_v56  ;;  %4272 = vperm.xlu0 %6249, %v4218_v1   ;;  %v7009_v1 = vld [vmem:[#allocation2 + $0xea] sm:$0xff]  ;;  %v4242_v0 = vld [vmem:[%s7357_s3 + $0xe0] sm:$0xff] }
  0xb3   : > { %5798 = vmatmul.mubr.msk.f32.gmra.mrb[20].mxu0 %vm361_vm1, %v6637_v6  ;;  %5549 = vmatprep.mubr.msk.f32.mxu1 %vm361_vm1, %v6790_v59  ;;  %v6846_v6 = vld [vmem:[#allocation2 + $0x52] sm:$0xff] }
  0xb4   : > { %5800 = vmatprep.mubr.msk.f32.mxu0 %vm361_vm1, %v6639_v8  ;;  %v4223_v8 = vld [vmem:[%s7357_s3 + $0x48] sm:$0xff] }
  0xb5   : > { %4287 = vperm.xlu1 %6250, %v4221_v5   ;;  %v7015_v5 = vld [vmem:[#allocation2 + $0xf2] sm:$0xff] }
  0xb6   : > { %5550 = vmatmul.mubr.msk.f32.gmra.mrb[4].mxu1 %vm361_vm1, %v6800_v60  ;;  %4282 = vperm.xlu0 %6249, %v4220_v2   ;;  %v3365_v2 = vld [vmem:[#allocation2 + $0x7d] sm:$0xff] }
  0xb7   : > { %5801 = vmatmul.mubr.msk.f32.gmra.mrb[22].mxu0 %vm361_vm1, %v6647_v10  ;;  %5552 = vmatprep.mubr.msk.f32.mxu1 %vm361_vm1, %v6810_v62  ;;  %v6864_v10 = vld [vmem:[#allocation2 + $0x62] sm:$0xff] }
  0xb8   : > { %5803 = vmatprep.mubr.msk.f32.mxu0 %vm361_vm1, %v6649_v12  ;;  %v4225_v12 = vld [vmem:[%s7357_s3 + $0x58] sm:$0xff] }
  0xb9   : > { %4297 = vperm.xlu1 %6250, %v4223_v8   ;;  %v4243_v8 = vld [vmem:[%s7357_s3 + $0xe8] sm:$0xff] }
  0xba   : > { %5553 = vmatmul.mubr.msk.f32.gmra.mrb[6].mxu1 %vm361_vm1, %v6818_v63  ;;  %4292 = vperm.xlu0 %6249, %v4222_v37   ;;  %v3366_v37 = vld [vmem:[#allocation2 + $0x85] sm:$0xff] }
  0xbb   : > { %5804 = vmatmul.mubr.msk.f32.gmra.mrb[24].mxu0 %vm361_vm1, %v6657_v14  ;;  %5555 = vmatprep.mubr.msk.f32.mxu1 %vm361_vm1, %v6828_v3  ;;  %v6882_v14 = vld [vmem:[#allocation2 + $0x72] sm:$0xff] }
  0xbc   : > { %5806 = vmatprep.mubr.msk.f32.mxu0 %vm361_vm1, %v6659_v16  ;;  %v4227_v16 = vld [vmem:[%s7357_s3 + $0x68] sm:$0xff] }
  0xbd   : > { %4307 = vperm.xlu1 %6250, %v4225_v12   ;;  %v4244_v12 = vld [vmem:[%s7357_s3 + $0xf0] sm:$0xff] }
  0xbe   : > { %5556 = vmatmul.mubr.msk.f32.gmra.mrb[8].mxu1 %vm361_vm1, %v6836_v4  ;;  %4302 = vperm.xlu0 %6249, %v4224_v9   ;;  %v7025_v9 = vld [vmem:[#allocation2 + $0xfa] sm:$0xff] }
  0xbf   : > { %5807 = vmatmul.mubr.msk.f32.gmra.mrb[26].mxu0 %vm361_vm1, %v6667_v18  ;;  %5558 = vmatprep.mubr.msk.f32.mxu1 %vm361_vm1, %v6846_v6  ;;  %v6900_v18 = vld [vmem:[#allocation2 + $0x82] sm:$0xff] }
  0xc0   : > { %5809 = vmatprep.mubr.msk.f32.mxu0 %vm361_vm1, %v6669_v20  ;;  %v6908_v20 = vld [vmem:[#allocation2 + $0x8a] sm:$0xff] }
  0xc1   : > { %4317 = vperm.xlu1 %6250, %v4227_v16   ;;  %v7031_v16 = vld [vmem:[#allocation2 + $0x102] sm:$0xff] }
  0xc2   : > { %5559 = vmatmul.mubr.msk.f32.gmra.mrb[10].mxu1 %vm361_vm1, %v6854_v7  ;;  %4312 = vperm.xlu0 %6249, %v4226_v13   ;;  %v3367_v13 = vld [vmem:[#allocation2 + $0x8d] sm:$0xff] }
  0xc3   : > { %5810 = vmatmul.mubr.msk.f32.gmra.mrb[28].mxu0 %vm361_vm1, %v6677_v25  ;;  %5561 = vmatprep.mubr.msk.f32.mxu1 %vm361_vm1, %v6864_v10  ;;  %v4230_v25 = vld [vmem:[%s7357_s3 + $0x80] sm:$0xff] }
  0xc4   : > { %5812 = vmatprep.mubr.msk.f32.mxu0 %vm361_vm1, %v6679_v28  ;;  %v6917_v28 = vld [vmem:[#allocation2 + $0x92] sm:$0xff] }
  0xc5   : > { %4327 = vperm.xlu1 %6250, %v4229_v23   ;;  %v7041_v23 = vld [vmem:[#allocation2 + $0x10a] sm:$0xff] }
  0xc6   : > { %5562 = vmatmul.mubr.msk.f32.gmra.mrb[12].mxu1 %vm361_vm1, %v6872_v11  ;;  %4322 = vperm.xlu0 %6249, %v4228_v17   ;;  %v3368_v17 = vld [vmem:[#allocation2 + $0x95] sm:$0xff] }
  0xc7   : > { %5813 = vmatmul.mubr.msk.f32.gmra.mrb[30].mxu0 %vm361_vm1, %v6687_v31  ;;  %5564 = vmatprep.mubr.msk.f32.mxu1 %vm361_vm1, %v6882_v14  ;;  %v6924_v31 = vld [vmem:[#allocation2 + $0x9a] sm:$0xff] }
  0xc8   : > { %5815 = vmatprep.mubr.msk.f32.mxu0 %vm361_vm1, %v6689_v35  ;;  %v4232_v35 = vld [vmem:[%s7357_s3 + $0x90] sm:$0xff] }
  0xc9   : > { %4337 = vperm.xlu1 %6250, %v4231_v33   ;;  %v3370_v33 = vld [vmem:[#allocation2 + $0xa5] sm:$0xff] }
  0xca   : > { %5565 = vmatmul.mubr.msk.f32.gmra.mrb[14].mxu1 %vm361_vm1, %v6890_v15  ;;  %4332 = vperm.xlu0 %6249, %v4230_v25   ;;  %v4246_v25 = vld [vmem:[%s7357_s3 + $0x100] sm:$0xff] }
  0xcb   : > { %5816 = vmatmul.mubr.msk.f32.gmra.mrb[32].mxu0 %vm361_vm1, %v6697_v40  ;;  %5567 = vmatprep.mubr.msk.f32.mxu1 %vm361_vm1, %v6900_v18  ;;  %v6933_v40 = vld [vmem:[#allocation2 + $0xa2] sm:$0xff] }
  0xcc   : > { %5818 = vmatprep.mubr.msk.f32.mxu0 %vm361_vm1, %v2958_v19  ;;  %v4245_v19 = vld [vmem:[%s7357_s3 + $0xf8] sm:$0xff] }
  0xcd   : > { %4347 = vperm.xlu1 %6250, %v4233_v44   ;;  %v3371_v44 = vld [vmem:[#allocation2 + $0xad] sm:$0xff] }
  0xce   : > { %5568 = vmatmul.mubr.msk.f32.gmra.mrb[16].mxu1 %vm361_vm1, %v6908_v20  ;;  %4342 = vperm.xlu0 %6249, %v4232_v35   ;;  %v4247_v35 = vld [vmem:[%s7357_s3 + $0x108] sm:$0xff] }
  0xcf   : > { %5819 = vmatmul.mubr.msk.f32.gmra.mrb[34].mxu0 %vm361_vm1, %v2959_v26  ;;  %5570 = vmatprep.mubr.msk.f32.mxu1 %vm361_vm1, %v6917_v28  ;;  %v3369_v26 = vld [vmem:[#allocation2 + $0x9d] sm:$0xff] }
  0xd0   : > { %5823 = vmatprep.mubr.msk.f32.mxu0 %vm361_vm1, %v3354_v29  ;;  %v7047_v29 = vld [vmem:[#allocation2 + $0x112] sm:$0xff] }
  0xd2   : > { %5571 = vmatmul.mubr.msk.f32.gmra.mrb[18].mxu1 %vm361_vm1, %v6924_v31  ;;  %4352 = vperm.xlu0 %6249, %v4234_v48   ;;  %v3372_v48 = vld [vmem:[#allocation2 + $0xb5] sm:$0xff] }
  0xd3   : > { %5824 = vmatmul.mubr.msk.f32.vlgmr.msra.gmra.mrb[0].mxu0 %vm361_vm1, %v3355_v38  ;;  %5573 = vmatprep.mubr.msk.f32.mxu1 %vm361_vm1, %v6933_v40  ;;  %v7057_v38 = vld [vmem:[#allocation2 + $0x11a] sm:$0xff] }
  0xd4   : > { %5878 = vmatpush3.msk.msra.mxu0 %vm599_vm0, %v6709_v46  ;;  %5826 = vmatprep.mubr.msk.f32.mxu0 %vm361_vm1, %v3356_v42  ;;  %v4235_v46 = vld [vmem:[%s7357_s3 + $0xa8] sm:$0xff]  ;;  %v4248_v42 = vld [vmem:[%s7357_s3 + $0x110] sm:$0xff] }
  0xd5   : > { %4357 = vperm.xlu1 %6250, %v4235_v46   ;;  %v3374_v46 = vld [vmem:[#allocation2 + $0xc5] sm:$0xff] }
  0xd6   : > { %5574 = vmatmul.mubr.msk.f32.gmra.mrb[20].mxu1 %vm361_vm1, %v6940_v43  ;;  %4362 = vperm.xlu0 %6249, %v4236_v27   ;;  %v6251_v27 = vld [vmem:[%s7356_s2 + $0x10] sm:$0xf] }
  0xd7   : > { %5827 = vmatmul.mubr.msk.f32.gmra.mrb[2].mxu0 %vm361_vm1, %v3357_v21  ;;  %5576 = vmatprep.mubr.msk.f32.mxu1 %vm361_vm1, %v6951_v24  ;;  %v4249_v21 = vld [vmem:[%s7357_s3 + $0x118] sm:$0xff] }
  0xd8   : > { %5829 = vmatprep.mubr.msk.f32.mxu0 %vm361_vm1, %v3358_v50  ;;  %v3373_v50 = vld [vmem:[#allocation2 + $0xbd] sm:$0xff] }
  0xd9   : > { %4367 = vperm.xlu1 %6250, %v4237_v39   ;;  %v3795_v39 = vld [vmem:[#allocation2 + $0x7e] sm:$0xff] }
  0xda   : > { %5577 = vmatmul.mubr.msk.f32.gmra.mrb[22].mxu1 %vm361_vm1, %v6958_v22  ;;  %4372 = vperm.xlu0 %6249, %v4238_v41   ;;  %v3796_v41 = vld [vmem:[#allocation2 + $0x86] sm:$0xff] }
  0xdb   : > { %5830 = vmatmul.mubr.msk.f32.gmra.mrb[4].mxu0 %vm361_vm1, %v3359_v30  ;;  %5579 = vmatprep.mubr.msk.f32.mxu1 %vm361_vm1, %v6967_v32  ;;  %v3376_v30 = vld [vmem:[#allocation2 + $0xd5] sm:$0xff] }
  0xdc   : > { %5832 = vmatprep.mubr.msk.f32.mxu0 %vm361_vm1, %v3360_v34  ;;  %v3378_v34 = vld [vmem:[#allocation2 + $0xe5] sm:$0xff] }
  0xdd   : > { %4377 = vperm.xlu1 %6250, %v4239_v52   ;;  %v3800_v52 = vld [vmem:[#allocation2 + $0xa6] sm:$0xff] }
  0xde   : > { %5580 = vmatmul.mubr.msk.f32.gmra.mrb[24].mxu1 %vm361_vm1, %v6974_v36  ;;  %4382 = vperm.xlu0 %6249, %v4240_v53   ;;  %v1669_v53 = vld [vmem:[#allocation2 + $0x12a] sm:$0xff] }
  0xdf   : > { %5833 = vmatmul.mubr.msk.f32.gmra.mrb[6].mxu0 %vm361_vm1, %v3361_v45  ;;  %5582 = vmatprep.mubr.msk.f32.mxu1 %vm361_vm1, %v6983_v47  ;;  %v3797_v45 = vld [vmem:[#allocation2 + $0x8e] sm:$0xff] }
  0xe0   : > { %5835 = vmatprep.mubr.msk.f32.mxu0 %vm361_vm1, %v3362_v49  ;;  %v3799_v49 = vld [vmem:[#allocation2 + $0x9e] sm:$0xff] }
  0xe1   : > { %4387 = vperm.xlu1 %6250, %v4241_v61   ;;  %v2083_v61 = vld [vmem:[#allocation2 + $0xab] sm:$0xff] }
  0xe2   : > { %5583 = vmatmul.mubr.msk.f32.gmra.mrb[26].mxu1 %vm361_vm1, %v6990_v51  ;;  %4392 = vperm.xlu0 %6249, %v4242_v0   ;;  %v2084_v0 = vld [vmem:[#allocation2 + $0xb3] sm:$0xff] }
  0xe3   : > { %5836 = vmatmul.mubr.msk.f32.gmra.mrb[8].mxu0 %vm361_vm1, %v3363_v54  ;;  %5585 = vmatprep.mubr.msk.f32.mxu1 %vm361_vm1, %v6999_v57  ;;  %v3801_v54 = vld [vmem:[#allocation2 + $0xae] sm:$0xff] }
  0xe4   : > { %5838 = vmatprep.mubr.msk.f32.mxu0 %vm361_vm1, %v3364_v58  ;;  %v3802_v58 = vld [vmem:[#allocation2 + $0xb6] sm:$0xff] }
  0xe5   : > { %4397 = vperm.xlu1 %6250, %v4243_v8   ;;  %v2086_v8 = vld [vmem:[#allocation2 + $0xc3] sm:$0xff] }
  0xe6   : > { %5586 = vmatmul.mubr.msk.f32.gmra.mrb[28].mxu1 %vm361_vm1, %v7009_v1  ;;  %4402 = vperm.xlu0 %6249, %v4244_v12   ;;  %v2087_v12 = vld [vmem:[#allocation2 + $0xcb] sm:$0xff] }
  0xe7   : > { %5839 = vmatmul.mubr.msk.f32.gmra.mrb[10].mxu0 %vm361_vm1, %v3365_v2  ;;  %5588 = vmatprep.mubr.msk.f32.mxu1 %vm361_vm1, %v7015_v5  ;;  %v3804_v2 = vld [vmem:[#allocation2 + $0xc6] sm:$0xff] }
  0xe8   : > { %5841 = vmatprep.mubr.msk.f32.mxu0 %vm361_vm1, %v3366_v37  ;;  %v3805_v37 = vld [vmem:[#allocation2 + $0xce] sm:$0xff] }
  0xe9   : > { %4407 = vperm.xlu1 %6250, %v4245_v19   ;;  %v2089_v19 = vld [vmem:[#allocation2 + $0xdb] sm:$0xff] }
  0xea   : > { %5589 = vmatmul.mubr.msk.f32.gmra.mrb[30].mxu1 %vm361_vm1, %v7025_v9  ;;  %4412 = vperm.xlu0 %6249, %v4246_v25   ;;  %v2090_v25 = vld [vmem:[#allocation2 + $0xe3] sm:$0xff] }
  0xeb   : > { %5842 = vmatmul.mubr.msk.f32.gmra.mrb[12].mxu0 %vm361_vm1, %v3367_v13  ;;  %5591 = vmatprep.mubr.msk.f32.mxu1 %vm361_vm1, %v7031_v16  ;;  %v3807_v13 = vld [vmem:[#allocation2 + $0xde] sm:$0xff] }
  0xec   : > { %5844 = vmatprep.mubr.msk.f32.mxu0 %vm361_vm1, %v3368_v17  ;;  %v3808_v17 = vld [vmem:[#allocation2 + $0xe6] sm:$0xff] }
  0xed   : > { %4417 = vperm.xlu1 %6250, %v4247_v35   ;;  %v2092_v35 = vld [vmem:[#allocation2 + $0xf3] sm:$0xff] }
  0xee   : > { %5592 = vmatmul.mubr.msk.f32.gmra.mrb[32].mxu1 %vm361_vm1, %v7041_v23  ;;  %4422 = vperm.xlu0 %6249, %v4248_v42   ;;  %v2093_v42 = vld [vmem:[#allocation2 + $0xfb] sm:$0xff] }
  0xef   : > { %5845 = vmatmul.mubr.msk.f32.gmra.mrb[14].mxu0 %vm361_vm1, %v3369_v26  ;;  %5594 = vmatprep.mubr.msk.f32.mxu1 %vm361_vm1, %v7047_v29  ;;  %v3810_v26 = vld [vmem:[#allocation2 + $0xf6] sm:$0xff] }
  0xf0   : > { %5847 = vmatprep.mubr.msk.f32.mxu0 %vm361_vm1, %v3370_v33  ;;  %v3811_v33 = vld [vmem:[#allocation2 + $0xfe] sm:$0xff] }
  0xf1   : > { %4427 = vperm.xlu1 %6250, %v4249_v21   ;;  %v3814_v21 = vld [vmem:[#allocation2 + $0x116] sm:$0xff] }
  0xf2   : > { %5595 = vmatmul.mubr.msk.f32.gmra.mrb[34].mxu1 %vm361_vm1, %v7057_v38 }
  0xf3   : > { %5848 = vmatmul.mubr.msk.f32.gmra.mrb[16].mxu0 %vm361_vm1, %v3371_v44  ;;  %5599 = vmatprep.mubr.msk.f32.mxu1 %vm361_vm1, %v6771_v55  ;;  %v3375_v55 = vld [vmem:[#allocation2 + $0xcd] sm:$0xff] }
  0xf4   : > { %5850 = vmatprep.mubr.msk.f32.mxu0 %vm361_vm1, %v3372_v48  ;;  %v3813_v44 = vld [vmem:[#allocation2 + $0x10e] sm:$0xff]  ;;  %v2094_v48 = vld [vmem:[#allocation2 + $0x103] sm:$0xff] }
  0xf6   : > { %5600 = vmatmul.mubr.msk.f32.vlgmr.msra.gmra.mrb[0].mxu1 %vm361_vm1, %v6778_v56  ;;  %v3377_v56 = vld [vmem:[#allocation2 + $0xdd] sm:$0xff] }
  0xf7   : > { %5934 = vmatpush3.msk.msra.mxu1 %vm599_vm0, %v6251_v27  ;;  %5851 = vmatmul.mubr.msk.f32.gmra.mrb[18].mxu0 %vm361_vm1, %v3373_v50  ;;  %v2095_v50 = vld [vmem:[#allocation2 + $0x10b] sm:$0xff]  ;;  %v2096_v27 = vld [vmem:[#allocation2 + $0x113] sm:$0xff] }
  0xf8   : > { %5602 = vmatprep.mubr.msk.f32.mxu1 %vm361_vm1, %v6790_v59  ;;  %5853 = vmatprep.mubr.msk.f32.mxu0 %vm361_vm1, %v3374_v46  ;;  %v3379_v59 = vld [vmem:[#allocation2 + $0xed] sm:$0xff]  ;;  %v3815_v46 = vld [vmem:[#allocation2 + $0x11e] sm:$0xff] }
  0xfa   : > { %5603 = vmatmul.mubr.msk.f32.gmra.mrb[2].mxu1 %vm361_vm1, %v6800_v60  ;;  %v3380_v60 = vld [vmem:[#allocation2 + $0xf5] sm:$0xff] }
  0xfb   : > { %5854 = vmatmul.mubr.msk.f32.gmra.mrb[20].mxu0 %vm361_vm1, %v3375_v55  ;;  %5605 = vmatprep.mubr.msk.f32.mxu1 %vm361_vm1, %v6810_v62  ;;  %v3381_v62 = vld [vmem:[#allocation2 + $0xfd] sm:$0xff]  ;;  %v3816_v55 = vld [vmem:[#allocation2 + $0x126] sm:$0xff] }
  0xfc   : > { %5856 = vmatprep.mubr.msk.f32.mxu0 %vm361_vm1, %v3376_v30  ;;  %v2097_v30 = vld [vmem:[#allocation2 + $0x11b] sm:$0xff] }
  0xfe   : > { %5606 = vmatmul.mubr.msk.f32.gmra.mrb[4].mxu1 %vm361_vm1, %v6818_v63  ;;  %v3382_v63 = vld [vmem:[#allocation2 + $0x105] sm:$0xff] }
  0xff   : > { %5857 = vmatmul.mubr.msk.f32.gmra.mrb[22].mxu0 %vm361_vm1, %v3377_v56  ;;  %5608 = vmatprep.mubr.msk.f32.mxu1 %vm361_vm1, %v6828_v3  ;;  %v3383_v3 = vld [vmem:[#allocation2 + $0x10d] sm:$0xff] }
 0x100   : > { %5859 = vmatprep.mubr.msk.f32.mxu0 %vm361_vm1, %v3378_v34  ;;  %v3817_v56 = vld [vmem:[#allocation2 + $0x12e] sm:$0xff]  ;;  %v2098_v34 = vld [vmem:[#allocation2 + $0x123] sm:$0xff] }
 0x102   : > { %5609 = vmatmul.mubr.msk.f32.gmra.mrb[6].mxu1 %vm361_vm1, %v6836_v4  ;;  %v3384_v4 = vld [vmem:[#allocation2 + $0x115] sm:$0xff] }
 0x103   : > { %5860 = vmatmul.mubr.msk.f32.gmra.mrb[24].mxu0 %vm361_vm1, %v3379_v59  ;;  %5611 = vmatprep.mubr.msk.f32.mxu1 %vm361_vm1, %v6846_v6  ;;  %v3385_v6 = vld [vmem:[#allocation2 + $0x11d] sm:$0xff] }
 0x104   : > { %5862 = vmatprep.mubr.msk.f32.mxu0 %vm361_vm1, %v3380_v60  ;;  %v3818_v59 = vld [vmem:[#allocation2 + $0x136] sm:$0xff]  ;;  %v2099_v60 = vld [vmem:[#allocation2 + $0x12b] sm:$0xff] }
 0x106   : > { %5612 = vmatmul.mubr.msk.f32.gmra.mrb[8].mxu1 %vm361_vm1, %v6854_v7  ;;  %v3386_v7 = vld [vmem:[#allocation2 + $0x125] sm:$0xff] }
 0x107   : > { %5863 = vmatmul.mubr.msk.f32.gmra.mrb[26].mxu0 %vm361_vm1, %v3381_v62  ;;  %5614 = vmatprep.mubr.msk.f32.mxu1 %vm361_vm1, %v6864_v10  ;;  %v3387_v10 = vld [vmem:[#allocation2 + $0x12d] sm:$0xff]  ;;  %v3819_v62 = vld [vmem:[#allocation2 + $0x13e] sm:$0xff] }
 0x108   : > { %5865 = vmatprep.mubr.msk.f32.mxu0 %vm361_vm1, %v3382_v63  ;;  %v6277_v63 = vmov 0.0  }
 0x109   : > { %4502 = vst [vmem:[%s7220_s25] sm:$0xff] %v6277_v63 }
 0x10a   : > { %5615 = vmatmul.mubr.msk.f32.gmra.mrb[10].mxu1 %vm361_vm1, %v6872_v11  ;;  %v3388_v11 = vld [vmem:[#allocation2 + $0x135] sm:$0xff] }
 0x10b   : > { %5866 = vmatmul.mubr.msk.f32.gmra.mrb[28].mxu0 %vm361_vm1, %v3383_v3  ;;  %5617 = vmatprep.mubr.msk.f32.mxu1 %vm361_vm1, %v6882_v14  ;;  %v3389_v14 = vld [vmem:[#allocation2 + $0x13d] sm:$0xff] }
 0x10c   : > { %5868 = vmatprep.mubr.msk.f32.mxu0 %vm361_vm1, %v3384_v4 }
 0x10e   : > { %5618 = vmatmul.mubr.msk.f32.gmra.mrb[12].mxu1 %vm361_vm1, %v6890_v15  ;;  %v3784_v15 = vld [vmem:[#allocation2 + $0x26] sm:$0xff] }
 0x10f   : > { %5869 = vmatmul.mubr.msk.f32.gmra.mrb[30].mxu0 %vm361_vm1, %v3385_v6  ;;  %5620 = vmatprep.mubr.msk.f32.mxu1 %vm361_vm1, %v6900_v18  ;;  %v3785_v18 = vld [vmem:[#allocation2 + $0x2e] sm:$0xff] }
 0x110   : > { %5871 = vmatprep.mubr.msk.f32.mxu0 %vm361_vm1, %v3386_v7 }
 0x112   : > { %5621 = vmatmul.mubr.msk.f32.gmra.mrb[14].mxu1 %vm361_vm1, %v6908_v20  ;;  %v3786_v20 = vld [vmem:[#allocation2 + $0x36] sm:$0xff] }
 0x113   : > { %5872 = vmatmul.mubr.msk.f32.gmra.mrb[32].mxu0 %vm361_vm1, %v3387_v10  ;;  %5623 = vmatprep.mubr.msk.f32.mxu1 %vm361_vm1, %v6917_v28  ;;  %v3787_v28 = vld [vmem:[#allocation2 + $0x3e] sm:$0xff] }
 0x114   : > { %5874 = vmatprep.mubr.msk.f32.mxu0 %vm361_vm1, %v3388_v11  ;;  %v4253_v11 = vpop.permute.xlu0 %4252 }
 0x116   : > { %5624 = vmatmul.mubr.msk.f32.gmra.mrb[16].mxu1 %vm361_vm1, %v6924_v31  ;;  %v3788_v31 = vld [vmem:[#allocation2 + $0x46] sm:$0xff] }
 0x117   : > { %5875 = vmatmul.mubr.msk.f32.gmra.mrb[34].mxu0 %vm361_vm1, %v3389_v14  ;;  %5626 = vmatprep.mubr.msk.f32.mxu1 %vm361_vm1, %v6933_v40  ;;  %v3789_v40 = vld [vmem:[#allocation2 + $0x4e] sm:$0xff] }
 0x118   : > { %5879 = vmatprep.mubr.msk.f32.mxu0 %vm361_vm1, %v3784_v15 }
 0x11a   : > { %5627 = vmatmul.mubr.msk.f32.gmra.mrb[18].mxu1 %vm361_vm1, %v6940_v43  ;;  %v3790_v43 = vld [vmem:[#allocation2 + $0x56] sm:$0xff] }
 0x11b   : > { %5880 = vmatmul.mubr.msk.f32.vlgmr.msra.gmra.mrb[0].mxu0 %vm361_vm1, %v3785_v18  ;;  %5629 = vmatprep.mubr.msk.f32.mxu1 %vm361_vm1, %v6951_v24  ;;  %v3791_v24 = vld [vmem:[#allocation2 + $0x5e] sm:$0xff] }
 0x11c   : > { %5882 = vmatprep.mubr.msk.f32.mxu0 %vm361_vm1, %v3786_v20  ;;  %v4258_v20 = vpop.permute.xlu0 %4257 }
 0x11e   : > { %5630 = vmatmul.mubr.msk.f32.gmra.mrb[20].mxu1 %vm361_vm1, %v6958_v22  ;;  %v3792_v22 = vld [vmem:[#allocation2 + $0x66] sm:$0xff] }
 0x11f   : > { %5883 = vmatmul.mubr.msk.f32.gmra.mrb[2].mxu0 %vm361_vm1, %v3787_v28  ;;  %5632 = vmatprep.mubr.msk.f32.mxu1 %vm361_vm1, %v6967_v32  ;;  %v3793_v32 = vld [vmem:[#allocation2 + $0x6e] sm:$0xff] }
 0x120   : > { %5885 = vmatprep.mubr.msk.f32.mxu0 %vm361_vm1, %v3788_v31 }
 0x122   : > { %5633 = vmatmul.mubr.msk.f32.gmra.mrb[22].mxu1 %vm361_vm1, %v6974_v36  ;;  %v3794_v36 = vld [vmem:[#allocation2 + $0x76] sm:$0xff] }
 0x123   : > { %5886 = vmatmul.mubr.msk.f32.gmra.mrb[4].mxu0 %vm361_vm1, %v3789_v40  ;;  %5635 = vmatprep.mubr.msk.f32.mxu1 %vm361_vm1, %v6983_v47  ;;  %v3798_v47 = vld [vmem:[#allocation2 + $0x96] sm:$0xff] }
 0x124   : > { %5888 = vmatprep.mubr.msk.f32.mxu0 %vm361_vm1, %v3790_v43 }
 0x126   : > { %5636 = vmatmul.mubr.msk.f32.gmra.mrb[24].mxu1 %vm361_vm1, %v6990_v51  ;;  %v1668_v51 = vld [vmem:[#allocation2 + $0x122] sm:$0xff] }
 0x127   : > { %5889 = vmatmul.mubr.msk.f32.gmra.mrb[6].mxu0 %vm361_vm1, %v3791_v24  ;;  %5638 = vmatprep.mubr.msk.f32.mxu1 %vm361_vm1, %v6999_v57  ;;  %v2082_v57 = vld [vmem:[#allocation2 + $0xa3] sm:$0xff]  ;;  %v4263_v6 = vpop.permute.xlu1 %4262 }
 0x128   : > { %5891 = vmatprep.mubr.msk.f32.mxu0 %vm361_vm1, %v3792_v22 }
 0x12a   : > { %5639 = vmatmul.mubr.msk.f32.gmra.mrb[26].mxu1 %vm361_vm1, %v7009_v1  ;;  %v3803_v1 = vld [vmem:[#allocation2 + $0xbe] sm:$0xff] }
 0x12b   : > { %5892 = vmatmul.mubr.msk.f32.gmra.mrb[8].mxu0 %vm361_vm1, %v3793_v32  ;;  %5641 = vmatprep.mubr.msk.f32.mxu1 %vm361_vm1, %v7015_v5  ;;  %v2085_v5 = vld [vmem:[#allocation2 + $0xbb] sm:$0xff]  ;;  %v4268_v18 = vpop.permute.xlu1 %4267 }
 0x12c   : > { %5894 = vmatprep.mubr.msk.f32.mxu0 %vm361_vm1, %v3794_v36 }
 0x12e   : > { %5642 = vmatmul.mubr.msk.f32.gmra.mrb[28].mxu1 %vm361_vm1, %v7025_v9  ;;  %v3806_v9 = vld [vmem:[#allocation2 + $0xd6] sm:$0xff] }
 0x12f   : > { %5895 = vmatmul.mubr.msk.f32.gmra.mrb[10].mxu0 %vm361_vm1, %v3795_v39  ;;  %5644 = vmatprep.mubr.msk.f32.mxu1 %vm361_vm1, %v7031_v16  ;;  %v2088_v16 = vld [vmem:[#allocation2 + $0xd3] sm:$0xff] }
 0x130   : > { %5897 = vmatprep.mubr.msk.f32.mxu0 %vm361_vm1, %v3796_v41  ;;  %v4278_v40 = vpop.permute.xlu1 %4277 }
 0x131   : > { %v4273_v22 = vpop.permute.xlu0 %4272 }
 0x132   : > { %5645 = vmatmul.mubr.msk.f32.gmra.mrb[30].mxu1 %vm361_vm1, %v7041_v23  ;;  %v3809_v23 = vld [vmem:[#allocation2 + $0xee] sm:$0xff] }
 0x133   : > { %5898 = vmatmul.mubr.msk.f32.gmra.mrb[12].mxu0 %vm361_vm1, %v3797_v45  ;;  %5647 = vmatprep.mubr.msk.f32.mxu1 %vm361_vm1, %v7047_v29  ;;  %v2091_v29 = vld [vmem:[#allocation2 + $0xeb] sm:$0xff] }
 0x134   : > { %5900 = vmatprep.mubr.msk.f32.mxu0 %vm361_vm1, %v3798_v47  ;;  %v4288_v39 = vpop.permute.xlu1 %4287 }
 0x135   : > { %v7233_v41 = vpop.permute.xlu0 %4282 }
 0x136   : > { %5648 = vmatmul.mubr.msk.f32.gmra.mrb[32].mxu1 %vm361_vm1, %v7057_v38  ;;  %v3812_v38 = vld [vmem:[#allocation2 + $0x106] sm:$0xff] }
 0x137   : > { %5901 = vmatmul.mubr.msk.f32.gmra.mrb[14].mxu0 %vm361_vm1, %v3799_v49  ;;  %5650 = vmatprep.mubr.msk.f32.mxu1 %vm361_vm1, %v1668_v51 }
 0x138   : > { %5903 = vmatprep.mubr.msk.f32.mxu0 %vm361_vm1, %v3800_v52  ;;  %v7240_v49 = vpop.permute.xlu1 %4297 }
 0x13a   : > { %5651 = vmatmul.mubr.msk.f32.gmra.mrb[34].mxu1 %vm361_vm1, %v1669_v53  ;;  %v7246_v53 = vpop.permute.xlu0 %4292 }
 0x13b   : > { %5904 = vmatmul.mubr.msk.f32.gmra.mrb[16].mxu0 %vm361_vm1, %v3801_v54  ;;  %5682 = vmatprep.mubr.msk.f32.mxu1 %vm361_vm1, %v2082_v57 }
 0x13c   : > { %5906 = vmatprep.mubr.msk.f32.mxu0 %vm361_vm1, %v3802_v58  ;;  %v7252_v58 = vpop.permute.xlu1 %4307 }
 0x13e   : > { %5683 = vmatmul.mubr.msk.f32.vlgmr.msra.gmra.mrb[18].mxu1 %vm361_vm1, %v2083_v61  ;;  %v7254_v61 = vpop.permute.xlu0 %4302 }
 0x13f   : > { %5907 = vmatmul.mubr.msk.f32.gmra.mrb[18].mxu0 %vm361_vm1, %v3803_v1  ;;  %5685 = vmatprep.mubr.msk.f32.mxu1 %vm361_vm1, %v2084_v0 }
 0x140   : > { %5909 = vmatprep.mubr.msk.f32.mxu0 %vm361_vm1, %v3804_v2 }
 0x142   : > { %5686 = vmatmul.mubr.msk.f32.gmra.mrb[20].mxu1 %vm361_vm1, %v2085_v5 }
 0x143   : > { %5910 = vmatmul.mubr.msk.f32.gmra.mrb[20].mxu0 %vm361_vm1, %v3805_v37  ;;  %5688 = vmatprep.mubr.msk.f32.mxu1 %vm361_vm1, %v2086_v8  ;;  %v7261_v37 = vpop.permute.xlu1 %4317 }
 0x144   : > { %5912 = vmatprep.mubr.msk.f32.mxu0 %vm361_vm1, %v3806_v9 }
 0x146   : > { %5689 = vmatmul.mubr.msk.f32.gmra.mrb[22].mxu1 %vm361_vm1, %v2087_v12 }
 0x147   : > { %5913 = vmatmul.mubr.msk.f32.gmra.mrb[22].mxu0 %vm361_vm1, %v3807_v13  ;;  %5691 = vmatprep.mubr.msk.f32.mxu1 %vm361_vm1, %v2088_v16  ;;  %v7263_v13 = vpop.permute.xlu0 %4312 }
 0x148   : > { %5915 = vmatprep.mubr.msk.f32.mxu0 %vm361_vm1, %v3808_v17 }
 0x14a   : > { %5692 = vmatmul.mubr.msk.f32.gmra.mrb[24].mxu1 %vm361_vm1, %v2089_v19 }
 0x14b   : > { %5916 = vmatmul.mubr.msk.f32.gmra.mrb[24].mxu0 %vm361_vm1, %v3809_v23  ;;  %5694 = vmatprep.mubr.msk.f32.mxu1 %vm361_vm1, %v2090_v25 }
 0x14c   : > { %5918 = vmatprep.mubr.msk.f32.mxu0 %vm361_vm1, %v3810_v26 }
 0x14e   : > { %5695 = vmatmul.mubr.msk.f32.gmra.mrb[26].mxu1 %vm361_vm1, %v2091_v29 }
 0x14f   : > { %5919 = vmatmul.mubr.msk.f32.gmra.mrb[26].mxu0 %vm361_vm1, %v3811_v33  ;;  %5697 = vmatprep.mubr.msk.f32.mxu1 %vm361_vm1, %v2092_v35 }
 0x150   : > { %5921 = vmatprep.mubr.msk.f32.mxu0 %vm361_vm1, %v3812_v38 }
 0x152   : > { %5698 = vmatmul.mubr.msk.f32.gmra.mrb[28].mxu1 %vm361_vm1, %v2093_v42  ;;  %v7267_v42 = vpop.permute.xlu1 %4327 }
 0x153   : > { %5922 = vmatmul.mubr.msk.f32.gmra.mrb[28].mxu0 %vm361_vm1, %v3813_v44  ;;  %5700 = vmatprep.mubr.msk.f32.mxu1 %vm361_vm1, %v2094_v48 }
 0x154   : > { %5924 = vmatprep.mubr.msk.f32.mxu0 %vm361_vm1, %v3814_v21 }
 0x156   : > { %5701 = vmatmul.mubr.msk.f32.gmra.mrb[30].mxu1 %vm361_vm1, %v2095_v50 }
 0x157   : > { %5925 = vmatmul.mubr.msk.f32.gmra.mrb[30].mxu0 %vm361_vm1, %v3815_v46  ;;  %5703 = vmatprep.mubr.msk.f32.mxu1 %vm361_vm1, %v2096_v27  ;;  %v7271_v27 = vpop.permute.xlu0 %4322 }
 0x158   : > { %5927 = vmatprep.mubr.msk.f32.mxu0 %vm361_vm1, %v3816_v55 }
 0x15a   : > { %5704 = vmatmul.mubr.msk.f32.gmra.mrb[32].mxu1 %vm361_vm1, %v2097_v30 }
 0x15b   : > { %5928 = vmatmul.mubr.msk.f32.gmra.mrb[32].mxu0 %vm361_vm1, %v3817_v56  ;;  %5706 = vmatprep.mubr.msk.f32.mxu1 %vm361_vm1, %v2098_v34 }
 0x15c   : > { %5930 = vmatprep.mubr.msk.f32.mxu0 %vm361_vm1, %v3818_v59 }
 0x15e   : > { %5707 = vmatmul.mubr.msk.f32.gmra.mrb[34].mxu1 %vm361_vm1, %v2099_v60 }
 0x15f   : > { %5931 = vmatmul.mubr.msk.f32.gmra.mrb[34].mxu0 %vm361_vm1, %v3819_v62 }
 0x1c9   : > { %v5601_v3 = vpop.f32.mrb[0].mxu1 }
 0x1ca   : > { %v1849_v4 = vpop.f32.mrb[1].mxu1 }
 0x1cd   : > { %v5604_v7 = vpop.f32.mrb[2].mxu1 }
 0x1ce   : > { %v1859_v10 = vpop.f32.mrb[3].mxu1 }
 0x1d1   : > { %v5607_v14 = vpop.f32.mrb[4].mxu1 }
 0x1d2   : > { %v1869_v15 = vpop.f32.mrb[5].mxu1 }
 0x1d5   : > { %v5610_v28 = vpop.f32.mrb[6].mxu1 }
 0x1d6   : > { %v7223_v31 = vpop.f32.mrb[7].mxu1 }
 0x1d9   : > { %v7225_v43 = vpop.f32.mrb[8].mxu1 }
 0x1da   : > { %v7227_v24 = vpop.f32.mrb[9].mxu1 }
 0x1dd   : > { %v7229_v32 = vpop.f32.mrb[10].mxu1 }
 0x1de   : > { %v7231_v36 = vpop.f32.mrb[11].mxu1 }
 0x1e1   : > { %v7235_v45 = vpop.f32.mrb[12].mxu1 }
 0x1e2   : > { %v7238_v47 = vpop.f32.mrb[13].mxu1 }
 0x1e5   : > { %v7242_v51 = vpop.f32.mrb[14].mxu1 }
 0x1e6   : > { %v7244_v52 = vpop.f32.mrb[15].mxu1 }
 0x1e9   : > { %v7248_v54 = vpop.f32.mrb[16].mxu1 }
 0x1ea   : > { %v7250_v57 = vpop.f32.mrb[17].mxu1 }
 0x1ee   : > { %v5881_v1 = vpop.f32.mrb[0].mxu0 }
 0x1ef   : > { %v5935_v0 = vadd.f32 %v5881_v1, %v5601_v3  ;;  %v3999_v2 = vpop.f32.mrb[1].mxu0 }
 0x1f0   : > { %v5936_v5 = vadd.f32 %v3999_v2, %v1849_v4 }
 0x1f1   : > { %v4431_v8 = vmul.f32 %v5935_v0, %v4258_v20 }
 0x1f2   : > { %v4430_v9 = vmul.f32 %v5936_v5, %v4253_v11  ;;  %v5884_v12 = vpop.f32.mrb[2].mxu0 }
 0x1f3   : > { %4467 = vst [vmem:[%s7259_s29 + $0x8] sm:$0xff] %v4431_v8  ;;  %v4546_v16 = vmul.f32 %v4431_v8, %v4431_v8  ;;  %v5937_v17 = vadd.f32 %v5884_v12, %v5604_v7  ;;  %v4009_v19 = vpop.f32.mrb[3].mxu0 }
 0x1f4   : > { %4466 = vst [vmem:[%s7259_s29] sm:$0xff] %v4430_v9  ;;  %v4503_v23 = vadd.f32 %v4431_v8, %v4430_v9  ;;  %v4545_v25 = vmul.f32 %v4430_v9, %v4430_v9  ;;  %v5938_v26 = vadd.f32 %v4009_v19, %v1859_v10  ;;  %v7276_v10 = vpop.permute.xlu1 %4337 }
 0x1f5   : > { %v4433_v29 = vmul.f32 %v5937_v17, %v4268_v18 }
 0x1f6   : > { %v4581_v33 = vadd.f32 %v4546_v16, %v4545_v25  ;;  %v4432_v35 = vmul.f32 %v5938_v26, %v4263_v6  ;;  %v5887_v38 = vpop.f32.mrb[4].mxu0 }
 0x1f7   : > { %4469 = vst [vmem:[%s7259_s29 + $0x18] sm:$0xff] %v4433_v29  ;;  %v5939_v44 = vadd.f32 %v5887_v38, %v5607_v14  ;;  %v4019_v48 = vpop.f32.mrb[5].mxu0  ;;  %v4548_v30 = vmul.f32 %v4433_v29, %v4433_v29 }
 0x1f8   : > { %4468 = vst [vmem:[%s7259_s29 + $0x10] sm:$0xff] %v4432_v35  ;;  %v4504_v21 = vadd.f32 %v4503_v23, %v4432_v35  ;;  %v4547_v50 = vmul.f32 %v4432_v35, %v4432_v35  ;;  %v5940_v46 = vadd.f32 %v4019_v48, %v1869_v15  ;;  %v7287_v17 = vpop.permute.xlu1 %4347 }
 0x1f9   : > { %v4435_v55 = vmul.f32 %v5939_v44, %v4278_v40 }
 0x1fa   : > { %v4582_v56 = vadd.f32 %v4581_v33, %v4547_v50  ;;  %v4434_v34 = vmul.f32 %v5940_v46, %v4273_v22  ;;  %v4505_v59 = vadd.f32 %v4504_v21, %v4433_v29  ;;  %v5890_v60 = vpop.f32.mrb[6].mxu0  ;;  %v7279_v22 = vpop.permute.xlu0 %4332 }
 0x1fb   : > { %4471 = vst [vmem:[%s7259_s29 + $0x28] sm:$0xff] %v4435_v55  ;;  %v5941_v62 = vadd.f32 %v5890_v60, %v5610_v28  ;;  %v4029_v63 = vpop.f32.mrb[7].mxu0  ;;  %v4550_v14 = vmul.f32 %v4435_v55, %v4435_v55 }
 0x1fc   : > { %4470 = vst [vmem:[%s7259_s29 + $0x20] sm:$0xff] %v4434_v34  ;;  %v4506_v3 = vadd.f32 %v4505_v59, %v4434_v34  ;;  %v4549_v4 = vmul.f32 %v4434_v34, %v4434_v34  ;;  %v4583_v6 = vadd.f32 %v4582_v56, %v4548_v30  ;;  %v5942_v7 = vadd.f32 %v4029_v63, %v7223_v31 }
 0x1fd   : > { %v4437_v11 = vmul.f32 %v5941_v62, %v4288_v39 }
 0x1fe   : > { %v4584_v15 = vadd.f32 %v4583_v6, %v4549_v4  ;;  %v4436_v18 = vmul.f32 %v5942_v7, %v7233_v41  ;;  %v4507_v20 = vadd.f32 %v4506_v3, %v4435_v55  ;;  %v5893_v40 = vpop.f32.mrb[8].mxu0  ;;  %v7293_v26 = vpop.permute.xlu0 %4342 }
 0x1ff   : > { %4473 = vst [vmem:[%s7259_s29 + $0x38] sm:$0xff] %v4437_v11  ;;  %v5943_v28 = vadd.f32 %v5893_v40, %v7225_v43  ;;  %v4039_v1 = vpop.f32.mrb[9].mxu0  ;;  %v4552_v8 = vmul.f32 %v4437_v11, %v4437_v11  ;;  %v7301_v55 = vpop.permute.xlu1 %4357 }
 0x200   : > { %4472 = vst [vmem:[%s7259_s29 + $0x30] sm:$0xff] %v4436_v18  ;;  %v4508_v0 = vadd.f32 %v4507_v20, %v4436_v18  ;;  %v4551_v31 = vmul.f32 %v4436_v18, %v4436_v18  ;;  %v4585_v2 = vadd.f32 %v4584_v15, %v4550_v14  ;;  %v5944_v39 = vadd.f32 %v4039_v1, %v7227_v24 }
 0x201   : > { %v4439_v5 = vmul.f32 %v5943_v28, %v7240_v49 }
 0x202   : > { %v4586_v41 = vadd.f32 %v4585_v2, %v4551_v31  ;;  %v4438_v9 = vmul.f32 %v5944_v39, %v7246_v53  ;;  %v4509_v12 = vadd.f32 %v4508_v0, %v4437_v11  ;;  %v5896_v16 = vpop.f32.mrb[10].mxu0  ;;  %v7305_v60 = vpop.permute.xlu0 %4352 }
 0x203   : > { %4475 = vst [vmem:[%s7259_s29 + $0x48] sm:$0xff] %v4439_v5  ;;  %v5945_v43 = vadd.f32 %v5896_v16, %v7229_v32  ;;  %v4049_v19 = vpop.f32.mrb[11].mxu0  ;;  %v4554_v29 = vmul.f32 %v4439_v5, %v4439_v5  ;;  %v4368_v15 = vpop.permute.xlu1 %4367 }
 0x204   : > { %4474 = vst [vmem:[%s7259_s29 + $0x40] sm:$0xff] %v4438_v9  ;;  %v4510_v23 = vadd.f32 %v4509_v12, %v4438_v9  ;;  %v4553_v25 = vmul.f32 %v4438_v9, %v4438_v9  ;;  %v4587_v24 = vadd.f32 %v4586_v41, %v4552_v8  ;;  %v5946_v49 = vadd.f32 %v4049_v19, %v7231_v36 }
 0x205   : > { %v4441_v53 = vmul.f32 %v5945_v43, %v7252_v58 }
 0x206   : > { %v4588_v33 = vadd.f32 %v4587_v24, %v4553_v25  ;;  %v4440_v35 = vmul.f32 %v5946_v49, %v7254_v61  ;;  %v4511_v38 = vadd.f32 %v4510_v23, %v4439_v5  ;;  %v5899_v44 = vpop.f32.mrb[12].mxu0 }
 0x207   : > { %4477 = vst [vmem:[%s7259_s29 + $0x58] sm:$0xff] %v4441_v53  ;;  %v5947_v32 = vadd.f32 %v5899_v44, %v7235_v45  ;;  %v4059_v48 = vpop.f32.mrb[13].mxu0  ;;  %v4556_v30 = vmul.f32 %v4441_v53, %v4441_v53  ;;  %v4378_v43 = vpop.permute.xlu1 %4377 }
 0x208   : > { %4476 = vst [vmem:[%s7259_s29 + $0x50] sm:$0xff] %v4440_v35  ;;  %v4512_v21 = vadd.f32 %v4511_v38, %v4440_v35  ;;  %v4555_v50 = vmul.f32 %v4440_v35, %v4440_v35  ;;  %v4589_v36 = vadd.f32 %v4588_v33, %v4554_v29  ;;  %v5948_v46 = vadd.f32 %v4059_v48, %v7238_v47 }
 0x209   : > { %v4443_v58 = vmul.f32 %v5947_v32, %v7261_v37 }
 0x20a   : > { %v4590_v61 = vadd.f32 %v4589_v36, %v4555_v50  ;;  %v4442_v56 = vmul.f32 %v5948_v46, %v7263_v13  ;;  %v4513_v34 = vadd.f32 %v4512_v21, %v4441_v53  ;;  %v5902_v59 = vpop.f32.mrb[14].mxu0 }
 0x20b   : > { %4479 = vst [vmem:[%s7259_s29 + $0x68] sm:$0xff] %v4443_v58  ;;  %v5949_v45 = vadd.f32 %v5902_v59, %v7242_v51  ;;  %v4069_v62 = vpop.f32.mrb[15].mxu0  ;;  %v4558_v6 = vmul.f32 %v4443_v58, %v4443_v58 }
 0x20c   : > { %4478 = vst [vmem:[%s7259_s29 + $0x60] sm:$0xff] %v4442_v56  ;;  %v4514_v47 = vadd.f32 %v4513_v34, %v4442_v56  ;;  %v4557_v63 = vmul.f32 %v4442_v56, %v4442_v56  ;;  %v4591_v3 = vadd.f32 %v4590_v61, %v4556_v30  ;;  %v5950_v37 = vadd.f32 %v4069_v62, %v7244_v52  ;;  %v4388_v61 = vpop.permute.xlu1 %4387 }
 0x20d   : > { %v4445_v4 = vmul.f32 %v5949_v45, %v7267_v42  ;;  %v4363_v42 = vpop.permute.xlu0 %4362 }
 0x20e   : > { %v4592_v13 = vadd.f32 %v4591_v3, %v4557_v63  ;;  %v4444_v7 = vmul.f32 %v5950_v37, %v7271_v27  ;;  %v4515_v11 = vadd.f32 %v4514_v47, %v4443_v58  ;;  %v5905_v14 = vpop.f32.mrb[16].mxu0 }
 0x20f   : > { %4481 = vst [vmem:[%s7259_s29 + $0x78] sm:$0xff] %v4445_v4  ;;  %v5951_v51 = vadd.f32 %v5905_v14, %v7248_v54  ;;  %v4079_v18 = vpop.f32.mrb[17].mxu0  ;;  %v4560_v27 = vmul.f32 %v4445_v4, %v4445_v4 }
 0x210   : > { %4480 = vst [vmem:[%s7259_s29 + $0x70] sm:$0xff] %v4444_v7  ;;  %v4516_v20 = vadd.f32 %v4515_v11, %v4444_v7  ;;  %v4559_v40 = vmul.f32 %v4444_v7, %v4444_v7  ;;  %v4593_v28 = vadd.f32 %v4592_v13, %v4558_v6  ;;  %v5952_v52 = vadd.f32 %v4079_v18, %v7250_v57 }
 0x211   : > { %v4447_v1 = vmul.f32 %v5951_v51, %v7276_v10  ;;  %v5684_v0 = vpop.f32.mrb[18].mxu1  ;;  %v4373_v29 = vpop.permute.xlu0 %4372 }
 0x212   : > { %v4594_v31 = vadd.f32 %v4593_v28, %v4559_v40  ;;  %v4446_v2 = vmul.f32 %v5952_v52, %v7279_v22  ;;  %v4517_v39 = vadd.f32 %v4516_v20, %v4445_v4  ;;  %v5908_v5 = vpop.f32.mrb[18].mxu0  ;;  %v2369_v54 = vpop.f32.mrb[19].mxu1 }
 0x213   : > { %4483 = vst [vmem:[%s7259_s29 + $0x88] sm:$0xff] %v4447_v1  ;;  %v5953_v8 = vadd.f32 %v5908_v5, %v5684_v0  ;;  %v4089_v41 = vpop.f32.mrb[19].mxu0  ;;  %v4562_v23 = vmul.f32 %v4447_v1, %v4447_v1  ;;  %v4398_v28 = vpop.permute.xlu1 %4397 }
 0x214   : > { %4482 = vst [vmem:[%s7259_s29 + $0x80] sm:$0xff] %v4446_v2  ;;  %v4518_v9 = vadd.f32 %v4517_v39, %v4446_v2  ;;  %v4561_v12 = vmul.f32 %v4446_v2, %v4446_v2  ;;  %v4595_v57 = vadd.f32 %v4594_v31, %v4560_v27  ;;  %v5954_v16 = vadd.f32 %v4089_v41, %v2369_v54 }
 0x215   : > { %v4449_v10 = vmul.f32 %v5953_v8, %v7287_v17  ;;  %v5687_v19 = vpop.f32.mrb[20].mxu1 }
 0x216   : > { %v4596_v25 = vadd.f32 %v4595_v57, %v4561_v12  ;;  %v4448_v22 = vmul.f32 %v5954_v16, %v7293_v26  ;;  %v4519_v24 = vadd.f32 %v4518_v9, %v4447_v1  ;;  %v5911_v49 = vpop.f32.mrb[20].mxu0  ;;  %v2379_v53 = vpop.f32.mrb[21].mxu1 }
 0x217   : > { %4485 = vst [vmem:[%s7259_s29 + $0x98] sm:$0xff] %v4449_v10  ;;  %v5955_v33 = vadd.f32 %v5911_v49, %v5687_v19  ;;  %v4099_v35 = vpop.f32.mrb[21].mxu0  ;;  %v4564_v50 = vmul.f32 %v4449_v10, %v4449_v10 }
 0x218   : > { %4484 = vst [vmem:[%s7259_s29 + $0x90] sm:$0xff] %v4448_v22  ;;  %v4520_v38 = vadd.f32 %v4519_v24, %v4448_v22  ;;  %v4563_v44 = vmul.f32 %v4448_v22, %v4448_v22  ;;  %v4597_v32 = vadd.f32 %v4596_v25, %v4562_v23  ;;  %v5956_v48 = vadd.f32 %v4099_v35, %v2379_v53  ;;  %v4408_v24 = vpop.permute.xlu1 %4407 }
 0x219   : > { %v4451_v17 = vmul.f32 %v5955_v33, %v7301_v55  ;;  %v5690_v21 = vpop.f32.mrb[22].mxu1  ;;  %v4383_v55 = vpop.permute.xlu0 %4382 }
 0x21a   : > { %v4598_v36 = vadd.f32 %v4597_v32, %v4563_v44  ;;  %v4450_v26 = vmul.f32 %v5956_v48, %v7305_v60  ;;  %v4521_v46 = vadd.f32 %v4520_v38, %v4449_v10  ;;  %v5914_v58 = vpop.f32.mrb[22].mxu0  ;;  %v2389_v30 = vpop.f32.mrb[23].mxu1 }
 0x21b   : > { %4487 = vst [vmem:[%s7259_s29 + $0xa8] sm:$0xff] %v4451_v17  ;;  %v5957_v56 = vadd.f32 %v5914_v58, %v5690_v21  ;;  %v4109_v34 = vpop.f32.mrb[23].mxu0  ;;  %v4566_v37 = vmul.f32 %v4451_v17, %v4451_v17 }
 0x21c   : > { %4486 = vst [vmem:[%s7259_s29 + $0xa0] sm:$0xff] %v4450_v26  ;;  %v4522_v59 = vadd.f32 %v4521_v46, %v4450_v26  ;;  %v4565_v45 = vmul.f32 %v4450_v26, %v4450_v26  ;;  %v4599_v62 = vadd.f32 %v4598_v36, %v4564_v50  ;;  %v5958_v47 = vadd.f32 %v4109_v34, %v2389_v30 }
 0x21d   : > { %v4453_v63 = vmul.f32 %v5957_v56, %v4368_v15  ;;  %v5693_v3 = vpop.f32.mrb[24].mxu1  ;;  %v4393_v39 = vpop.permute.xlu0 %4392 }
 0x21e   : > { %v4600_v4 = vadd.f32 %v4599_v62, %v4565_v45  ;;  %v4452_v60 = vmul.f32 %v5958_v47, %v4363_v42  ;;  %v4523_v6 = vadd.f32 %v4522_v59, %v4451_v17  ;;  %v5917_v13 = vpop.f32.mrb[24].mxu0  ;;  %v2399_v7 = vpop.f32.mrb[25].mxu1 }
 0x21f   : > { %4489 = vst [vmem:[%s7259_s29 + $0xb8] sm:$0xff] %v4453_v63  ;;  %v5959_v11 = vadd.f32 %v5917_v13, %v5693_v3  ;;  %v4119_v14 = vpop.f32.mrb[25].mxu0  ;;  %v4568_v1 = vmul.f32 %v4453_v63, %v4453_v63  ;;  %v4418_v45 = vpop.permute.xlu1 %4417 }
 0x220   : > { %4488 = vst [vmem:[%s7259_s29 + $0xb0] sm:$0xff] %v4452_v60  ;;  %v4524_v51 = vadd.f32 %v4523_v6, %v4452_v60  ;;  %v4567_v18 = vmul.f32 %v4452_v60, %v4452_v60  ;;  %v4601_v20 = vadd.f32 %v4600_v4, %v4566_v37  ;;  %v5960_v40 = vadd.f32 %v4119_v14, %v2399_v7 }
 0x221   : > { %v4455_v52 = vmul.f32 %v5959_v11, %v4378_v43  ;;  %v5696_v15 = vpop.f32.mrb[26].mxu1  ;;  %v4403_v44 = vpop.permute.xlu0 %4402 }
 0x222   : > { %v4602_v0 = vadd.f32 %v4601_v20, %v4567_v18  ;;  %v4454_v27 = vmul.f32 %v5960_v40, %v4373_v29  ;;  %v4525_v42 = vadd.f32 %v4524_v51, %v4453_v63  ;;  %v5920_v31 = vpop.f32.mrb[26].mxu0  ;;  %v2409_v2 = vpop.f32.mrb[27].mxu1 }
 0x223   : > { %4491 = vst [vmem:[%s7259_s29 + $0xc8] sm:$0xff] %v4455_v52  ;;  %v5961_v5 = vadd.f32 %v5920_v31, %v5696_v15  ;;  %v4129_v54 = vpop.f32.mrb[27].mxu0  ;;  %v4570_v43 = vmul.f32 %v4455_v52, %v4455_v52 }
 0x224   : > { %4490 = vst [vmem:[%s7259_s29 + $0xc0] sm:$0xff] %v4454_v27  ;;  %v4526_v8 = vadd.f32 %v4525_v42, %v4454_v27  ;;  %v4569_v41 = vmul.f32 %v4454_v27, %v4454_v27  ;;  %v4603_v9 = vadd.f32 %v4602_v0, %v4568_v1  ;;  %v5962_v12 = vadd.f32 %v4129_v54, %v2409_v2  ;;  %v4428_v2 = vpop.permute.xlu1 %4427 }
 0x225   : > { %v4457_v57 = vmul.f32 %v5961_v5, %v4388_v61  ;;  %v5699_v16 = vpop.f32.mrb[28].mxu1  ;;  %v4413_v6 = vpop.permute.xlu0 %4412 }
 0x226   : > { %v4604_v10 = vadd.f32 %v4603_v9, %v4569_v41  ;;  %v4456_v19 = vmul.f32 %v5962_v12, %v4383_v55  ;;  %v4527_v23 = vadd.f32 %v4526_v8, %v4455_v52  ;;  %v5923_v25 = vpop.f32.mrb[28].mxu0  ;;  %v2419_v22 = vpop.f32.mrb[29].mxu1 }
 0x227   : > { %4493 = vst [vmem:[%s7259_s29 + $0xd8] sm:$0xff] %v4457_v57  ;;  %v5963_v49 = vadd.f32 %v5923_v25, %v5699_v16  ;;  %v4139_v53 = vpop.f32.mrb[29].mxu0  ;;  %v4572_v17 = vmul.f32 %v4457_v57, %v4457_v57 }
 0x228   : > { %4492 = vst [vmem:[%s7259_s29 + $0xd0] sm:$0xff] %v4456_v19  ;;  %v4528_v29 = vadd.f32 %v4527_v23, %v4456_v19  ;;  %v4571_v33 = vmul.f32 %v4456_v19, %v4456_v19  ;;  %v4605_v35 = vadd.f32 %v4604_v10, %v4570_v43  ;;  %v5964_v38 = vadd.f32 %v4139_v53, %v2419_v22 }
 0x229   : > { %v4459_v32 = vmul.f32 %v5963_v49, %v4398_v28  ;;  %v5702_v48 = vpop.f32.mrb[30].mxu1  ;;  %v4423_v41 = vpop.permute.xlu0 %4422 }
 0x22a   : > { %v4606_v21 = vadd.f32 %v4605_v35, %v4571_v33  ;;  %v4458_v50 = vmul.f32 %v5964_v38, %v4393_v39  ;;  %v4529_v36 = vadd.f32 %v4528_v29, %v4457_v57  ;;  %v5926_v26 = vpop.f32.mrb[30].mxu0  ;;  %v2429_v46 = vpop.f32.mrb[31].mxu1 }
 0x22b   : > { %4495 = vst [vmem:[%s7259_s29 + $0xe8] sm:$0xff] %v4459_v32  ;;  %v5965_v58 = vadd.f32 %v5926_v26, %v5702_v48  ;;  %v4149_v30 = vpop.f32.mrb[31].mxu0  ;;  %v4574_v55 = vmul.f32 %v4459_v32, %v4459_v32 }
 0x22c   : > { %4494 = vst [vmem:[%s7259_s29 + $0xe0] sm:$0xff] %v4458_v50  ;;  %v4530_v61 = vadd.f32 %v4529_v36, %v4458_v50  ;;  %v4573_v56 = vmul.f32 %v4458_v50, %v4458_v50  ;;  %v4607_v34 = vadd.f32 %v4606_v21, %v4572_v17  ;;  %v5966_v59 = vadd.f32 %v4149_v30, %v2429_v46 }
 0x22d   : > { %v4461_v62 = vmul.f32 %v5965_v58, %v4408_v24  ;;  %v5705_v47 = vpop.f32.mrb[32].mxu1 }
 0x22e   : > { %v4608_v63 = vadd.f32 %v4607_v34, %v4573_v56  ;;  %v4460_v3 = vmul.f32 %v5966_v59, %v4403_v44  ;;  %v4531_v37 = vadd.f32 %v4530_v61, %v4459_v32  ;;  %v5929_v4 = vpop.f32.mrb[32].mxu0  ;;  %v2439_v60 = vpop.f32.mrb[33].mxu1 }
 0x22f   : > { %4497 = vst [vmem:[%s7259_s29 + $0xf8] sm:$0xff] %v4461_v62  ;;  %v5967_v13 = vadd.f32 %v5929_v4, %v5705_v47  ;;  %v4159_v7 = vpop.f32.mrb[33].mxu0  ;;  %v4576_v28 = vmul.f32 %v4461_v62, %v4461_v62 }
 0x230   : > { %4496 = vst [vmem:[%s7259_s29 + $0xf0] sm:$0xff] %v4460_v3  ;;  %v4532_v11 = vadd.f32 %v4531_v37, %v4460_v3  ;;  %v4575_v14 = vmul.f32 %v4460_v3, %v4460_v3  ;;  %v4609_v51 = vadd.f32 %v4608_v63, %v4574_v55  ;;  %v5968_v18 = vadd.f32 %v4159_v7, %v2439_v60 }
 0x231   : > { %v4463_v20 = vmul.f32 %v5967_v13, %v4418_v45  ;;  %v5708_v40 = vpop.f32.mrb[34].mxu1 }
 0x232   : > { %v4610_v52 = vadd.f32 %v4609_v51, %v4575_v14  ;;  %v4462_v15 = vmul.f32 %v5968_v18, %v4413_v6  ;;  %v4533_v1 = vadd.f32 %v4532_v11, %v4461_v62  ;;  %v5932_v0 = vpop.f32.mrb[34].mxu0  ;;  %v2449_v27 = vpop.f32.mrb[35].mxu1 }
 0x233   : > { %4499 = vst [vmem:[%s7259_s29 + $0x108] sm:$0xff] %v4463_v20  ;;  %v5969_v42 = vadd.f32 %v5932_v0, %v5708_v40  ;;  %v4169_v31 = vpop.f32.mrb[35].mxu0  ;;  %v4578_v12 = vmul.f32 %v4463_v20, %v4463_v20 }
 0x234   : > { %4498 = vst [vmem:[%s7259_s29 + $0x100] sm:$0xff] %v4462_v15  ;;  %v4534_v39 = vadd.f32 %v4533_v1, %v4462_v15  ;;  %v4577_v5 = vmul.f32 %v4462_v15, %v4462_v15  ;;  %v4611_v54 = vadd.f32 %v4610_v52, %v4576_v28  ;;  %v5970_v8 = vadd.f32 %v4169_v31, %v2449_v27 }
 0x235   : > { %v4465_v9 = vmul.f32 %v5969_v42, %v4428_v2 }
 0x236   : > { %v4612_v57 = vadd.f32 %v4611_v54, %v4577_v5  ;;  %v4464_v16 = vmul.f32 %v5970_v8, %v4423_v41  ;;  %v4535_v43 = vadd.f32 %v4534_v39, %v4463_v20 }
 0x237   : > { %4501 = vst [vmem:[%s7259_s29 + $0x118] sm:$0xff] %v4465_v9  ;;  %v4580_v25 = vmul.f32 %v4465_v9, %v4465_v9 }
 0x238   : > { %4500 = vst [vmem:[%s7259_s29 + $0x110] sm:$0xff] %v4464_v16  ;;  %v4536_v10 = vadd.f32 %v4535_v43, %v4464_v16  ;;  %v4579_v19 = vmul.f32 %v4464_v16, %v4464_v16  ;;  %v4613_v23 = vadd.f32 %v4612_v57, %v4578_v12 }
 0x23a   : > { %v4537_v22 = vadd.f32 %v4536_v10, %v4465_v9  ;;  %v4614_v24 = vadd.f32 %v4613_v23, %v4579_v19 }
 0x23c   : > { %v4538_v49 = vrot.slane %v4537_v22, 4  ;;  %v4615_v53 = vadd.f32 %v4614_v24, %v4580_v25 }
 0x23e   : > { %v4539_v29 = vadd.f32 %v4538_v49, %v4537_v22  ;;  %v4616_v33 = vrot.slane %v4615_v53, 4 }
 0x240   : > { %v4540_v35 = vrot.slane %v4539_v29, 2  ;;  %v4617_v38 = vadd.f32 %v4616_v33, %v4615_v53 }
 0x242   : > { %v4541_v44 = vadd.f32 %v4540_v35, %v4539_v29  ;;  %v4618_v32 = vrot.slane %v4617_v38, 2 }
 0x244   : > { %v4542_v48 = vrot.slane %v4541_v44, 1  ;;  %v4619_v17 = vadd.f32 %v4618_v32, %v4617_v38 }
 0x246   : > { %v4543_v21 = vadd.f32 %v4542_v48, %v4541_v44  ;;  %v4620_v50 = vrot.slane %v4619_v17, 1 }
 0x248   : > { %4544 = vst [vmem:[%s7220_s25] sm:$0x1] %v4543_v21  ;;  %v4621_v36 = vadd.f32 %v4620_v50, %v4619_v17 }
 0x24a   : > { %4622 = vst [vmem:[%s7220_s25 + $0x1] sm:$0x1] %v4621_v36 }
 0x24b PF: > { %s16_s20 = sadd.s32 1, %s6274_s20   ;;  %s7360_s18 = smov %s6270_s19 }
 0x24c   : > { %p13_p8 = scmp.ge.s32.totalorder %s16_s20, 4   ;;  %s7361_s19 = smov %s7363_s21 }
 0x24e   :  { %15 = sbr.rel (!%p13_p8) target bundleno = 2 (0x2), region = 89 }

// kernel: _lambda_.6
= control target key start
LH: loop header
LB: loop body
LE: loop exit
PB: predicated region body
PF: predicated region fallthrough
CT: control target
= control target key end

     0   :  { %s6271_s18 = smov 0   ;;  %s6273_s19 = smov 0   ;;  %s7297_s0 = inlined_call_operand.vmem [shape: f32[1152,8], index: 0, kind: input, shape index: {}, may-alias: {0,1}]   ;;  %s7298_s1 = inlined_call_operand.vmem [shape: f32[1152,8], index: 1, kind: input, shape index: {}, may-alias: {0,1}]   ;;  %s7299_s2 = inlined_call_operand.vmem [shape: f32[9,8,128], index: 2, kind: input, shape index: {}]   ;;  %s7300_s3 = inlined_call_operand.vmem [shape: f32[288,1], index: 3, kind: input, shape index: {}]   ;;  %s7301_s4 = inlined_call_operand.vmem [shape: f32[576,128], index: 4, kind: output, shape index: {0}]   ;;  %s7302_s5 = inlined_call_operand.vmem [shape: f32[2,8,128], index: 5, kind: output, shape index: {1}]  }
   0x1   :  { %s6275_s20 = smov 0  }
   0x2 LB: > { %s28_s21 = sadd.s32 1, %s6233_s19  ;;  %p4717_p0 = scmp.ge.s32.totalorder %s6237_s20, 1  ;;  %s6237_s20 = sphi %s6275_s20, %s16_s20   ;;  %s6233_s19 = sphi %s6273_s19, %s7304_s19   ;;  %s6229_s18 = sphi %s6271_s18, %s7303_s18  }
   0x3   : > { %p30_p1 = scmp.ge.s32.totalorder %s28_s21, 2  ;;  %p242_p2 = scmp.lt.s32.totalorder %s6237_s20, 3 }
   0x5   : > { %s7306_s21 = smov (%p30_p1, %s28_s21), 0  ;;  %p243_p3 = pnand %p4717_p0, %p242_p2 }
   0x6   : > { %v4725_v0 = vld [vmem:[%s7299_s2 + $0x8] sm:$0xff] (!%p243_p3)  ;;  %v6297_v1 = vld [vmem:[%s7299_s2 + $0x20] sm:$0xff] (!%p243_p3)  ;;  %s4719_s26 = smul.u32 (!%p243_p3), 72, %s6229_s18  ;;  %vm361_vm0 = vcmask (!%p243_p3), 64512   ;;  %s4721_s10 = sshll.u32 (!%p243_p3), %s6229_s18, 3  ;;  %v6376_v35 = vld [vmem:[%s7299_s2 + $0x30] sm:$0xff] (!%p243_p3) }
   0x7   : > { %246 = sbr.rel (%p243_p3) target bundleno = 587 (0x24b), region = 36  ;;  %v6303_v2 = vld [vmem:[%s7299_s2] sm:$0xff] (!%p243_p3)  ;;  %5392 = vmatprep.subr.mxu1 (!%p243_p3), %v4725_v0  ;;  %5616 = vmatprep.subr.mxu0 (!%p243_p3), %v6297_v1  ;;  %v6309_v3 = vld [vmem:[%s7299_s2 + $0x28] sm:$0xff] (!%p243_p3)  ;;  %s6378_s13 = sadd.s32 (!%p243_p3), 4, %s4721_s10  ;;  %v6385_v37 = vld [vmem:[%s7299_s2 + $0x10] sm:$0xff] (!%p243_p3) }
   0x8   : > { %5393 = vmatpush3.msra.mxu1 (!%p243_p3), %v4725_v0  ;;  %5617 = vmatpush3.msra.mxu0 (!%p243_p3), %v6297_v1  ;;  %p290_p4 = scmp.lt.s32.totalorder (!%p243_p3), %s4719_s26, 143  ;;  %s301_s16 = smul.u32 (!%p243_p3), 9, %s6378_s13 }
   0x9   : > { %5448 = vmatprep.subr.mxu1 (!%p243_p3), %v6303_v2  ;;  %5672 = vmatprep.subr.mxu0 (!%p243_p3), %v6309_v3  ;;  %p320_p6 = scmp.lt.s32.totalorder (!%p243_p3), %s6229_s18, 1 }
   0xa   : > { %p302_p5 = scmp.lt.s32.totalorder (!%p243_p3), %s301_s16, 143 }
   0xe   : > { %s7308_s26 = smov (!%p290_p4, %s4719_s26), 143  ;;  %s7310_s16 = smov (!%p302_p5, %s301_s16), 143 }
   0xf   : > { %s4720_s6 = sshll.u32 %s7308_s26, 3  ;;  %s4722_s17 = sshll.u32 %s7310_s16, 3 }
  0x10   : > { %s6317_s9 = scalar_lea.vmem %s7297_s0, %s4720_s6  ;;  %s6428_s24 = scalar_lea.vmem %s7298_s1, %s4722_s17 }
  0x11   : > { %v325_v4 = vld [vmem:[%s6317_s9] sm:$0xff]  ;;  %v326_v5 = vld [vmem:[%s6317_s9 + $0x8] sm:$0xff]  ;;  %v327_v6 = vld [vmem:[%s6317_s9 + $0x10] sm:$0xff]  ;;  %s321_s17 = scalar_select %p320_p6, %s6229_s18, 1 }
  0x12   : > { %362 = vst.msk [vmem:[#allocation2] sm:$0xff] %vm361_vm0, %v325_v4  ;;  %363 = vst.msk [vmem:[#allocation2 + $0x8] sm:$0xff] %vm361_vm0, %v326_v5  ;;  %v328_v7 = vld [vmem:[%s6317_s9 + $0x18] sm:$0xff]  ;;  %v329_v8 = vld [vmem:[%s6317_s9 + $0x20] sm:$0xff]  ;;  %s312_s26 = smul.u32 36, %s6229_s18 }
  0x13   : > { %364 = vst.msk [vmem:[#allocation2 + $0x10] sm:$0xff] %vm361_vm0, %v327_v6  ;;  %v330_v9 = vld [vmem:[%s6317_s9 + $0x28] sm:$0xff]  ;;  %365 = vst.msk [vmem:[#allocation2 + $0x18] sm:$0xff] %vm361_vm0, %v328_v7  ;;  %v331_v10 = vld [vmem:[%s6317_s9 + $0x30] sm:$0xff]  ;;  %s4724_s22 = sshll.u32 %s321_s17, 3 }
  0x14   : > { %366 = vst.msk [vmem:[#allocation2 + $0x20] sm:$0xff] %vm361_vm0, %v329_v8  ;;  %367 = vst.msk [vmem:[#allocation2 + $0x28] sm:$0xff] %vm361_vm0, %v330_v9  ;;  %v332_v11 = vld [vmem:[%s6317_s9 + $0x38] sm:$0xff]  ;;  %v333_v12 = vld [vmem:[%s6317_s9 + $0x40] sm:$0xff]  ;;  %s7163_s25 = scalar_lea.vmem %s7302_s5, %s4724_s22  ;;  %p313_p7 = scmp.lt.s32.totalorder %s312_s26, 71 }
  0x15   : > { %368 = vst.msk [vmem:[#allocation2 + $0x30] sm:$0xff] %vm361_vm0, %v331_v10  ;;  %369 = vst.msk [vmem:[#allocation2 + $0x38] sm:$0xff] %vm361_vm0, %v332_v11  ;;  %v334_v13 = vld [vmem:[%s6317_s9 + $0x48] sm:$0xff]  ;;  %v335_v14 = vld [vmem:[%s6317_s9 + $0x50] sm:$0xff] }
  0x16   : > { %370 = vst.msk [vmem:[#allocation2 + $0x40] sm:$0xff] %vm361_vm0, %v333_v12  ;;  %v336_v15 = vld [vmem:[%s6317_s9 + $0x58] sm:$0xff]  ;;  %371 = vst.msk [vmem:[#allocation2 + $0x48] sm:$0xff] %vm361_vm0, %v334_v13  ;;  %v337_v16 = vld [vmem:[%s6317_s9 + $0x60] sm:$0xff]  ;;  %s7312_s26 = smov (!%p313_p7, %s312_s26), 71 }
  0x17   : > { %372 = vst.msk [vmem:[#allocation2 + $0x50] sm:$0xff] %vm361_vm0, %v335_v14  ;;  %373 = vst.msk [vmem:[#allocation2 + $0x58] sm:$0xff] %vm361_vm0, %v336_v15  ;;  %v338_v17 = vld [vmem:[%s6317_s9 + $0x68] sm:$0xff]  ;;  %v339_v18 = vld [vmem:[%s6317_s9 + $0x70] sm:$0xff]  ;;  %s4723_s18 = sshll.u32 %s7312_s26, 3 }
  0x18   : > { %374 = vst.msk [vmem:[#allocation2 + $0x60] sm:$0xff] %vm361_vm0, %v337_v16  ;;  %375 = vst.msk [vmem:[#allocation2 + $0x68] sm:$0xff] %vm361_vm0, %v338_v17  ;;  %v340_v19 = vld [vmem:[%s6317_s9 + $0x78] sm:$0xff]  ;;  %v341_v20 = vld [vmem:[%s6317_s9 + $0x80] sm:$0xff]  ;;  %s7202_s29 = scalar_lea.vmem %s7301_s4, %s4723_s18 }
  0x19   : > { %376 = vst.msk [vmem:[#allocation2 + $0x70] sm:$0xff] %vm361_vm0, %v339_v18  ;;  %v342_v21 = vld [vmem:[%s6317_s9 + $0x88] sm:$0xff]  ;;  %377 = vst.msk [vmem:[#allocation2 + $0x78] sm:$0xff] %vm361_vm0, %v340_v19  ;;  %v343_v22 = vld [vmem:[%s6317_s9 + $0x90] sm:$0xff] }
  0x1a   : > { %378 = vst.msk [vmem:[#allocation2 + $0x80] sm:$0xff] %vm361_vm0, %v341_v20  ;;  %379 = vst.msk [vmem:[#allocation2 + $0x88] sm:$0xff] %vm361_vm0, %v342_v21  ;;  %v344_v23 = vld [vmem:[%s6317_s9 + $0x98] sm:$0xff]  ;;  %v345_v24 = vld [vmem:[%s6317_s9 + $0xa0] sm:$0xff] }
  0x1b   : > { %380 = vst.msk [vmem:[#allocation2 + $0x90] sm:$0xff] %vm361_vm0, %v343_v22  ;;  %381 = vst.msk [vmem:[#allocation2 + $0x98] sm:$0xff] %vm361_vm0, %v344_v23  ;;  %v346_v25 = vld [vmem:[%s6317_s9 + $0xa8] sm:$0xff]  ;;  %v347_v26 = vld [vmem:[%s6317_s9 + $0xb0] sm:$0xff] }
  0x1c   : > { %382 = vst.msk [vmem:[#allocation2 + $0xa0] sm:$0xff] %vm361_vm0, %v345_v24  ;;  %v348_v27 = vld [vmem:[%s6317_s9 + $0xb8] sm:$0xff]  ;;  %v453_v28 = vld [vmem:[#allocation2 + $0x1] sm:$0xff]  ;;  %v454_v29 = vld [vmem:[#allocation2 + $0x9] sm:$0xff] }
  0x1d   : > { %383 = vst.msk [vmem:[#allocation2 + $0xa8] sm:$0xff] %vm361_vm0, %v346_v25  ;;  %384 = vst.msk [vmem:[#allocation2 + $0xb0] sm:$0xff] %vm361_vm0, %v347_v26  ;;  %v349_v30 = vld [vmem:[%s6317_s9 + $0xc0] sm:$0xff]  ;;  %5394 = vmatprep.mubr.msk.f32.mxu1 %vm361_vm0, %v453_v28  ;;  %v2051_v31 = vld [vmem:[#allocation2 + $0x13] sm:$0xff] }
  0x1e   : > { %385 = vst.msk [vmem:[#allocation2 + $0xb8] sm:$0xff] %vm361_vm0, %v348_v27  ;;  %v2052_v32 = vld [vmem:[#allocation2 + $0x1b] sm:$0xff]  ;;  %v455_v33 = vld [vmem:[#allocation2 + $0x11] sm:$0xff]  ;;  %386 = vst.msk [vmem:[#allocation2 + $0xc0] sm:$0xff] %vm361_vm0, %v349_v30  ;;  %5618 = vmatprep.mubr.msk.f32.mxu0 %vm361_vm0, %v2051_v31  ;;  %5395 = vmatmul.mubr.msk.f32.vlgmr.msra.gmra.mrb[0].mxu1 %vm361_vm0, %v454_v29 }
  0x1f   : > { %v2053_v34 = vld [vmem:[#allocation2 + $0x23] sm:$0xff]  ;;  %5449 = vmatpush3.msra.mxu1 %v6303_v2  ;;  %5619 = vmatmul.mubr.msk.f32.vlgmr.msra.gmra.mrb[0].mxu0 %vm361_vm0, %v2052_v32  ;;  %v456_v36 = vld [vmem:[#allocation2 + $0x19] sm:$0xff]  ;;  %v2054_v38 = vld [vmem:[#allocation2 + $0x2b] sm:$0xff] }
  0x20   : > { %5673 = vmatpush3.msra.mxu0 %v6309_v3  ;;  %5397 = vmatprep.mubr.msk.f32.mxu1 %vm361_vm0, %v455_v33  ;;  %v457_v39 = vld [vmem:[#allocation2 + $0x21] sm:$0xff]  ;;  %v2055_v40 = vld [vmem:[#allocation2 + $0x33] sm:$0xff]  ;;  %v458_v41 = vld [vmem:[#allocation2 + $0x29] sm:$0xff] }
  0x21   : > { %5621 = vmatprep.mubr.msk.f32.mxu0 %vm361_vm0, %v2053_v34  ;;  %5728 = vmatprep.subr.mxu0 %v6376_v35  ;;  %v2056_v42 = vld [vmem:[#allocation2 + $0x3b] sm:$0xff]  ;;  %v459_v43 = vld [vmem:[#allocation2 + $0x31] sm:$0xff]  ;;  %v2057_v44 = vld [vmem:[#allocation2 + $0x43] sm:$0xff] }
  0x22   : > { %5398 = vmatmul.mubr.msk.f32.gmra.mrb[2].mxu1 %vm361_vm0, %v456_v36  ;;  %5504 = vmatprep.subr.mxu1 %v6385_v37  ;;  %v460_v45 = vld [vmem:[#allocation2 + $0x39] sm:$0xff]  ;;  %v2058_v46 = vld [vmem:[#allocation2 + $0x4b] sm:$0xff]  ;;  %v461_v47 = vld [vmem:[#allocation2 + $0x41] sm:$0xff] }
  0x23   : > { %5622 = vmatmul.mubr.msk.f32.gmra.mrb[2].mxu0 %vm361_vm0, %v2054_v38  ;;  %5400 = vmatprep.mubr.msk.f32.mxu1 %vm361_vm0, %v457_v39  ;;  %v2059_v48 = vld [vmem:[#allocation2 + $0x53] sm:$0xff]  ;;  %v462_v49 = vld [vmem:[#allocation2 + $0x49] sm:$0xff]  ;;  %v2060_v50 = vld [vmem:[#allocation2 + $0x5b] sm:$0xff] }
  0x24   : > { %5624 = vmatprep.mubr.msk.f32.mxu0 %vm361_vm0, %v2055_v40  ;;  %v463_v51 = vld [vmem:[#allocation2 + $0x51] sm:$0xff]  ;;  %v350_v52 = vld [vmem:[%s6317_s9 + $0xc8] sm:$0xff]  ;;  %v353_v56 = vld [vmem:[%s6317_s9 + $0xe0] sm:$0xff] }
  0x25   : > { %v2061_v53 = vld [vmem:[#allocation2 + $0x63] sm:$0xff]  ;;  %387 = vst.msk [vmem:[#allocation2 + $0xc8] sm:$0xff] %vm361_vm0, %v350_v52  ;;  %v351_v54 = vld [vmem:[%s6317_s9 + $0xd0] sm:$0xff]  ;;  %v352_v55 = vld [vmem:[%s6317_s9 + $0xd8] sm:$0xff] }
  0x26   : > { %5401 = vmatmul.mubr.msk.f32.gmra.mrb[4].mxu1 %vm361_vm0, %v458_v41  ;;  %388 = vst.msk [vmem:[#allocation2 + $0xd0] sm:$0xff] %vm361_vm0, %v351_v54  ;;  %389 = vst.msk [vmem:[#allocation2 + $0xd8] sm:$0xff] %vm361_vm0, %v352_v55  ;;  %v464_v57 = vld [vmem:[#allocation2 + $0x59] sm:$0xff]  ;;  %v354_v58 = vld [vmem:[%s6317_s9 + $0xe8] sm:$0xff] }
  0x27   : > { %5625 = vmatmul.mubr.msk.f32.gmra.mrb[4].mxu0 %vm361_vm0, %v2056_v42  ;;  %5403 = vmatprep.mubr.msk.f32.mxu1 %vm361_vm0, %v459_v43  ;;  %390 = vst.msk [vmem:[#allocation2 + $0xe0] sm:$0xff] %vm361_vm0, %v353_v56  ;;  %v355_v59 = vld [vmem:[%s6317_s9 + $0xf0] sm:$0xff]  ;;  %v465_v61 = vld [vmem:[#allocation2 + $0x61] sm:$0xff]  ;;  %391 = vst.msk [vmem:[#allocation2 + $0xe8] sm:$0xff] %vm361_vm0, %v354_v58 }
  0x28   : > { %5627 = vmatprep.mubr.msk.f32.mxu0 %vm361_vm0, %v2057_v44  ;;  %v2062_v60 = vld [vmem:[#allocation2 + $0x6b] sm:$0xff]  ;;  %392 = vst.msk [vmem:[#allocation2 + $0xf0] sm:$0xff] %vm361_vm0, %v355_v59  ;;  %v356_v62 = vld [vmem:[%s6317_s9 + $0xf8] sm:$0xff]  ;;  %v357_v0 = vld [vmem:[%s6317_s9 + $0x100] sm:$0xff] }
  0x29   : > { %v2063_v63 = vld [vmem:[#allocation2 + $0x73] sm:$0xff]  ;;  %393 = vst.msk [vmem:[#allocation2 + $0xf8] sm:$0xff] %vm361_vm0, %v356_v62  ;;  %v358_v2 = vld [vmem:[%s6317_s9 + $0x108] sm:$0xff]  ;;  %394 = vst.msk [vmem:[#allocation2 + $0x100] sm:$0xff] %vm361_vm0, %v357_v0 }
  0x2a   : > { %5404 = vmatmul.mubr.msk.f32.gmra.mrb[6].mxu1 %vm361_vm0, %v460_v45  ;;  %v466_v3 = vld [vmem:[#allocation2 + $0x69] sm:$0xff]  ;;  %395 = vst.msk [vmem:[#allocation2 + $0x108] sm:$0xff] %vm361_vm0, %v358_v2  ;;  %v2064_v5 = vld [vmem:[#allocation2 + $0x7b] sm:$0xff]  ;;  %v467_v8 = vld [vmem:[#allocation2 + $0x71] sm:$0xff] }
  0x2b   : > { %5628 = vmatmul.mubr.msk.f32.gmra.mrb[6].mxu0 %vm361_vm0, %v2058_v46  ;;  %5406 = vmatprep.mubr.msk.f32.mxu1 %vm361_vm0, %v461_v47  ;;  %v359_v4 = vld [vmem:[%s6317_s9 + $0x110] sm:$0xff]  ;;  %v360_v6 = vld [vmem:[%s6317_s9 + $0x118] sm:$0xff]  ;;  %v398_v7 = vld [vmem:[%s6428_s24] sm:$0xff] }
  0x2c   : > { %5630 = vmatprep.mubr.msk.f32.mxu0 %vm361_vm0, %v2059_v48  ;;  %396 = vst.msk [vmem:[#allocation2 + $0x110] sm:$0xff] %vm361_vm0, %v359_v4  ;;  %397 = vst.msk [vmem:[#allocation2 + $0x118] sm:$0xff] %vm361_vm0, %v360_v6  ;;  %v2065_v9 = vld [vmem:[#allocation2 + $0x83] sm:$0xff]  ;;  %v468_v10 = vld [vmem:[#allocation2 + $0x79] sm:$0xff] }
  0x2d   : > { %407 = vst.msk [vmem:[#allocation2 + $0x120] sm:$0xff] %vm361_vm0, %v398_v7  ;;  %v2066_v11 = vld [vmem:[#allocation2 + $0x8b] sm:$0xff]  ;;  %v469_v12 = vld [vmem:[#allocation2 + $0x81] sm:$0xff]  ;;  %v2067_v13 = vld [vmem:[#allocation2 + $0x93] sm:$0xff] }
  0x2e   : > { %5407 = vmatmul.mubr.msk.f32.gmra.mrb[8].mxu1 %vm361_vm0, %v462_v49  ;;  %v470_v14 = vld [vmem:[#allocation2 + $0x89] sm:$0xff]  ;;  %v2068_v15 = vld [vmem:[#allocation2 + $0x9b] sm:$0xff]  ;;  %v471_v16 = vld [vmem:[#allocation2 + $0x91] sm:$0xff] }
  0x2f   : > { %5631 = vmatmul.mubr.msk.f32.gmra.mrb[8].mxu0 %vm361_vm0, %v2060_v50  ;;  %5409 = vmatprep.mubr.msk.f32.mxu1 %vm361_vm0, %v463_v51  ;;  %v2478_v17 = vld [vmem:[#allocation2 + $0x14] sm:$0xff]  ;;  %v2479_v19 = vld [vmem:[#allocation2 + $0x1c] sm:$0xff]  ;;  %v6457_v21 = vld [vmem:[#allocation2 + $0x24] sm:$0xff] }
  0x30   : > { %5633 = vmatprep.mubr.msk.f32.mxu0 %vm361_vm0, %v2061_v53  ;;  %v472_v18 = vld [vmem:[#allocation2 + $0x99] sm:$0xff]  ;;  %v473_v20 = vld [vmem:[#allocation2 + $0xa1] sm:$0xff]  ;;  %v474_v23 = vld [vmem:[#allocation2 + $0xa9] sm:$0xff] }
  0x31   : > { %v6463_v22 = vld [vmem:[%s7299_s2 + $0x38] sm:$0xff]  ;;  %v6470_v24 = vld [vmem:[#allocation2 + $0x2c] sm:$0xff]  ;;  %v477_v31 = vld [vmem:[#allocation2 + $0xc1] sm:$0xff] }
  0x32   : > { %5410 = vmatmul.mubr.msk.f32.gmra.mrb[10].mxu1 %vm361_vm0, %v464_v57  ;;  %v475_v25 = vld [vmem:[#allocation2 + $0xb1] sm:$0xff]  ;;  %v399_v26 = vld [vmem:[%s6428_s24 + $0x8] sm:$0xff]  ;;  %v476_v29 = vld [vmem:[#allocation2 + $0xb9] sm:$0xff] }
  0x33   : > { %5634 = vmatmul.mubr.msk.f32.gmra.mrb[10].mxu0 %vm361_vm0, %v2062_v60  ;;  %5412 = vmatprep.mubr.msk.f32.mxu1 %vm361_vm0, %v465_v61  ;;  %v6473_v27 = vld [vmem:[#allocation2 + $0x34] sm:$0xff]  ;;  %408 = vst.msk [vmem:[#allocation2 + $0x128] sm:$0xff] %vm361_vm0, %v399_v26  ;;  %v6485_v30 = vld [vmem:[#allocation2 + $0x3c] sm:$0xff]  ;;  %v6487_v32 = vld [vmem:[#allocation2 + $0x44] sm:$0xff] }
  0x34   : > { %5636 = vmatprep.mubr.msk.f32.mxu0 %vm361_vm0, %v2063_v63  ;;  %v400_v28 = vld [vmem:[%s6428_s24 + $0x10] sm:$0xff]  ;;  %v480_v38 = vld [vmem:[#allocation2 + $0xd9] sm:$0xff]  ;;  %v481_v40 = vld [vmem:[#allocation2 + $0xe1] sm:$0xff] }
  0x35   : > { %409 = vst.msk [vmem:[#allocation2 + $0x130] sm:$0xff] %vm361_vm0, %v400_v28  ;;  %v478_v33 = vld [vmem:[#allocation2 + $0xc9] sm:$0xff]  ;;  %v6497_v36 = vld [vmem:[#allocation2 + $0x54] sm:$0xff]  ;;  %v6505_v39 = vld [vmem:[#allocation2 + $0x5c] sm:$0xff] }
  0x36   : > { %5413 = vmatmul.mubr.msk.f32.gmra.mrb[12].mxu1 %vm361_vm0, %v466_v3  ;;  %v6495_v34 = vld [vmem:[#allocation2 + $0x4c] sm:$0xff]  ;;  %v6507_v41 = vld [vmem:[#allocation2 + $0x64] sm:$0xff]  ;;  %v401_v42 = vld [vmem:[%s6428_s24 + $0x18] sm:$0xff] }
  0x37   : > { %5637 = vmatmul.mubr.msk.f32.gmra.mrb[12].mxu0 %vm361_vm0, %v2064_v5  ;;  %5415 = vmatprep.mubr.msk.f32.mxu1 %vm361_vm0, %v467_v8  ;;  %v482_v43 = vld [vmem:[#allocation2 + $0xe9] sm:$0xff]  ;;  %410 = vst.msk [vmem:[#allocation2 + $0x138] sm:$0xff] %vm361_vm0, %v401_v42  ;;  %v402_v44 = vld [vmem:[%s6428_s24 + $0x20] sm:$0xff]  ;;  %v483_v46 = vld [vmem:[#allocation2 + $0xf1] sm:$0xff] }
  0x38   : > { %5639 = vmatprep.mubr.msk.f32.mxu0 %vm361_vm0, %v2065_v9  ;;  %v6518_v45 = vld [vmem:[#allocation2 + $0x6c] sm:$0xff]  ;;  %411 = vst.msk [vmem:[#allocation2 + $0x140] sm:$0xff] %vm361_vm0, %v402_v44  ;;  %v6521_v47 = vld [vmem:[#allocation2 + $0x74] sm:$0xff]  ;;  %v6529_v49 = vld [vmem:[#allocation2 + $0x7c] sm:$0xff] }
  0x39   : > { %v484_v48 = vld [vmem:[#allocation2 + $0xf9] sm:$0xff]  ;;  %v485_v50 = vld [vmem:[#allocation2 + $0x101] sm:$0xff]  ;;  %v486_v52 = vld [vmem:[#allocation2 + $0x109] sm:$0xff] }
  0x3a   : > { %5416 = vmatmul.mubr.msk.f32.gmra.mrb[14].mxu1 %vm361_vm0, %v468_v10  ;;  %v6531_v51 = vld [vmem:[#allocation2 + $0x84] sm:$0xff]  ;;  %v6539_v53 = vld [vmem:[#allocation2 + $0x8c] sm:$0xff]  ;;  %v6541_v55 = vld [vmem:[#allocation2 + $0x94] sm:$0xff] }
  0x3b   : > { %5640 = vmatmul.mubr.msk.f32.gmra.mrb[14].mxu0 %vm361_vm0, %v2066_v11  ;;  %5418 = vmatprep.mubr.msk.f32.mxu1 %vm361_vm0, %v469_v12  ;;  %v487_v54 = vld [vmem:[#allocation2 + $0x111] sm:$0xff]  ;;  %v488_v56 = vld [vmem:[#allocation2 + $0x119] sm:$0xff]  ;;  %v6551_v59 = vld [vmem:[#allocation2 + $0xa4] sm:$0xff] }
  0x3c   : > { %5642 = vmatprep.mubr.msk.f32.mxu0 %vm361_vm0, %v2067_v13  ;;  %v6549_v57 = vld [vmem:[#allocation2 + $0x9c] sm:$0xff]  ;;  %v417_v60 = vld [vmem:[#allocation2 + $0x8] sm:$0xff]  ;;  %v418_v62 = vld [vmem:[#allocation2 + $0x10] sm:$0xff] }
  0x3d   : > { %v416_v58 = vld [vmem:[#allocation2] sm:$0xff]  ;;  %v6559_v61 = vld [vmem:[#allocation2 + $0xac] sm:$0xff]  ;;  %v6561_v63 = vld [vmem:[#allocation2 + $0xb4] sm:$0xff] }
  0x3e   : > { %5419 = vmatmul.mubr.msk.f32.gmra.mrb[16].mxu1 %vm361_vm0, %v470_v14  ;;  %v6567_v0 = vld [vmem:[%s7299_s2 + $0x18] sm:$0xff]  ;;  %v420_v4 = vld [vmem:[#allocation2 + $0x20] sm:$0xff]  ;;  %v6586_v6 = vld [vmem:[#allocation2 + $0xcc] sm:$0xff] }
  0x3f   : > { %5643 = vmatmul.mubr.msk.f32.gmra.mrb[16].mxu0 %vm361_vm0, %v2068_v15  ;;  %5421 = vmatprep.mubr.msk.f32.mxu1 %vm361_vm0, %v471_v16  ;;  %v419_v2 = vld [vmem:[#allocation2 + $0x18] sm:$0xff]  ;;  %v6577_v5 = vld [vmem:[#allocation2 + $0xc4] sm:$0xff]  ;;  %v422_v7 = vld [vmem:[#allocation2 + $0x30] sm:$0xff] }
  0x40   : > { %5674 = vmatprep.mubr.msk.f32.mxu0 %vm361_vm0, %v2478_v17  ;;  %v6575_v3 = vld [vmem:[#allocation2 + $0xbc] sm:$0xff]  ;;  %v6588_v8 = vld [vmem:[#allocation2 + $0xd4] sm:$0xff]  ;;  %v6598_v12 = vld [vmem:[#allocation2 + $0xe4] sm:$0xff] }
  0x41   : > { %v423_v9 = vld [vmem:[#allocation2 + $0x38] sm:$0xff]  ;;  %v424_v11 = vld [vmem:[#allocation2 + $0x40] sm:$0xff]  ;;  %v425_v13 = vld [vmem:[#allocation2 + $0x48] sm:$0xff] }
  0x42   : > { %5422 = vmatmul.mubr.msk.f32.gmra.mrb[18].mxu1 %vm361_vm0, %v472_v18  ;;  %v6596_v10 = vld [vmem:[#allocation2 + $0xdc] sm:$0xff]  ;;  %v6606_v14 = vld [vmem:[#allocation2 + $0xec] sm:$0xff]  ;;  %v6608_v16 = vld [vmem:[#allocation2 + $0xf4] sm:$0xff] }
  0x43   : > { %5675 = vmatmul.mubr.msk.f32.vlgmr.msra.gmra.mrb[0].mxu0 %vm361_vm0, %v2479_v19  ;;  %5424 = vmatprep.mubr.msk.f32.mxu1 %vm361_vm0, %v473_v20  ;;  %v426_v15 = vld [vmem:[#allocation2 + $0x50] sm:$0xff]  ;;  %v427_v17 = vld [vmem:[#allocation2 + $0x58] sm:$0xff]  ;;  %v428_v19 = vld [vmem:[#allocation2 + $0x60] sm:$0xff] }
  0x44   : > { %5729 = vmatpush3.msra.mxu0 %v6376_v35  ;;  %5677 = vmatprep.mubr.msk.f32.mxu0 %vm361_vm0, %v6457_v21  ;;  %v479_v35 = vld [vmem:[#allocation2 + $0xd1] sm:$0xff]  ;;  %v6616_v18 = vld [vmem:[#allocation2 + $0xfc] sm:$0xff]  ;;  %v6618_v20 = vld [vmem:[#allocation2 + $0x104] sm:$0xff] }
  0x45   : > { %5784 = vmatprep.subr.mxu0 %v6463_v22  ;;  %v430_v26 = vld [vmem:[#allocation2 + $0x70] sm:$0xff]  ;;  %v436_v44 = vld [vmem:[#allocation2 + $0xa0] sm:$0xff] }
  0x46   : > { %5425 = vmatmul.mubr.msk.f32.gmra.mrb[20].mxu1 %vm361_vm0, %v474_v23  ;;  %v429_v23 = vld [vmem:[#allocation2 + $0x68] sm:$0xff]  ;;  %v6628_v28 = vld [vmem:[#allocation2 + $0x114] sm:$0xff] }
  0x47   : > { %5678 = vmatmul.mubr.msk.f32.gmra.mrb[2].mxu0 %vm361_vm0, %v6470_v24  ;;  %5427 = vmatprep.mubr.msk.f32.mxu1 %vm361_vm0, %v475_v25  ;;  %v6626_v25 = vld [vmem:[#allocation2 + $0x10c] sm:$0xff] }
  0x48   : > { %5680 = vmatprep.mubr.msk.f32.mxu0 %vm361_vm0, %v6473_v27  ;;  %v434_v42 = vld [vmem:[#allocation2 + $0x90] sm:$0xff] }
  0x4a   : > { %5428 = vmatmul.mubr.msk.f32.gmra.mrb[22].mxu1 %vm361_vm0, %v476_v29  ;;  %v431_v29 = vld [vmem:[#allocation2 + $0x78] sm:$0xff] }
  0x4b   : > { %5681 = vmatmul.mubr.msk.f32.gmra.mrb[4].mxu0 %vm361_vm0, %v6485_v30  ;;  %5430 = vmatprep.mubr.msk.f32.mxu1 %vm361_vm0, %v477_v31  ;;  %v6636_v31 = vld [vmem:[#allocation2 + $0x11c] sm:$0xff] }
  0x4c   : > { %5683 = vmatprep.mubr.msk.f32.mxu0 %vm361_vm0, %v6487_v32 }
  0x4e   : > { %5431 = vmatmul.mubr.msk.f32.gmra.mrb[24].mxu1 %vm361_vm0, %v478_v33  ;;  %v432_v33 = vld [vmem:[#allocation2 + $0x80] sm:$0xff] }
  0x4f   : > { %5684 = vmatmul.mubr.msk.f32.gmra.mrb[6].mxu0 %vm361_vm0, %v6495_v34  ;;  %5433 = vmatprep.mubr.msk.f32.mxu1 %vm361_vm0, %v479_v35  ;;  %v6638_v35 = vld [vmem:[#allocation2 + $0x124] sm:$0xff] }
  0x50   : > { %5686 = vmatprep.mubr.msk.f32.mxu0 %vm361_vm0, %v6497_v36 }
  0x52   : > { %5434 = vmatmul.mubr.msk.f32.gmra.mrb[26].mxu1 %vm361_vm0, %v480_v38  ;;  %v433_v38 = vld [vmem:[#allocation2 + $0x88] sm:$0xff] }
  0x53   : > { %5687 = vmatmul.mubr.msk.f32.gmra.mrb[8].mxu0 %vm361_vm0, %v6505_v39  ;;  %5436 = vmatprep.mubr.msk.f32.mxu1 %vm361_vm0, %v481_v40  ;;  %v6646_v40 = vld [vmem:[#allocation2 + $0x12c] sm:$0xff] }
  0x54   : > { %5689 = vmatprep.mubr.msk.f32.mxu0 %vm361_vm0, %v6507_v41 }
  0x56   : > { %5437 = vmatmul.mubr.msk.f32.gmra.mrb[28].mxu1 %vm361_vm0, %v482_v43  ;;  %v435_v43 = vld [vmem:[#allocation2 + $0x98] sm:$0xff] }
  0x57   : > { %5690 = vmatmul.mubr.msk.f32.gmra.mrb[10].mxu0 %vm361_vm0, %v6518_v45  ;;  %5439 = vmatprep.mubr.msk.f32.mxu1 %vm361_vm0, %v483_v46  ;;  %v6658_v46 = vld [vmem:[%s7299_s2 + $0x40] sm:$0xff] }
  0x58   : > { %5692 = vmatprep.mubr.msk.f32.mxu0 %vm361_vm0, %v6521_v47 }
  0x5a   : > { %5440 = vmatmul.mubr.msk.f32.gmra.mrb[30].mxu1 %vm361_vm0, %v484_v48  ;;  %v437_v48 = vld [vmem:[#allocation2 + $0xa8] sm:$0xff] }
  0x5b   : > { %5693 = vmatmul.mubr.msk.f32.gmra.mrb[12].mxu0 %vm361_vm0, %v6529_v49  ;;  %5442 = vmatprep.mubr.msk.f32.mxu1 %vm361_vm0, %v485_v50  ;;  %v439_v50 = vld [vmem:[#allocation2 + $0xb8] sm:$0xff] }
  0x5c   : > { %5695 = vmatprep.mubr.msk.f32.mxu0 %vm361_vm0, %v6531_v51 }
  0x5e   : > { %5443 = vmatmul.mubr.msk.f32.gmra.mrb[32].mxu1 %vm361_vm0, %v486_v52  ;;  %v6239_v52 = vmov 0  }
  0x5f   : > { %5696 = vmatmul.mubr.msk.f32.gmra.mrb[14].mxu0 %vm361_vm0, %v6539_v53  ;;  %5445 = vmatprep.mubr.msk.f32.mxu1 %vm361_vm0, %v487_v54  ;;  %v4186_v54 = vld [vmem:[%s7300_s3] sm:$0xff] }
  0x60   : > { %5698 = vmatprep.mubr.msk.f32.mxu0 %vm361_vm0, %v6541_v55  ;;  %6212 = vset.pattern.permute.xlu0 %v6239_v52 }
  0x61   : > { %6213 = vset.pattern.permute.xlu1 %v6239_v52  ;;  %4224 = vperm.xlu0 %6212, %v4186_v54   ;;  %v4211_v52 = vld [vmem:[%s7300_s3 + $0xc8] sm:$0xff] }
  0x62   : > { %5446 = vmatmul.mubr.msk.f32.gmra.mrb[34].mxu1 %vm361_vm0, %v488_v56  ;;  %v6724_v56 = vld [vmem:[#allocation2 + $0x1a] sm:$0xff]  ;;  %v3341_v54 = vld [vmem:[#allocation2 + $0x6d] sm:$0xff] }
  0x63   : > { %5699 = vmatmul.mubr.msk.f32.gmra.mrb[16].mxu0 %vm361_vm0, %v6549_v57  ;;  %5450 = vmatprep.mubr.msk.f32.mxu1 %vm361_vm0, %v416_v58  ;;  %v4187_v58 = vld [vmem:[%s7300_s3 + $0x8] sm:$0xff] }
  0x64   : > { %5701 = vmatprep.mubr.msk.f32.mxu0 %vm361_vm0, %v6551_v59 }
  0x65   : > { %4229 = vperm.xlu0 %6212, %v4187_v58   ;;  %v3342_v58 = vld [vmem:[#allocation2 + $0x75] sm:$0xff] }
  0x66   : > { %5451 = vmatmul.mubr.msk.f32.vlgmr.msra.gmra.mrb[0].mxu1 %vm361_vm0, %v417_v60  ;;  %v6745_v60 = vld [vmem:[#allocation2 + $0x2a] sm:$0xff] }
  0x67   : > { %5505 = vmatpush3.msra.mxu1 %v6385_v37  ;;  %5702 = vmatmul.mubr.msk.f32.gmra.mrb[18].mxu0 %vm361_vm0, %v6559_v61  ;;  %v421_v37 = vld [vmem:[#allocation2 + $0x28] sm:$0xff] }
  0x68   : > { %5453 = vmatprep.mubr.msk.f32.mxu1 %vm361_vm0, %v418_v62  ;;  %5704 = vmatprep.mubr.msk.f32.mxu0 %vm361_vm0, %v6561_v63  ;;  %v6755_v62 = vld [vmem:[#allocation2 + $0x32] sm:$0xff] }
  0x69   : > { %5560 = vmatprep.subr.mxu1 %v6567_v0 }
  0x6a   : > { %5454 = vmatmul.mubr.msk.f32.gmra.mrb[2].mxu1 %vm361_vm0, %v419_v2  ;;  %v4192_v2 = vld [vmem:[%s7300_s3 + $0x30] sm:$0xff] }
  0x6b   : > { %5705 = vmatmul.mubr.msk.f32.gmra.mrb[20].mxu0 %vm361_vm0, %v6575_v3  ;;  %5456 = vmatprep.mubr.msk.f32.mxu1 %vm361_vm0, %v420_v4  ;;  %v6781_v4 = vld [vmem:[#allocation2 + $0x4a] sm:$0xff] }
  0x6c   : > { %5707 = vmatprep.mubr.msk.f32.mxu0 %vm361_vm0, %v6577_v5 }
  0x6e   : > { %5457 = vmatmul.mubr.msk.f32.gmra.mrb[4].mxu1 %vm361_vm0, %v421_v37  ;;  %v4194_v37 = vld [vmem:[%s7300_s3 + $0x40] sm:$0xff] }
  0x6f   : > { %5708 = vmatmul.mubr.msk.f32.gmra.mrb[22].mxu0 %vm361_vm0, %v6586_v6  ;;  %5459 = vmatprep.mubr.msk.f32.mxu1 %vm361_vm0, %v422_v7  ;;  %v6799_v7 = vld [vmem:[#allocation2 + $0x5a] sm:$0xff] }
  0x70   : > { %5710 = vmatprep.mubr.msk.f32.mxu0 %vm361_vm0, %v6588_v8 }
  0x72   : > { %5460 = vmatmul.mubr.msk.f32.gmra.mrb[6].mxu1 %vm361_vm0, %v423_v9  ;;  %v4196_v9 = vld [vmem:[%s7300_s3 + $0x50] sm:$0xff] }
  0x73   : > { %5711 = vmatmul.mubr.msk.f32.gmra.mrb[24].mxu0 %vm361_vm0, %v6596_v10  ;;  %5462 = vmatprep.mubr.msk.f32.mxu1 %vm361_vm0, %v424_v11  ;;  %v6817_v11 = vld [vmem:[#allocation2 + $0x6a] sm:$0xff] }
  0x74   : > { %5713 = vmatprep.mubr.msk.f32.mxu0 %vm361_vm0, %v6598_v12 }
  0x76   : > { %5463 = vmatmul.mubr.msk.f32.gmra.mrb[8].mxu1 %vm361_vm0, %v425_v13  ;;  %v4198_v13 = vld [vmem:[%s7300_s3 + $0x60] sm:$0xff] }
  0x77   : > { %5714 = vmatmul.mubr.msk.f32.gmra.mrb[26].mxu0 %vm361_vm0, %v6606_v14  ;;  %5465 = vmatprep.mubr.msk.f32.mxu1 %vm361_vm0, %v426_v15  ;;  %v6835_v15 = vld [vmem:[#allocation2 + $0x7a] sm:$0xff] }
  0x78   : > { %5716 = vmatprep.mubr.msk.f32.mxu0 %vm361_vm0, %v6608_v16 }
  0x7a   : > { %5466 = vmatmul.mubr.msk.f32.gmra.mrb[10].mxu1 %vm361_vm0, %v427_v17  ;;  %v4200_v17 = vld [vmem:[%s7300_s3 + $0x70] sm:$0xff] }
  0x7b   : > { %5717 = vmatmul.mubr.msk.f32.gmra.mrb[28].mxu0 %vm361_vm0, %v6616_v18  ;;  %5468 = vmatprep.mubr.msk.f32.mxu1 %vm361_vm0, %v428_v19  ;;  %v2939_v19 = vld [vmem:[#allocation2 + $0x134] sm:$0xff] }
  0x7c   : > { %5719 = vmatprep.mubr.msk.f32.mxu0 %vm361_vm0, %v6618_v20 }
  0x7e   : > { %5469 = vmatmul.mubr.msk.f32.gmra.mrb[12].mxu1 %vm361_vm0, %v429_v23  ;;  %v4201_v23 = vld [vmem:[%s7300_s3 + $0x78] sm:$0xff] }
  0x7f   : > { %5720 = vmatmul.mubr.msk.f32.gmra.mrb[30].mxu0 %vm361_vm0, %v6626_v25  ;;  %5471 = vmatprep.mubr.msk.f32.mxu1 %vm361_vm0, %v430_v26  ;;  %v2940_v26 = vld [vmem:[#allocation2 + $0x13c] sm:$0xff] }
  0x80   : > { %5722 = vmatprep.mubr.msk.f32.mxu0 %vm361_vm0, %v6628_v28 }
  0x82   : > { %5472 = vmatmul.mubr.msk.f32.gmra.mrb[14].mxu1 %vm361_vm0, %v431_v29  ;;  %v3332_v29 = vld [vmem:[#allocation2 + $0x25] sm:$0xff] }
  0x83   : > { %5723 = vmatmul.mubr.msk.f32.gmra.mrb[32].mxu0 %vm361_vm0, %v6636_v31  ;;  %5474 = vmatprep.mubr.msk.f32.mxu1 %vm361_vm0, %v432_v33  ;;  %v4203_v33 = vld [vmem:[%s7300_s3 + $0x88] sm:$0xff] }
  0x84   : > { %5725 = vmatprep.mubr.msk.f32.mxu0 %vm361_vm0, %v6638_v35 }
  0x86   : > { %5475 = vmatmul.mubr.msk.f32.gmra.mrb[16].mxu1 %vm361_vm0, %v433_v38  ;;  %v3333_v38 = vld [vmem:[#allocation2 + $0x2d] sm:$0xff] }
  0x87   : > { %5726 = vmatmul.mubr.msk.f32.gmra.mrb[34].mxu0 %vm361_vm0, %v6646_v40  ;;  %5477 = vmatprep.mubr.msk.f32.mxu1 %vm361_vm0, %v434_v42  ;;  %v3334_v42 = vld [vmem:[#allocation2 + $0x35] sm:$0xff] }
  0x88   : > { %5730 = vmatprep.mubr.msk.f32.mxu0 %vm361_vm0, %v6457_v21  ;;  %v438_v21 = vld [vmem:[#allocation2 + $0xb0] sm:$0xff] }
  0x8a   : > { %5478 = vmatmul.mubr.msk.f32.gmra.mrb[18].mxu1 %vm361_vm0, %v435_v43  ;;  %v6885_v43 = vld [vmem:[#allocation2 + $0xaa] sm:$0xff] }
  0x8b   : > { %5731 = vmatmul.mubr.msk.f32.vlgmr.msra.gmra.mrb[0].mxu0 %vm361_vm0, %v6470_v24  ;;  %5480 = vmatprep.mubr.msk.f32.mxu1 %vm361_vm0, %v436_v44  ;;  %v440_v24 = vld [vmem:[#allocation2 + $0xc0] sm:$0xff]  ;;  %v4205_v44 = vld [vmem:[%s7300_s3 + $0x98] sm:$0xff] }
  0x8c   : > { %5785 = vmatpush3.msra.mxu0 %v6463_v22  ;;  %5733 = vmatprep.mubr.msk.f32.mxu0 %vm361_vm0, %v6473_v27  ;;  %v441_v22 = vld [vmem:[#allocation2 + $0xc8] sm:$0xff]  ;;  %v442_v27 = vld [vmem:[#allocation2 + $0xd0] sm:$0xff] }
  0x8d   : > { %5840 = vmatprep.subr.mxu0 %v6658_v46 }
  0x8e   : > { %5481 = vmatmul.mubr.msk.f32.gmra.mrb[20].mxu1 %vm361_vm0, %v437_v48  ;;  %v4206_v48 = vld [vmem:[%s7300_s3 + $0xa0] sm:$0xff] }
  0x8f   : > { %5734 = vmatmul.mubr.msk.f32.gmra.mrb[2].mxu0 %vm361_vm0, %v6485_v30  ;;  %5483 = vmatprep.mubr.msk.f32.mxu1 %vm361_vm0, %v438_v21  ;;  %v443_v30 = vld [vmem:[#allocation2 + $0xd8] sm:$0xff] }
  0x90   : > { %5736 = vmatprep.mubr.msk.f32.mxu0 %vm361_vm0, %v6487_v32  ;;  %v444_v32 = vld [vmem:[#allocation2 + $0xe0] sm:$0xff] }
  0x91   : > { %v3335_v21 = vld [vmem:[#allocation2 + $0x3d] sm:$0xff] }
  0x92   : > { %5484 = vmatmul.mubr.msk.f32.gmra.mrb[22].mxu1 %vm361_vm0, %v439_v50  ;;  %v6895_v50 = vld [vmem:[#allocation2 + $0xb2] sm:$0xff] }
  0x93   : > { %5737 = vmatmul.mubr.msk.f32.gmra.mrb[4].mxu0 %vm361_vm0, %v6495_v34  ;;  %5486 = vmatprep.mubr.msk.f32.mxu1 %vm361_vm0, %v440_v24  ;;  %v445_v34 = vld [vmem:[#allocation2 + $0xe8] sm:$0xff] }
  0x94   : > { %5739 = vmatprep.mubr.msk.f32.mxu0 %vm361_vm0, %v6497_v36  ;;  %v446_v36 = vld [vmem:[#allocation2 + $0xf0] sm:$0xff]  ;;  %v3336_v24 = vld [vmem:[#allocation2 + $0x45] sm:$0xff] }
  0x96   : > { %5487 = vmatmul.mubr.msk.f32.gmra.mrb[24].mxu1 %vm361_vm0, %v441_v22  ;;  %v6902_v22 = vld [vmem:[#allocation2 + $0xba] sm:$0xff] }
  0x97   : > { %5740 = vmatmul.mubr.msk.f32.gmra.mrb[6].mxu0 %vm361_vm0, %v6505_v39  ;;  %5489 = vmatprep.mubr.msk.f32.mxu1 %vm361_vm0, %v442_v27  ;;  %v447_v39 = vld [vmem:[#allocation2 + $0xf8] sm:$0xff]  ;;  %v4208_v27 = vld [vmem:[%s7300_s3 + $0xb0] sm:$0xff] }
  0x98   : > { %5742 = vmatprep.mubr.msk.f32.mxu0 %vm361_vm0, %v6507_v41  ;;  %v448_v41 = vld [vmem:[#allocation2 + $0x100] sm:$0xff] }
  0x9a   : > { %5490 = vmatmul.mubr.msk.f32.gmra.mrb[26].mxu1 %vm361_vm0, %v443_v30  ;;  %v3337_v30 = vld [vmem:[#allocation2 + $0x4d] sm:$0xff] }
  0x9b   : > { %5743 = vmatmul.mubr.msk.f32.gmra.mrb[8].mxu0 %vm361_vm0, %v6518_v45  ;;  %5492 = vmatprep.mubr.msk.f32.mxu1 %vm361_vm0, %v444_v32  ;;  %v449_v45 = vld [vmem:[#allocation2 + $0x108] sm:$0xff] }
  0x9c   : > { %5745 = vmatprep.mubr.msk.f32.mxu0 %vm361_vm0, %v6521_v47  ;;  %v450_v47 = vld [vmem:[#allocation2 + $0x110] sm:$0xff]  ;;  %v6911_v32 = vld [vmem:[#allocation2 + $0xc2] sm:$0xff] }
  0x9e   : > { %5493 = vmatmul.mubr.msk.f32.gmra.mrb[28].mxu1 %vm361_vm0, %v445_v34  ;;  %v3338_v34 = vld [vmem:[#allocation2 + $0x55] sm:$0xff] }
  0x9f   : > { %5746 = vmatmul.mubr.msk.f32.gmra.mrb[10].mxu0 %vm361_vm0, %v6529_v49  ;;  %5495 = vmatprep.mubr.msk.f32.mxu1 %vm361_vm0, %v446_v36  ;;  %v451_v49 = vld [vmem:[#allocation2 + $0x118] sm:$0xff]  ;;  %v6918_v36 = vld [vmem:[#allocation2 + $0xca] sm:$0xff] }
  0xa0   : > { %5748 = vmatprep.mubr.msk.f32.mxu0 %vm361_vm0, %v6531_v51  ;;  %v1197_v51 = vld [vmem:[#allocation2 + $0x2] sm:$0xff] }
  0xa2   : > { %5496 = vmatmul.mubr.msk.f32.gmra.mrb[30].mxu1 %vm361_vm0, %v447_v39  ;;  %v4209_v39 = vld [vmem:[%s7300_s3 + $0xb8] sm:$0xff] }
  0xa3   : > { %5749 = vmatmul.mubr.msk.f32.gmra.mrb[12].mxu0 %vm361_vm0, %v6539_v53  ;;  %5498 = vmatprep.mubr.msk.f32.mxu1 %vm361_vm0, %v448_v41  ;;  %v1198_v53 = vld [vmem:[#allocation2 + $0xa] sm:$0xff]  ;;  %v4210_v41 = vld [vmem:[%s7300_s3 + $0xc0] sm:$0xff] }
  0xa4   : > { %5751 = vmatprep.mubr.msk.f32.mxu0 %vm361_vm0, %v6541_v55  ;;  %v6718_v55 = vld [vmem:[#allocation2 + $0x12] sm:$0xff] }
  0xa6   : > { %5499 = vmatmul.mubr.msk.f32.gmra.mrb[32].mxu1 %vm361_vm0, %v449_v45  ;;  %v3339_v45 = vld [vmem:[#allocation2 + $0x5d] sm:$0xff] }
  0xa7   : > { %5752 = vmatmul.mubr.msk.f32.gmra.mrb[14].mxu0 %vm361_vm0, %v6549_v57  ;;  %5501 = vmatprep.mubr.msk.f32.mxu1 %vm361_vm0, %v450_v47  ;;  %v4188_v57 = vld [vmem:[%s7300_s3 + $0x10] sm:$0xff] }
  0xa8   : > { %5754 = vmatprep.mubr.msk.f32.mxu0 %vm361_vm0, %v6551_v59  ;;  %v6736_v59 = vld [vmem:[#allocation2 + $0x22] sm:$0xff]  ;;  %4234 = vperm.xlu1 %6213, %v4188_v57   ;;  %v6927_v47 = vld [vmem:[#allocation2 + $0xd2] sm:$0xff] }
  0xa9   : > { %v6943_v57 = vld [vmem:[#allocation2 + $0xe2] sm:$0xff] }
  0xaa   : > { %5502 = vmatmul.mubr.msk.f32.gmra.mrb[34].mxu1 %vm361_vm0, %v451_v49  ;;  %v3340_v49 = vld [vmem:[#allocation2 + $0x65] sm:$0xff] }
  0xab   : > { %5755 = vmatmul.mubr.msk.f32.gmra.mrb[16].mxu0 %vm361_vm0, %v6559_v61  ;;  %5506 = vmatprep.mubr.msk.f32.mxu1 %vm361_vm0, %v1197_v51  ;;  %v4189_v61 = vld [vmem:[%s7300_s3 + $0x18] sm:$0xff] }
  0xac   : > { %5757 = vmatprep.mubr.msk.f32.mxu0 %vm361_vm0, %v6561_v63  ;;  %4239 = vperm.xlu1 %6213, %v4189_v61   ;;  %v6763_v63 = vld [vmem:[#allocation2 + $0x3a] sm:$0xff] }
  0xad   : > { %v6934_v51 = vld [vmem:[#allocation2 + $0xda] sm:$0xff] }
  0xae   : > { %5507 = vmatmul.mubr.msk.f32.vlgmr.msra.gmra.mrb[0].mxu1 %vm361_vm0, %v1198_v53  ;;  %v4212_v53 = vld [vmem:[%s7300_s3 + $0xd0] sm:$0xff]  ;;  %v4213_v61 = vld [vmem:[%s7300_s3 + $0xd8] sm:$0xff] }
  0xaf   : > { %5561 = vmatpush3.msra.mxu1 %v6567_v0  ;;  %5758 = vmatmul.mubr.msk.f32.gmra.mrb[18].mxu0 %vm361_vm0, %v6575_v3  ;;  %v4191_v0 = vld [vmem:[%s7300_s3 + $0x28] sm:$0xff] }
  0xb0   : > { %5509 = vmatprep.mubr.msk.f32.mxu1 %vm361_vm0, %v6718_v55  ;;  %5760 = vmatprep.mubr.msk.f32.mxu0 %vm361_vm0, %v6577_v5  ;;  %v6773_v3 = vld [vmem:[#allocation2 + $0x42] sm:$0xff]  ;;  %v4193_v5 = vld [vmem:[%s7300_s3 + $0x38] sm:$0xff] }
  0xb1   : > { %5896 = vmatprep.subr.mxu1 %v6297_v1  ;;  %v4190_v1 = vld [vmem:[%s7300_s3 + $0x20] sm:$0xff]  ;;  %4249 = vperm.xlu1 %6213, %v4191_v0  }
  0xb2   : > { %5510 = vmatmul.mubr.msk.f32.gmra.mrb[2].mxu1 %vm361_vm0, %v6724_v56  ;;  %4244 = vperm.xlu0 %6212, %v4190_v1   ;;  %v6953_v1 = vld [vmem:[#allocation2 + $0xea] sm:$0xff]  ;;  %v4214_v0 = vld [vmem:[%s7300_s3 + $0xe0] sm:$0xff] }
  0xb3   : > { %5761 = vmatmul.mubr.msk.f32.gmra.mrb[20].mxu0 %vm361_vm0, %v6586_v6  ;;  %5512 = vmatprep.mubr.msk.f32.mxu1 %vm361_vm0, %v6736_v59  ;;  %v6791_v6 = vld [vmem:[#allocation2 + $0x52] sm:$0xff] }
  0xb4   : > { %5763 = vmatprep.mubr.msk.f32.mxu0 %vm361_vm0, %v6588_v8  ;;  %v4195_v8 = vld [vmem:[%s7300_s3 + $0x48] sm:$0xff] }
  0xb5   : > { %4259 = vperm.xlu1 %6213, %v4193_v5   ;;  %v6959_v5 = vld [vmem:[#allocation2 + $0xf2] sm:$0xff] }
  0xb6   : > { %5513 = vmatmul.mubr.msk.f32.gmra.mrb[4].mxu1 %vm361_vm0, %v6745_v60  ;;  %4254 = vperm.xlu0 %6212, %v4192_v2   ;;  %v3343_v2 = vld [vmem:[#allocation2 + $0x7d] sm:$0xff] }
  0xb7   : > { %5764 = vmatmul.mubr.msk.f32.gmra.mrb[22].mxu0 %vm361_vm0, %v6596_v10  ;;  %5515 = vmatprep.mubr.msk.f32.mxu1 %vm361_vm0, %v6755_v62  ;;  %v6809_v10 = vld [vmem:[#allocation2 + $0x62] sm:$0xff] }
  0xb8   : > { %5766 = vmatprep.mubr.msk.f32.mxu0 %vm361_vm0, %v6598_v12  ;;  %v4197_v12 = vld [vmem:[%s7300_s3 + $0x58] sm:$0xff] }
  0xb9   : > { %4269 = vperm.xlu1 %6213, %v4195_v8   ;;  %v4215_v8 = vld [vmem:[%s7300_s3 + $0xe8] sm:$0xff] }
  0xba   : > { %5516 = vmatmul.mubr.msk.f32.gmra.mrb[6].mxu1 %vm361_vm0, %v6763_v63  ;;  %4264 = vperm.xlu0 %6212, %v4194_v37   ;;  %v3344_v37 = vld [vmem:[#allocation2 + $0x85] sm:$0xff] }
  0xbb   : > { %5767 = vmatmul.mubr.msk.f32.gmra.mrb[24].mxu0 %vm361_vm0, %v6606_v14  ;;  %5518 = vmatprep.mubr.msk.f32.mxu1 %vm361_vm0, %v6773_v3  ;;  %v6827_v14 = vld [vmem:[#allocation2 + $0x72] sm:$0xff] }
  0xbc   : > { %5769 = vmatprep.mubr.msk.f32.mxu0 %vm361_vm0, %v6608_v16  ;;  %v4199_v16 = vld [vmem:[%s7300_s3 + $0x68] sm:$0xff] }
  0xbd   : > { %4279 = vperm.xlu1 %6213, %v4197_v12   ;;  %v4216_v12 = vld [vmem:[%s7300_s3 + $0xf0] sm:$0xff] }
  0xbe   : > { %5519 = vmatmul.mubr.msk.f32.gmra.mrb[8].mxu1 %vm361_vm0, %v6781_v4  ;;  %4274 = vperm.xlu0 %6212, %v4196_v9   ;;  %v6969_v9 = vld [vmem:[#allocation2 + $0xfa] sm:$0xff] }
  0xbf   : > { %5770 = vmatmul.mubr.msk.f32.gmra.mrb[26].mxu0 %vm361_vm0, %v6616_v18  ;;  %5521 = vmatprep.mubr.msk.f32.mxu1 %vm361_vm0, %v6791_v6  ;;  %v6845_v18 = vld [vmem:[#allocation2 + $0x82] sm:$0xff] }
  0xc0   : > { %5772 = vmatprep.mubr.msk.f32.mxu0 %vm361_vm0, %v6618_v20  ;;  %v6853_v20 = vld [vmem:[#allocation2 + $0x8a] sm:$0xff] }
  0xc1   : > { %4289 = vperm.xlu1 %6213, %v4199_v16   ;;  %v6975_v16 = vld [vmem:[#allocation2 + $0x102] sm:$0xff] }
  0xc2   : > { %5522 = vmatmul.mubr.msk.f32.gmra.mrb[10].mxu1 %vm361_vm0, %v6799_v7  ;;  %4284 = vperm.xlu0 %6212, %v4198_v13   ;;  %v3345_v13 = vld [vmem:[#allocation2 + $0x8d] sm:$0xff] }
  0xc3   : > { %5773 = vmatmul.mubr.msk.f32.gmra.mrb[28].mxu0 %vm361_vm0, %v6626_v25  ;;  %5524 = vmatprep.mubr.msk.f32.mxu1 %vm361_vm0, %v6809_v10  ;;  %v4202_v25 = vld [vmem:[%s7300_s3 + $0x80] sm:$0xff] }
  0xc4   : > { %5775 = vmatprep.mubr.msk.f32.mxu0 %vm361_vm0, %v6628_v28  ;;  %v6862_v28 = vld [vmem:[#allocation2 + $0x92] sm:$0xff] }
  0xc5   : > { %4299 = vperm.xlu1 %6213, %v4201_v23   ;;  %v6985_v23 = vld [vmem:[#allocation2 + $0x10a] sm:$0xff] }
  0xc6   : > { %5525 = vmatmul.mubr.msk.f32.gmra.mrb[12].mxu1 %vm361_vm0, %v6817_v11  ;;  %4294 = vperm.xlu0 %6212, %v4200_v17   ;;  %v3346_v17 = vld [vmem:[#allocation2 + $0x95] sm:$0xff] }
  0xc7   : > { %5776 = vmatmul.mubr.msk.f32.gmra.mrb[30].mxu0 %vm361_vm0, %v6636_v31  ;;  %5527 = vmatprep.mubr.msk.f32.mxu1 %vm361_vm0, %v6827_v14  ;;  %v6869_v31 = vld [vmem:[#allocation2 + $0x9a] sm:$0xff] }
  0xc8   : > { %5778 = vmatprep.mubr.msk.f32.mxu0 %vm361_vm0, %v6638_v35  ;;  %v4204_v35 = vld [vmem:[%s7300_s3 + $0x90] sm:$0xff] }
  0xc9   : > { %4309 = vperm.xlu1 %6213, %v4203_v33   ;;  %v3348_v33 = vld [vmem:[#allocation2 + $0xa5] sm:$0xff] }
  0xca   : > { %5528 = vmatmul.mubr.msk.f32.gmra.mrb[14].mxu1 %vm361_vm0, %v6835_v15  ;;  %4304 = vperm.xlu0 %6212, %v4202_v25   ;;  %v4218_v25 = vld [vmem:[%s7300_s3 + $0x100] sm:$0xff] }
  0xcb   : > { %5779 = vmatmul.mubr.msk.f32.gmra.mrb[32].mxu0 %vm361_vm0, %v6646_v40  ;;  %5530 = vmatprep.mubr.msk.f32.mxu1 %vm361_vm0, %v6845_v18  ;;  %v6878_v40 = vld [vmem:[#allocation2 + $0xa2] sm:$0xff] }
  0xcc   : > { %5781 = vmatprep.mubr.msk.f32.mxu0 %vm361_vm0, %v2939_v19  ;;  %v4217_v19 = vld [vmem:[%s7300_s3 + $0xf8] sm:$0xff] }
  0xcd   : > { %4319 = vperm.xlu1 %6213, %v4205_v44   ;;  %v3349_v44 = vld [vmem:[#allocation2 + $0xad] sm:$0xff] }
  0xce   : > { %5531 = vmatmul.mubr.msk.f32.gmra.mrb[16].mxu1 %vm361_vm0, %v6853_v20  ;;  %4314 = vperm.xlu0 %6212, %v4204_v35   ;;  %v4219_v35 = vld [vmem:[%s7300_s3 + $0x108] sm:$0xff] }
  0xcf   : > { %5782 = vmatmul.mubr.msk.f32.gmra.mrb[34].mxu0 %vm361_vm0, %v2940_v26  ;;  %5533 = vmatprep.mubr.msk.f32.mxu1 %vm361_vm0, %v6862_v28  ;;  %v3347_v26 = vld [vmem:[#allocation2 + $0x9d] sm:$0xff] }
  0xd0   : > { %5786 = vmatprep.mubr.msk.f32.mxu0 %vm361_vm0, %v3332_v29  ;;  %v6991_v29 = vld [vmem:[#allocation2 + $0x112] sm:$0xff] }
  0xd2   : > { %5534 = vmatmul.mubr.msk.f32.gmra.mrb[18].mxu1 %vm361_vm0, %v6869_v31  ;;  %4324 = vperm.xlu0 %6212, %v4206_v48   ;;  %v3350_v48 = vld [vmem:[#allocation2 + $0xb5] sm:$0xff] }
  0xd3   : > { %5787 = vmatmul.mubr.msk.f32.vlgmr.msra.gmra.mrb[0].mxu0 %vm361_vm0, %v3333_v38  ;;  %5536 = vmatprep.mubr.msk.f32.mxu1 %vm361_vm0, %v6878_v40  ;;  %v7001_v38 = vld [vmem:[#allocation2 + $0x11a] sm:$0xff] }
  0xd4   : > { %5841 = vmatpush3.msra.mxu0 %v6658_v46  ;;  %5789 = vmatprep.mubr.msk.f32.mxu0 %vm361_vm0, %v3334_v42  ;;  %v4207_v46 = vld [vmem:[%s7300_s3 + $0xa8] sm:$0xff]  ;;  %v4220_v42 = vld [vmem:[%s7300_s3 + $0x110] sm:$0xff] }
  0xd5   : > { %4329 = vperm.xlu1 %6213, %v4207_v46   ;;  %v3352_v46 = vld [vmem:[#allocation2 + $0xc5] sm:$0xff] }
  0xd6   : > { %5537 = vmatmul.mubr.msk.f32.gmra.mrb[20].mxu1 %vm361_vm0, %v6885_v43  ;;  %4334 = vperm.xlu0 %6212, %v4208_v27   ;;  %v6214_v27 = vld [vmem:[%s7299_s2 + $0x20] sm:$0xff] }
  0xd7   : > { %5790 = vmatmul.mubr.msk.f32.gmra.mrb[2].mxu0 %vm361_vm0, %v3335_v21  ;;  %5539 = vmatprep.mubr.msk.f32.mxu1 %vm361_vm0, %v6895_v50  ;;  %v4221_v21 = vld [vmem:[%s7300_s3 + $0x118] sm:$0xff] }
  0xd8   : > { %5792 = vmatprep.mubr.msk.f32.mxu0 %vm361_vm0, %v3336_v24  ;;  %v3351_v24 = vld [vmem:[#allocation2 + $0xbd] sm:$0xff] }
  0xd9   : > { %4339 = vperm.xlu1 %6213, %v4209_v39   ;;  %v3770_v39 = vld [vmem:[#allocation2 + $0x7e] sm:$0xff] }
  0xda   : > { %5540 = vmatmul.mubr.msk.f32.gmra.mrb[22].mxu1 %vm361_vm0, %v6902_v22  ;;  %4344 = vperm.xlu0 %6212, %v4210_v41   ;;  %v3771_v41 = vld [vmem:[#allocation2 + $0x86] sm:$0xff] }
  0xdb   : > { %5793 = vmatmul.mubr.msk.f32.gmra.mrb[4].mxu0 %vm361_vm0, %v3337_v30  ;;  %5542 = vmatprep.mubr.msk.f32.mxu1 %vm361_vm0, %v6911_v32  ;;  %v3354_v30 = vld [vmem:[#allocation2 + $0xd5] sm:$0xff] }
  0xdc   : > { %5795 = vmatprep.mubr.msk.f32.mxu0 %vm361_vm0, %v3338_v34  ;;  %v3356_v34 = vld [vmem:[#allocation2 + $0xe5] sm:$0xff] }
  0xdd   : > { %4349 = vperm.xlu1 %6213, %v4211_v52   ;;  %v3775_v52 = vld [vmem:[#allocation2 + $0xa6] sm:$0xff] }
  0xde   : > { %5543 = vmatmul.mubr.msk.f32.gmra.mrb[24].mxu1 %vm361_vm0, %v6918_v36  ;;  %4354 = vperm.xlu0 %6212, %v4212_v53   ;;  %v1659_v53 = vld [vmem:[#allocation2 + $0x12a] sm:$0xff] }
  0xdf   : > { %5796 = vmatmul.mubr.msk.f32.gmra.mrb[6].mxu0 %vm361_vm0, %v3339_v45  ;;  %5545 = vmatprep.mubr.msk.f32.mxu1 %vm361_vm0, %v6927_v47  ;;  %v3772_v45 = vld [vmem:[#allocation2 + $0x8e] sm:$0xff] }
  0xe0   : > { %5798 = vmatprep.mubr.msk.f32.mxu0 %vm361_vm0, %v3340_v49  ;;  %v3774_v49 = vld [vmem:[#allocation2 + $0x9e] sm:$0xff] }
  0xe1   : > { %4359 = vperm.xlu1 %6213, %v4213_v61   ;;  %v2070_v61 = vld [vmem:[#allocation2 + $0xab] sm:$0xff] }
  0xe2   : > { %5546 = vmatmul.mubr.msk.f32.gmra.mrb[26].mxu1 %vm361_vm0, %v6934_v51  ;;  %4364 = vperm.xlu0 %6212, %v4214_v0   ;;  %v2071_v0 = vld [vmem:[#allocation2 + $0xb3] sm:$0xff] }
  0xe3   : > { %5799 = vmatmul.mubr.msk.f32.gmra.mrb[8].mxu0 %vm361_vm0, %v3341_v54  ;;  %5548 = vmatprep.mubr.msk.f32.mxu1 %vm361_vm0, %v6943_v57  ;;  %v3776_v54 = vld [vmem:[#allocation2 + $0xae] sm:$0xff] }
  0xe4   : > { %5801 = vmatprep.mubr.msk.f32.mxu0 %vm361_vm0, %v3342_v58  ;;  %v3777_v58 = vld [vmem:[#allocation2 + $0xb6] sm:$0xff] }
  0xe5   : > { %4369 = vperm.xlu1 %6213, %v4215_v8   ;;  %v2073_v8 = vld [vmem:[#allocation2 + $0xc3] sm:$0xff] }
  0xe6   : > { %5549 = vmatmul.mubr.msk.f32.gmra.mrb[28].mxu1 %vm361_vm0, %v6953_v1  ;;  %4374 = vperm.xlu0 %6212, %v4216_v12   ;;  %v2074_v12 = vld [vmem:[#allocation2 + $0xcb] sm:$0xff] }
  0xe7   : > { %5802 = vmatmul.mubr.msk.f32.gmra.mrb[10].mxu0 %vm361_vm0, %v3343_v2  ;;  %5551 = vmatprep.mubr.msk.f32.mxu1 %vm361_vm0, %v6959_v5  ;;  %v3779_v2 = vld [vmem:[#allocation2 + $0xc6] sm:$0xff] }
  0xe8   : > { %5804 = vmatprep.mubr.msk.f32.mxu0 %vm361_vm0, %v3344_v37  ;;  %v3780_v37 = vld [vmem:[#allocation2 + $0xce] sm:$0xff] }
  0xe9   : > { %4379 = vperm.xlu1 %6213, %v4217_v19   ;;  %v2076_v19 = vld [vmem:[#allocation2 + $0xdb] sm:$0xff] }
  0xea   : > { %5552 = vmatmul.mubr.msk.f32.gmra.mrb[30].mxu1 %vm361_vm0, %v6969_v9  ;;  %4384 = vperm.xlu0 %6212, %v4218_v25   ;;  %v2077_v25 = vld [vmem:[#allocation2 + $0xe3] sm:$0xff] }
  0xeb   : > { %5805 = vmatmul.mubr.msk.f32.gmra.mrb[12].mxu0 %vm361_vm0, %v3345_v13  ;;  %5554 = vmatprep.mubr.msk.f32.mxu1 %vm361_vm0, %v6975_v16  ;;  %v3782_v13 = vld [vmem:[#allocation2 + $0xde] sm:$0xff] }
  0xec   : > { %5807 = vmatprep.mubr.msk.f32.mxu0 %vm361_vm0, %v3346_v17  ;;  %v3783_v17 = vld [vmem:[#allocation2 + $0xe6] sm:$0xff] }
  0xed   : > { %4389 = vperm.xlu1 %6213, %v4219_v35   ;;  %v2079_v35 = vld [vmem:[#allocation2 + $0xf3] sm:$0xff] }
  0xee   : > { %5555 = vmatmul.mubr.msk.f32.gmra.mrb[32].mxu1 %vm361_vm0, %v6985_v23  ;;  %4394 = vperm.xlu0 %6212, %v4220_v42   ;;  %v2080_v42 = vld [vmem:[#allocation2 + $0xfb] sm:$0xff] }
  0xef   : > { %5808 = vmatmul.mubr.msk.f32.gmra.mrb[14].mxu0 %vm361_vm0, %v3347_v26  ;;  %5557 = vmatprep.mubr.msk.f32.mxu1 %vm361_vm0, %v6991_v29  ;;  %v3785_v26 = vld [vmem:[#allocation2 + $0xf6] sm:$0xff] }
  0xf0   : > { %5810 = vmatprep.mubr.msk.f32.mxu0 %vm361_vm0, %v3348_v33  ;;  %v3786_v33 = vld [vmem:[#allocation2 + $0xfe] sm:$0xff] }
  0xf1   : > { %4399 = vperm.xlu1 %6213, %v4221_v21   ;;  %v3789_v21 = vld [vmem:[#allocation2 + $0x116] sm:$0xff] }
  0xf2   : > { %5558 = vmatmul.mubr.msk.f32.gmra.mrb[34].mxu1 %vm361_vm0, %v7001_v38 }
  0xf3   : > { %5811 = vmatmul.mubr.msk.f32.gmra.mrb[16].mxu0 %vm361_vm0, %v3349_v44  ;;  %5562 = vmatprep.mubr.msk.f32.mxu1 %vm361_vm0, %v6718_v55  ;;  %v3353_v55 = vld [vmem:[#allocation2 + $0xcd] sm:$0xff] }
  0xf4   : > { %5813 = vmatprep.mubr.msk.f32.mxu0 %vm361_vm0, %v3350_v48  ;;  %v3788_v44 = vld [vmem:[#allocation2 + $0x10e] sm:$0xff]  ;;  %v2081_v48 = vld [vmem:[#allocation2 + $0x103] sm:$0xff] }
  0xf6   : > { %5563 = vmatmul.mubr.msk.f32.vlgmr.msra.gmra.mrb[0].mxu1 %vm361_vm0, %v6724_v56  ;;  %v3355_v56 = vld [vmem:[#allocation2 + $0xdd] sm:$0xff] }
  0xf7   : > { %5897 = vmatpush3.msra.mxu1 %v6214_v27  ;;  %5814 = vmatmul.mubr.msk.f32.gmra.mrb[18].mxu0 %vm361_vm0, %v3351_v24  ;;  %v2082_v24 = vld [vmem:[#allocation2 + $0x10b] sm:$0xff]  ;;  %v2083_v27 = vld [vmem:[#allocation2 + $0x113] sm:$0xff] }
  0xf8   : > { %5565 = vmatprep.mubr.msk.f32.mxu1 %vm361_vm0, %v6736_v59  ;;  %5816 = vmatprep.mubr.msk.f32.mxu0 %vm361_vm0, %v3352_v46  ;;  %v3357_v59 = vld [vmem:[#allocation2 + $0xed] sm:$0xff]  ;;  %v3790_v46 = vld [vmem:[#allocation2 + $0x11e] sm:$0xff] }
  0xfa   : > { %5566 = vmatmul.mubr.msk.f32.gmra.mrb[2].mxu1 %vm361_vm0, %v6745_v60  ;;  %v3358_v60 = vld [vmem:[#allocation2 + $0xf5] sm:$0xff] }
  0xfb   : > { %5817 = vmatmul.mubr.msk.f32.gmra.mrb[20].mxu0 %vm361_vm0, %v3353_v55  ;;  %5568 = vmatprep.mubr.msk.f32.mxu1 %vm361_vm0, %v6755_v62  ;;  %v3359_v62 = vld [vmem:[#allocation2 + $0xfd] sm:$0xff]  ;;  %v3791_v55 = vld [vmem:[#allocation2 + $0x126] sm:$0xff] }
  0xfc   : > { %5819 = vmatprep.mubr.msk.f32.mxu0 %vm361_vm0, %v3354_v30  ;;  %v2084_v30 = vld [vmem:[#allocation2 + $0x11b] sm:$0xff] }
  0xfe   : > { %5569 = vmatmul.mubr.msk.f32.gmra.mrb[4].mxu1 %vm361_vm0, %v6763_v63  ;;  %v3360_v63 = vld [vmem:[#allocation2 + $0x105] sm:$0xff] }
  0xff   : > { %5820 = vmatmul.mubr.msk.f32.gmra.mrb[22].mxu0 %vm361_vm0, %v3355_v56  ;;  %5571 = vmatprep.mubr.msk.f32.mxu1 %vm361_vm0, %v6773_v3  ;;  %v3361_v3 = vld [vmem:[#allocation2 + $0x10d] sm:$0xff] }
 0x100   : > { %5822 = vmatprep.mubr.msk.f32.mxu0 %vm361_vm0, %v3356_v34  ;;  %v3792_v56 = vld [vmem:[#allocation2 + $0x12e] sm:$0xff]  ;;  %v2085_v34 = vld [vmem:[#allocation2 + $0x123] sm:$0xff] }
 0x102   : > { %5572 = vmatmul.mubr.msk.f32.gmra.mrb[6].mxu1 %vm361_vm0, %v6781_v4  ;;  %v3362_v4 = vld [vmem:[#allocation2 + $0x115] sm:$0xff] }
 0x103   : > { %5823 = vmatmul.mubr.msk.f32.gmra.mrb[24].mxu0 %vm361_vm0, %v3357_v59  ;;  %5574 = vmatprep.mubr.msk.f32.mxu1 %vm361_vm0, %v6791_v6  ;;  %v3363_v6 = vld [vmem:[#allocation2 + $0x11d] sm:$0xff] }
 0x104   : > { %5825 = vmatprep.mubr.msk.f32.mxu0 %vm361_vm0, %v3358_v60  ;;  %v3793_v59 = vld [vmem:[#allocation2 + $0x136] sm:$0xff]  ;;  %v2086_v60 = vld [vmem:[#allocation2 + $0x12b] sm:$0xff] }
 0x106   : > { %5575 = vmatmul.mubr.msk.f32.gmra.mrb[8].mxu1 %vm361_vm0, %v6799_v7  ;;  %v3364_v7 = vld [vmem:[#allocation2 + $0x125] sm:$0xff] }
 0x107   : > { %5826 = vmatmul.mubr.msk.f32.gmra.mrb[26].mxu0 %vm361_vm0, %v3359_v62  ;;  %5577 = vmatprep.mubr.msk.f32.mxu1 %vm361_vm0, %v6809_v10  ;;  %v3365_v10 = vld [vmem:[#allocation2 + $0x12d] sm:$0xff]  ;;  %v3794_v62 = vld [vmem:[#allocation2 + $0x13e] sm:$0xff] }
 0x108   : > { %5828 = vmatprep.mubr.msk.f32.mxu0 %vm361_vm0, %v3360_v63  ;;  %v6240_v63 = vmov 0.0  }
 0x109   : > { %4474 = vst [vmem:[%s7163_s25] sm:$0xff] %v6240_v63 }
 0x10a   : > { %5578 = vmatmul.mubr.msk.f32.gmra.mrb[10].mxu1 %vm361_vm0, %v6817_v11  ;;  %v3366_v11 = vld [vmem:[#allocation2 + $0x135] sm:$0xff] }
 0x10b   : > { %5829 = vmatmul.mubr.msk.f32.gmra.mrb[28].mxu0 %vm361_vm0, %v3361_v3  ;;  %5580 = vmatprep.mubr.msk.f32.mxu1 %vm361_vm0, %v6827_v14  ;;  %v3367_v14 = vld [vmem:[#allocation2 + $0x13d] sm:$0xff] }
 0x10c   : > { %5831 = vmatprep.mubr.msk.f32.mxu0 %vm361_vm0, %v3362_v4 }
 0x10e   : > { %5581 = vmatmul.mubr.msk.f32.gmra.mrb[12].mxu1 %vm361_vm0, %v6835_v15  ;;  %v3759_v15 = vld [vmem:[#allocation2 + $0x26] sm:$0xff] }
 0x10f   : > { %5832 = vmatmul.mubr.msk.f32.gmra.mrb[30].mxu0 %vm361_vm0, %v3363_v6  ;;  %5583 = vmatprep.mubr.msk.f32.mxu1 %vm361_vm0, %v6845_v18  ;;  %v3760_v18 = vld [vmem:[#allocation2 + $0x2e] sm:$0xff] }
 0x110   : > { %5834 = vmatprep.mubr.msk.f32.mxu0 %vm361_vm0, %v3364_v7 }
 0x112   : > { %5584 = vmatmul.mubr.msk.f32.gmra.mrb[14].mxu1 %vm361_vm0, %v6853_v20  ;;  %v3761_v20 = vld [vmem:[#allocation2 + $0x36] sm:$0xff] }
 0x113   : > { %5835 = vmatmul.mubr.msk.f32.gmra.mrb[32].mxu0 %vm361_vm0, %v3365_v10  ;;  %5586 = vmatprep.mubr.msk.f32.mxu1 %vm361_vm0, %v6862_v28  ;;  %v3762_v28 = vld [vmem:[#allocation2 + $0x3e] sm:$0xff] }
 0x114   : > { %5837 = vmatprep.mubr.msk.f32.mxu0 %vm361_vm0, %v3366_v11  ;;  %v4225_v11 = vpop.permute.xlu0 %4224 }
 0x116   : > { %5587 = vmatmul.mubr.msk.f32.gmra.mrb[16].mxu1 %vm361_vm0, %v6869_v31  ;;  %v3763_v31 = vld [vmem:[#allocation2 + $0x46] sm:$0xff] }
 0x117   : > { %5838 = vmatmul.mubr.msk.f32.gmra.mrb[34].mxu0 %vm361_vm0, %v3367_v14  ;;  %5589 = vmatprep.mubr.msk.f32.mxu1 %vm361_vm0, %v6878_v40  ;;  %v3764_v40 = vld [vmem:[#allocation2 + $0x4e] sm:$0xff] }
 0x118   : > { %5842 = vmatprep.mubr.msk.f32.mxu0 %vm361_vm0, %v3759_v15 }
 0x11a   : > { %5590 = vmatmul.mubr.msk.f32.gmra.mrb[18].mxu1 %vm361_vm0, %v6885_v43  ;;  %v3765_v43 = vld [vmem:[#allocation2 + $0x56] sm:$0xff] }
 0x11b   : > { %5843 = vmatmul.mubr.msk.f32.vlgmr.msra.gmra.mrb[0].mxu0 %vm361_vm0, %v3760_v18  ;;  %5592 = vmatprep.mubr.msk.f32.mxu1 %vm361_vm0, %v6895_v50  ;;  %v3766_v50 = vld [vmem:[#allocation2 + $0x5e] sm:$0xff] }
 0x11c   : > { %5845 = vmatprep.mubr.msk.f32.mxu0 %vm361_vm0, %v3761_v20  ;;  %v4230_v20 = vpop.permute.xlu0 %4229 }
 0x11e   : > { %5593 = vmatmul.mubr.msk.f32.gmra.mrb[20].mxu1 %vm361_vm0, %v6902_v22  ;;  %v3767_v22 = vld [vmem:[#allocation2 + $0x66] sm:$0xff] }
 0x11f   : > { %5846 = vmatmul.mubr.msk.f32.gmra.mrb[2].mxu0 %vm361_vm0, %v3762_v28  ;;  %5595 = vmatprep.mubr.msk.f32.mxu1 %vm361_vm0, %v6911_v32  ;;  %v3768_v32 = vld [vmem:[#allocation2 + $0x6e] sm:$0xff] }
 0x120   : > { %5848 = vmatprep.mubr.msk.f32.mxu0 %vm361_vm0, %v3763_v31 }
 0x122   : > { %5596 = vmatmul.mubr.msk.f32.gmra.mrb[22].mxu1 %vm361_vm0, %v6918_v36  ;;  %v3769_v36 = vld [vmem:[#allocation2 + $0x76] sm:$0xff] }
 0x123   : > { %5849 = vmatmul.mubr.msk.f32.gmra.mrb[4].mxu0 %vm361_vm0, %v3764_v40  ;;  %5598 = vmatprep.mubr.msk.f32.mxu1 %vm361_vm0, %v6927_v47  ;;  %v3773_v47 = vld [vmem:[#allocation2 + $0x96] sm:$0xff] }
 0x124   : > { %5851 = vmatprep.mubr.msk.f32.mxu0 %vm361_vm0, %v3765_v43 }
 0x126   : > { %5599 = vmatmul.mubr.msk.f32.gmra.mrb[24].mxu1 %vm361_vm0, %v6934_v51  ;;  %v1658_v51 = vld [vmem:[#allocation2 + $0x122] sm:$0xff] }
 0x127   : > { %5852 = vmatmul.mubr.msk.f32.gmra.mrb[6].mxu0 %vm361_vm0, %v3766_v50  ;;  %5601 = vmatprep.mubr.msk.f32.mxu1 %vm361_vm0, %v6943_v57  ;;  %v2069_v57 = vld [vmem:[#allocation2 + $0xa3] sm:$0xff]  ;;  %v4235_v6 = vpop.permute.xlu1 %4234 }
 0x128   : > { %5854 = vmatprep.mubr.msk.f32.mxu0 %vm361_vm0, %v3767_v22 }
 0x12a   : > { %5602 = vmatmul.mubr.msk.f32.gmra.mrb[26].mxu1 %vm361_vm0, %v6953_v1  ;;  %v3778_v1 = vld [vmem:[#allocation2 + $0xbe] sm:$0xff] }
 0x12b   : > { %5855 = vmatmul.mubr.msk.f32.gmra.mrb[8].mxu0 %vm361_vm0, %v3768_v32  ;;  %5604 = vmatprep.mubr.msk.f32.mxu1 %vm361_vm0, %v6959_v5  ;;  %v2072_v5 = vld [vmem:[#allocation2 + $0xbb] sm:$0xff]  ;;  %v4240_v18 = vpop.permute.xlu1 %4239 }
 0x12c   : > { %5857 = vmatprep.mubr.msk.f32.mxu0 %vm361_vm0, %v3769_v36 }
 0x12e   : > { %5605 = vmatmul.mubr.msk.f32.gmra.mrb[28].mxu1 %vm361_vm0, %v6969_v9  ;;  %v3781_v9 = vld [vmem:[#allocation2 + $0xd6] sm:$0xff] }
 0x12f   : > { %5858 = vmatmul.mubr.msk.f32.gmra.mrb[10].mxu0 %vm361_vm0, %v3770_v39  ;;  %5607 = vmatprep.mubr.msk.f32.mxu1 %vm361_vm0, %v6975_v16  ;;  %v2075_v16 = vld [vmem:[#allocation2 + $0xd3] sm:$0xff] }
 0x130   : > { %5860 = vmatprep.mubr.msk.f32.mxu0 %vm361_vm0, %v3771_v41  ;;  %v4250_v40 = vpop.permute.xlu1 %4249 }
 0x131   : > { %v4245_v22 = vpop.permute.xlu0 %4244 }
 0x132   : > { %5608 = vmatmul.mubr.msk.f32.gmra.mrb[30].mxu1 %vm361_vm0, %v6985_v23  ;;  %v3784_v23 = vld [vmem:[#allocation2 + $0xee] sm:$0xff] }
 0x133   : > { %5861 = vmatmul.mubr.msk.f32.gmra.mrb[12].mxu0 %vm361_vm0, %v3772_v45  ;;  %5610 = vmatprep.mubr.msk.f32.mxu1 %vm361_vm0, %v6991_v29  ;;  %v2078_v29 = vld [vmem:[#allocation2 + $0xeb] sm:$0xff] }
 0x134   : > { %5863 = vmatprep.mubr.msk.f32.mxu0 %vm361_vm0, %v3773_v47  ;;  %v4260_v39 = vpop.permute.xlu1 %4259 }
 0x135   : > { %v7176_v41 = vpop.permute.xlu0 %4254 }
 0x136   : > { %5611 = vmatmul.mubr.msk.f32.gmra.mrb[32].mxu1 %vm361_vm0, %v7001_v38  ;;  %v3787_v38 = vld [vmem:[#allocation2 + $0x106] sm:$0xff] }
 0x137   : > { %5864 = vmatmul.mubr.msk.f32.gmra.mrb[14].mxu0 %vm361_vm0, %v3774_v49  ;;  %5613 = vmatprep.mubr.msk.f32.mxu1 %vm361_vm0, %v1658_v51 }
 0x138   : > { %5866 = vmatprep.mubr.msk.f32.mxu0 %vm361_vm0, %v3775_v52  ;;  %v7183_v49 = vpop.permute.xlu1 %4269 }
 0x13a   : > { %5614 = vmatmul.mubr.msk.f32.gmra.mrb[34].mxu1 %vm361_vm0, %v1659_v53  ;;  %v7189_v53 = vpop.permute.xlu0 %4264 }
 0x13b   : > { %5867 = vmatmul.mubr.msk.f32.gmra.mrb[16].mxu0 %vm361_vm0, %v3776_v54  ;;  %5645 = vmatprep.mubr.msk.f32.mxu1 %vm361_vm0, %v2069_v57 }
 0x13c   : > { %5869 = vmatprep.mubr.msk.f32.mxu0 %vm361_vm0, %v3777_v58  ;;  %v7195_v58 = vpop.permute.xlu1 %4279 }
 0x13e   : > { %5646 = vmatmul.mubr.msk.f32.vlgmr.msra.gmra.mrb[18].mxu1 %vm361_vm0, %v2070_v61  ;;  %v7197_v61 = vpop.permute.xlu0 %4274 }
 0x13f   : > { %5870 = vmatmul.mubr.msk.f32.gmra.mrb[18].mxu0 %vm361_vm0, %v3778_v1  ;;  %5648 = vmatprep.mubr.msk.f32.mxu1 %vm361_vm0, %v2071_v0 }
 0x140   : > { %5872 = vmatprep.mubr.msk.f32.mxu0 %vm361_vm0, %v3779_v2 }
 0x142   : > { %5649 = vmatmul.mubr.msk.f32.gmra.mrb[20].mxu1 %vm361_vm0, %v2072_v5 }
 0x143   : > { %5873 = vmatmul.mubr.msk.f32.gmra.mrb[20].mxu0 %vm361_vm0, %v3780_v37  ;;  %5651 = vmatprep.mubr.msk.f32.mxu1 %vm361_vm0, %v2073_v8  ;;  %v7204_v37 = vpop.permute.xlu1 %4289 }
 0x144   : > { %5875 = vmatprep.mubr.msk.f32.mxu0 %vm361_vm0, %v3781_v9 }
 0x146   : > { %5652 = vmatmul.mubr.msk.f32.gmra.mrb[22].mxu1 %vm361_vm0, %v2074_v12 }
 0x147   : > { %5876 = vmatmul.mubr.msk.f32.gmra.mrb[22].mxu0 %vm361_vm0, %v3782_v13  ;;  %5654 = vmatprep.mubr.msk.f32.mxu1 %vm361_vm0, %v2075_v16  ;;  %v7206_v13 = vpop.permute.xlu0 %4284 }
 0x148   : > { %5878 = vmatprep.mubr.msk.f32.mxu0 %vm361_vm0, %v3783_v17 }
 0x14a   : > { %5655 = vmatmul.mubr.msk.f32.gmra.mrb[24].mxu1 %vm361_vm0, %v2076_v19 }
 0x14b   : > { %5879 = vmatmul.mubr.msk.f32.gmra.mrb[24].mxu0 %vm361_vm0, %v3784_v23  ;;  %5657 = vmatprep.mubr.msk.f32.mxu1 %vm361_vm0, %v2077_v25 }
 0x14c   : > { %5881 = vmatprep.mubr.msk.f32.mxu0 %vm361_vm0, %v3785_v26 }
 0x14e   : > { %5658 = vmatmul.mubr.msk.f32.gmra.mrb[26].mxu1 %vm361_vm0, %v2078_v29 }
 0x14f   : > { %5882 = vmatmul.mubr.msk.f32.gmra.mrb[26].mxu0 %vm361_vm0, %v3786_v33  ;;  %5660 = vmatprep.mubr.msk.f32.mxu1 %vm361_vm0, %v2079_v35 }
 0x150   : > { %5884 = vmatprep.mubr.msk.f32.mxu0 %vm361_vm0, %v3787_v38 }
 0x152   : > { %5661 = vmatmul.mubr.msk.f32.gmra.mrb[28].mxu1 %vm361_vm0, %v2080_v42  ;;  %v7210_v42 = vpop.permute.xlu1 %4299 }
 0x153   : > { %5885 = vmatmul.mubr.msk.f32.gmra.mrb[28].mxu0 %vm361_vm0, %v3788_v44  ;;  %5663 = vmatprep.mubr.msk.f32.mxu1 %vm361_vm0, %v2081_v48 }
 0x154   : > { %5887 = vmatprep.mubr.msk.f32.mxu0 %vm361_vm0, %v3789_v21 }
 0x156   : > { %5664 = vmatmul.mubr.msk.f32.gmra.mrb[30].mxu1 %vm361_vm0, %v2082_v24 }
 0x157   : > { %5888 = vmatmul.mubr.msk.f32.gmra.mrb[30].mxu0 %vm361_vm0, %v3790_v46  ;;  %5666 = vmatprep.mubr.msk.f32.mxu1 %vm361_vm0, %v2083_v27  ;;  %v7214_v27 = vpop.permute.xlu0 %4294 }
 0x158   : > { %5890 = vmatprep.mubr.msk.f32.mxu0 %vm361_vm0, %v3791_v55 }
 0x15a   : > { %5667 = vmatmul.mubr.msk.f32.gmra.mrb[32].mxu1 %vm361_vm0, %v2084_v30 }
 0x15b   : > { %5891 = vmatmul.mubr.msk.f32.gmra.mrb[32].mxu0 %vm361_vm0, %v3792_v56  ;;  %5669 = vmatprep.mubr.msk.f32.mxu1 %vm361_vm0, %v2085_v34 }
 0x15c   : > { %5893 = vmatprep.mubr.msk.f32.mxu0 %vm361_vm0, %v3793_v59 }
 0x15e   : > { %5670 = vmatmul.mubr.msk.f32.gmra.mrb[34].mxu1 %vm361_vm0, %v2086_v60 }
 0x15f   : > { %5894 = vmatmul.mubr.msk.f32.gmra.mrb[34].mxu0 %vm361_vm0, %v3794_v62 }
 0x1c9   : > { %v5564_v3 = vpop.f32.mrb[0].mxu1 }
 0x1ca   : > { %v1836_v4 = vpop.f32.mrb[1].mxu1 }
 0x1cd   : > { %v5567_v7 = vpop.f32.mrb[2].mxu1 }
 0x1ce   : > { %v1846_v10 = vpop.f32.mrb[3].mxu1 }
 0x1d1   : > { %v5570_v14 = vpop.f32.mrb[4].mxu1 }
 0x1d2   : > { %v1856_v15 = vpop.f32.mrb[5].mxu1 }
 0x1d5   : > { %v5573_v28 = vpop.f32.mrb[6].mxu1 }
 0x1d6   : > { %v7166_v31 = vpop.f32.mrb[7].mxu1 }
 0x1d9   : > { %v7168_v43 = vpop.f32.mrb[8].mxu1 }
 0x1da   : > { %v7170_v50 = vpop.f32.mrb[9].mxu1 }
 0x1dd   : > { %v7172_v32 = vpop.f32.mrb[10].mxu1 }
 0x1de   : > { %v7174_v36 = vpop.f32.mrb[11].mxu1 }
 0x1e1   : > { %v7178_v45 = vpop.f32.mrb[12].mxu1 }
 0x1e2   : > { %v7181_v47 = vpop.f32.mrb[13].mxu1 }
 0x1e5   : > { %v7185_v51 = vpop.f32.mrb[14].mxu1 }
 0x1e6   : > { %v7187_v52 = vpop.f32.mrb[15].mxu1 }
 0x1e9   : > { %v7191_v54 = vpop.f32.mrb[16].mxu1 }
 0x1ea   : > { %v7193_v57 = vpop.f32.mrb[17].mxu1 }
 0x1ee   : > { %v5844_v1 = vpop.f32.mrb[0].mxu0 }
 0x1ef   : > { %v5898_v0 = vadd.f32 %v5844_v1, %v5564_v3  ;;  %v3971_v2 = vpop.f32.mrb[1].mxu0 }
 0x1f0   : > { %v5899_v5 = vadd.f32 %v3971_v2, %v1836_v4 }
 0x1f1   : > { %v4403_v8 = vmul.f32 %v5898_v0, %v4230_v20 }
 0x1f2   : > { %v4402_v9 = vmul.f32 %v5899_v5, %v4225_v11  ;;  %v5847_v12 = vpop.f32.mrb[2].mxu0 }
 0x1f3   : > { %4439 = vst [vmem:[%s7202_s29 + $0x8] sm:$0xff] %v4403_v8  ;;  %v4518_v16 = vmul.f32 %v4403_v8, %v4403_v8  ;;  %v5900_v17 = vadd.f32 %v5847_v12, %v5567_v7  ;;  %v3981_v19 = vpop.f32.mrb[3].mxu0 }
 0x1f4   : > { %4438 = vst [vmem:[%s7202_s29] sm:$0xff] %v4402_v9  ;;  %v4475_v23 = vadd.f32 %v4403_v8, %v4402_v9  ;;  %v4517_v25 = vmul.f32 %v4402_v9, %v4402_v9  ;;  %v5901_v26 = vadd.f32 %v3981_v19, %v1846_v10  ;;  %v7219_v10 = vpop.permute.xlu1 %4309 }
 0x1f5   : > { %v4405_v29 = vmul.f32 %v5900_v17, %v4240_v18 }
 0x1f6   : > { %v4553_v33 = vadd.f32 %v4518_v16, %v4517_v25  ;;  %v4404_v35 = vmul.f32 %v5901_v26, %v4235_v6  ;;  %v5850_v38 = vpop.f32.mrb[4].mxu0 }
 0x1f7   : > { %4441 = vst [vmem:[%s7202_s29 + $0x18] sm:$0xff] %v4405_v29  ;;  %v5902_v44 = vadd.f32 %v5850_v38, %v5570_v14  ;;  %v3991_v48 = vpop.f32.mrb[5].mxu0  ;;  %v4520_v30 = vmul.f32 %v4405_v29, %v4405_v29 }
 0x1f8   : > { %4440 = vst [vmem:[%s7202_s29 + $0x10] sm:$0xff] %v4404_v35  ;;  %v4476_v21 = vadd.f32 %v4475_v23, %v4404_v35  ;;  %v4519_v24 = vmul.f32 %v4404_v35, %v4404_v35  ;;  %v5903_v46 = vadd.f32 %v3991_v48, %v1856_v15  ;;  %v7230_v17 = vpop.permute.xlu1 %4319 }
 0x1f9   : > { %v4407_v55 = vmul.f32 %v5902_v44, %v4250_v40 }
 0x1fa   : > { %v4554_v56 = vadd.f32 %v4553_v33, %v4519_v24  ;;  %v4406_v34 = vmul.f32 %v5903_v46, %v4245_v22  ;;  %v4477_v59 = vadd.f32 %v4476_v21, %v4405_v29  ;;  %v5853_v60 = vpop.f32.mrb[6].mxu0  ;;  %v7222_v22 = vpop.permute.xlu0 %4304 }
 0x1fb   : > { %4443 = vst [vmem:[%s7202_s29 + $0x28] sm:$0xff] %v4407_v55  ;;  %v5904_v62 = vadd.f32 %v5853_v60, %v5573_v28  ;;  %v4001_v63 = vpop.f32.mrb[7].mxu0  ;;  %v4522_v14 = vmul.f32 %v4407_v55, %v4407_v55 }
 0x1fc   : > { %4442 = vst [vmem:[%s7202_s29 + $0x20] sm:$0xff] %v4406_v34  ;;  %v4478_v3 = vadd.f32 %v4477_v59, %v4406_v34  ;;  %v4521_v4 = vmul.f32 %v4406_v34, %v4406_v34  ;;  %v4555_v6 = vadd.f32 %v4554_v56, %v4520_v30  ;;  %v5905_v7 = vadd.f32 %v4001_v63, %v7166_v31 }
 0x1fd   : > { %v4409_v11 = vmul.f32 %v5904_v62, %v4260_v39 }
 0x1fe   : > { %v4556_v15 = vadd.f32 %v4555_v6, %v4521_v4  ;;  %v4408_v18 = vmul.f32 %v5905_v7, %v7176_v41  ;;  %v4479_v20 = vadd.f32 %v4478_v3, %v4407_v55  ;;  %v5856_v40 = vpop.f32.mrb[8].mxu0  ;;  %v7236_v26 = vpop.permute.xlu0 %4314 }
 0x1ff   : > { %4445 = vst [vmem:[%s7202_s29 + $0x38] sm:$0xff] %v4409_v11  ;;  %v5906_v28 = vadd.f32 %v5856_v40, %v7168_v43  ;;  %v4011_v1 = vpop.f32.mrb[9].mxu0  ;;  %v4524_v8 = vmul.f32 %v4409_v11, %v4409_v11  ;;  %v7244_v55 = vpop.permute.xlu1 %4329 }
 0x200   : > { %4444 = vst [vmem:[%s7202_s29 + $0x30] sm:$0xff] %v4408_v18  ;;  %v4480_v0 = vadd.f32 %v4479_v20, %v4408_v18  ;;  %v4523_v31 = vmul.f32 %v4408_v18, %v4408_v18  ;;  %v4557_v2 = vadd.f32 %v4556_v15, %v4522_v14  ;;  %v5907_v39 = vadd.f32 %v4011_v1, %v7170_v50 }
 0x201   : > { %v4411_v5 = vmul.f32 %v5906_v28, %v7183_v49 }
 0x202   : > { %v4558_v41 = vadd.f32 %v4557_v2, %v4523_v31  ;;  %v4410_v9 = vmul.f32 %v5907_v39, %v7189_v53  ;;  %v4481_v12 = vadd.f32 %v4480_v0, %v4409_v11  ;;  %v5859_v16 = vpop.f32.mrb[10].mxu0  ;;  %v7248_v60 = vpop.permute.xlu0 %4324 }
 0x203   : > { %4447 = vst [vmem:[%s7202_s29 + $0x48] sm:$0xff] %v4411_v5  ;;  %v5908_v43 = vadd.f32 %v5859_v16, %v7172_v32  ;;  %v4021_v19 = vpop.f32.mrb[11].mxu0  ;;  %v4526_v29 = vmul.f32 %v4411_v5, %v4411_v5  ;;  %v4340_v15 = vpop.permute.xlu1 %4339 }
 0x204   : > { %4446 = vst [vmem:[%s7202_s29 + $0x40] sm:$0xff] %v4410_v9  ;;  %v4482_v23 = vadd.f32 %v4481_v12, %v4410_v9  ;;  %v4525_v25 = vmul.f32 %v4410_v9, %v4410_v9  ;;  %v4559_v50 = vadd.f32 %v4558_v41, %v4524_v8  ;;  %v5909_v49 = vadd.f32 %v4021_v19, %v7174_v36 }
 0x205   : > { %v4413_v53 = vmul.f32 %v5908_v43, %v7195_v58 }
 0x206   : > { %v4560_v33 = vadd.f32 %v4559_v50, %v4525_v25  ;;  %v4412_v35 = vmul.f32 %v5909_v49, %v7197_v61  ;;  %v4483_v38 = vadd.f32 %v4482_v23, %v4411_v5  ;;  %v5862_v44 = vpop.f32.mrb[12].mxu0 }
 0x207   : > { %4449 = vst [vmem:[%s7202_s29 + $0x58] sm:$0xff] %v4413_v53  ;;  %v5910_v32 = vadd.f32 %v5862_v44, %v7178_v45  ;;  %v4031_v48 = vpop.f32.mrb[13].mxu0  ;;  %v4528_v30 = vmul.f32 %v4413_v53, %v4413_v53  ;;  %v4350_v43 = vpop.permute.xlu1 %4349 }
 0x208   : > { %4448 = vst [vmem:[%s7202_s29 + $0x50] sm:$0xff] %v4412_v35  ;;  %v4484_v21 = vadd.f32 %v4483_v38, %v4412_v35  ;;  %v4527_v24 = vmul.f32 %v4412_v35, %v4412_v35  ;;  %v4561_v36 = vadd.f32 %v4560_v33, %v4526_v29  ;;  %v5911_v46 = vadd.f32 %v4031_v48, %v7181_v47 }
 0x209   : > { %v4415_v58 = vmul.f32 %v5910_v32, %v7204_v37 }
 0x20a   : > { %v4562_v61 = vadd.f32 %v4561_v36, %v4527_v24  ;;  %v4414_v56 = vmul.f32 %v5911_v46, %v7206_v13  ;;  %v4485_v34 = vadd.f32 %v4484_v21, %v4413_v53  ;;  %v5865_v59 = vpop.f32.mrb[14].mxu0 }
 0x20b   : > { %4451 = vst [vmem:[%s7202_s29 + $0x68] sm:$0xff] %v4415_v58  ;;  %v5912_v45 = vadd.f32 %v5865_v59, %v7185_v51  ;;  %v4041_v62 = vpop.f32.mrb[15].mxu0  ;;  %v4530_v6 = vmul.f32 %v4415_v58, %v4415_v58 }
 0x20c   : > { %4450 = vst [vmem:[%s7202_s29 + $0x60] sm:$0xff] %v4414_v56  ;;  %v4486_v47 = vadd.f32 %v4485_v34, %v4414_v56  ;;  %v4529_v63 = vmul.f32 %v4414_v56, %v4414_v56  ;;  %v4563_v3 = vadd.f32 %v4562_v61, %v4528_v30  ;;  %v5913_v37 = vadd.f32 %v4041_v62, %v7187_v52  ;;  %v4360_v61 = vpop.permute.xlu1 %4359 }
 0x20d   : > { %v4417_v4 = vmul.f32 %v5912_v45, %v7210_v42  ;;  %v4335_v42 = vpop.permute.xlu0 %4334 }
 0x20e   : > { %v4564_v13 = vadd.f32 %v4563_v3, %v4529_v63  ;;  %v4416_v7 = vmul.f32 %v5913_v37, %v7214_v27  ;;  %v4487_v11 = vadd.f32 %v4486_v47, %v4415_v58  ;;  %v5868_v14 = vpop.f32.mrb[16].mxu0 }
 0x20f   : > { %4453 = vst [vmem:[%s7202_s29 + $0x78] sm:$0xff] %v4417_v4  ;;  %v5914_v51 = vadd.f32 %v5868_v14, %v7191_v54  ;;  %v4051_v18 = vpop.f32.mrb[17].mxu0  ;;  %v4532_v27 = vmul.f32 %v4417_v4, %v4417_v4 }
 0x210   : > { %4452 = vst [vmem:[%s7202_s29 + $0x70] sm:$0xff] %v4416_v7  ;;  %v4488_v20 = vadd.f32 %v4487_v11, %v4416_v7  ;;  %v4531_v40 = vmul.f32 %v4416_v7, %v4416_v7  ;;  %v4565_v28 = vadd.f32 %v4564_v13, %v4530_v6  ;;  %v5915_v52 = vadd.f32 %v4051_v18, %v7193_v57 }
 0x211   : > { %v4419_v1 = vmul.f32 %v5914_v51, %v7219_v10  ;;  %v5647_v0 = vpop.f32.mrb[18].mxu1  ;;  %v4345_v29 = vpop.permute.xlu0 %4344 }
 0x212   : > { %v4566_v31 = vadd.f32 %v4565_v28, %v4531_v40  ;;  %v4418_v2 = vmul.f32 %v5915_v52, %v7222_v22  ;;  %v4489_v39 = vadd.f32 %v4488_v20, %v4417_v4  ;;  %v5871_v5 = vpop.f32.mrb[18].mxu0  ;;  %v2353_v54 = vpop.f32.mrb[19].mxu1 }
 0x213   : > { %4455 = vst [vmem:[%s7202_s29 + $0x88] sm:$0xff] %v4419_v1  ;;  %v5916_v8 = vadd.f32 %v5871_v5, %v5647_v0  ;;  %v4061_v41 = vpop.f32.mrb[19].mxu0  ;;  %v4534_v23 = vmul.f32 %v4419_v1, %v4419_v1  ;;  %v4370_v28 = vpop.permute.xlu1 %4369 }
 0x214   : > { %4454 = vst [vmem:[%s7202_s29 + $0x80] sm:$0xff] %v4418_v2  ;;  %v4490_v9 = vadd.f32 %v4489_v39, %v4418_v2  ;;  %v4533_v12 = vmul.f32 %v4418_v2, %v4418_v2  ;;  %v4567_v57 = vadd.f32 %v4566_v31, %v4532_v27  ;;  %v5917_v16 = vadd.f32 %v4061_v41, %v2353_v54 }
 0x215   : > { %v4421_v10 = vmul.f32 %v5916_v8, %v7230_v17  ;;  %v5650_v19 = vpop.f32.mrb[20].mxu1 }
 0x216   : > { %v4568_v25 = vadd.f32 %v4567_v57, %v4533_v12  ;;  %v4420_v22 = vmul.f32 %v5917_v16, %v7236_v26  ;;  %v4491_v50 = vadd.f32 %v4490_v9, %v4419_v1  ;;  %v5874_v49 = vpop.f32.mrb[20].mxu0  ;;  %v2363_v53 = vpop.f32.mrb[21].mxu1 }
 0x217   : > { %4457 = vst [vmem:[%s7202_s29 + $0x98] sm:$0xff] %v4421_v10  ;;  %v5918_v33 = vadd.f32 %v5874_v49, %v5650_v19  ;;  %v4071_v35 = vpop.f32.mrb[21].mxu0  ;;  %v4536_v24 = vmul.f32 %v4421_v10, %v4421_v10 }
 0x218   : > { %4456 = vst [vmem:[%s7202_s29 + $0x90] sm:$0xff] %v4420_v22  ;;  %v4492_v38 = vadd.f32 %v4491_v50, %v4420_v22  ;;  %v4535_v44 = vmul.f32 %v4420_v22, %v4420_v22  ;;  %v4569_v32 = vadd.f32 %v4568_v25, %v4534_v23  ;;  %v5919_v48 = vadd.f32 %v4071_v35, %v2363_v53  ;;  %v4380_v50 = vpop.permute.xlu1 %4379 }
 0x219   : > { %v4423_v17 = vmul.f32 %v5918_v33, %v7244_v55  ;;  %v5653_v21 = vpop.f32.mrb[22].mxu1  ;;  %v4355_v55 = vpop.permute.xlu0 %4354 }
 0x21a   : > { %v4570_v36 = vadd.f32 %v4569_v32, %v4535_v44  ;;  %v4422_v26 = vmul.f32 %v5919_v48, %v7248_v60  ;;  %v4493_v46 = vadd.f32 %v4492_v38, %v4421_v10  ;;  %v5877_v58 = vpop.f32.mrb[22].mxu0  ;;  %v2373_v30 = vpop.f32.mrb[23].mxu1 }
 0x21b   : > { %4459 = vst [vmem:[%s7202_s29 + $0xa8] sm:$0xff] %v4423_v17  ;;  %v5920_v56 = vadd.f32 %v5877_v58, %v5653_v21  ;;  %v4081_v34 = vpop.f32.mrb[23].mxu0  ;;  %v4538_v37 = vmul.f32 %v4423_v17, %v4423_v17 }
 0x21c   : > { %4458 = vst [vmem:[%s7202_s29 + $0xa0] sm:$0xff] %v4422_v26  ;;  %v4494_v59 = vadd.f32 %v4493_v46, %v4422_v26  ;;  %v4537_v45 = vmul.f32 %v4422_v26, %v4422_v26  ;;  %v4571_v62 = vadd.f32 %v4570_v36, %v4536_v24  ;;  %v5921_v47 = vadd.f32 %v4081_v34, %v2373_v30 }
 0x21d   : > { %v4425_v63 = vmul.f32 %v5920_v56, %v4340_v15  ;;  %v5656_v3 = vpop.f32.mrb[24].mxu1  ;;  %v4365_v39 = vpop.permute.xlu0 %4364 }
 0x21e   : > { %v4572_v4 = vadd.f32 %v4571_v62, %v4537_v45  ;;  %v4424_v60 = vmul.f32 %v5921_v47, %v4335_v42  ;;  %v4495_v6 = vadd.f32 %v4494_v59, %v4423_v17  ;;  %v5880_v13 = vpop.f32.mrb[24].mxu0  ;;  %v2383_v7 = vpop.f32.mrb[25].mxu1 }
 0x21f   : > { %4461 = vst [vmem:[%s7202_s29 + $0xb8] sm:$0xff] %v4425_v63  ;;  %v5922_v11 = vadd.f32 %v5880_v13, %v5656_v3  ;;  %v4091_v14 = vpop.f32.mrb[25].mxu0  ;;  %v4540_v1 = vmul.f32 %v4425_v63, %v4425_v63  ;;  %v4390_v45 = vpop.permute.xlu1 %4389 }
 0x220   : > { %4460 = vst [vmem:[%s7202_s29 + $0xb0] sm:$0xff] %v4424_v60  ;;  %v4496_v51 = vadd.f32 %v4495_v6, %v4424_v60  ;;  %v4539_v18 = vmul.f32 %v4424_v60, %v4424_v60  ;;  %v4573_v20 = vadd.f32 %v4572_v4, %v4538_v37  ;;  %v5923_v40 = vadd.f32 %v4091_v14, %v2383_v7 }
 0x221   : > { %v4427_v52 = vmul.f32 %v5922_v11, %v4350_v43  ;;  %v5659_v15 = vpop.f32.mrb[26].mxu1  ;;  %v4375_v44 = vpop.permute.xlu0 %4374 }
 0x222   : > { %v4574_v0 = vadd.f32 %v4573_v20, %v4539_v18  ;;  %v4426_v27 = vmul.f32 %v5923_v40, %v4345_v29  ;;  %v4497_v42 = vadd.f32 %v4496_v51, %v4425_v63  ;;  %v5883_v31 = vpop.f32.mrb[26].mxu0  ;;  %v2393_v2 = vpop.f32.mrb[27].mxu1 }
 0x223   : > { %4463 = vst [vmem:[%s7202_s29 + $0xc8] sm:$0xff] %v4427_v52  ;;  %v5924_v5 = vadd.f32 %v5883_v31, %v5659_v15  ;;  %v4101_v54 = vpop.f32.mrb[27].mxu0  ;;  %v4542_v43 = vmul.f32 %v4427_v52, %v4427_v52 }
 0x224   : > { %4462 = vst [vmem:[%s7202_s29 + $0xc0] sm:$0xff] %v4426_v27  ;;  %v4498_v8 = vadd.f32 %v4497_v42, %v4426_v27  ;;  %v4541_v41 = vmul.f32 %v4426_v27, %v4426_v27  ;;  %v4575_v9 = vadd.f32 %v4574_v0, %v4540_v1  ;;  %v5925_v12 = vadd.f32 %v4101_v54, %v2393_v2  ;;  %v4400_v2 = vpop.permute.xlu1 %4399 }
 0x225   : > { %v4429_v57 = vmul.f32 %v5924_v5, %v4360_v61  ;;  %v5662_v16 = vpop.f32.mrb[28].mxu1  ;;  %v4385_v6 = vpop.permute.xlu0 %4384 }
 0x226   : > { %v4576_v10 = vadd.f32 %v4575_v9, %v4541_v41  ;;  %v4428_v19 = vmul.f32 %v5925_v12, %v4355_v55  ;;  %v4499_v23 = vadd.f32 %v4498_v8, %v4427_v52  ;;  %v5886_v25 = vpop.f32.mrb[28].mxu0  ;;  %v2403_v22 = vpop.f32.mrb[29].mxu1 }
 0x227   : > { %4465 = vst [vmem:[%s7202_s29 + $0xd8] sm:$0xff] %v4429_v57  ;;  %v5926_v49 = vadd.f32 %v5886_v25, %v5662_v16  ;;  %v4111_v53 = vpop.f32.mrb[29].mxu0  ;;  %v4544_v17 = vmul.f32 %v4429_v57, %v4429_v57 }
 0x228   : > { %4464 = vst [vmem:[%s7202_s29 + $0xd0] sm:$0xff] %v4428_v19  ;;  %v4500_v29 = vadd.f32 %v4499_v23, %v4428_v19  ;;  %v4543_v33 = vmul.f32 %v4428_v19, %v4428_v19  ;;  %v4577_v35 = vadd.f32 %v4576_v10, %v4542_v43  ;;  %v5927_v38 = vadd.f32 %v4111_v53, %v2403_v22 }
 0x229   : > { %v4431_v32 = vmul.f32 %v5926_v49, %v4370_v28  ;;  %v5665_v48 = vpop.f32.mrb[30].mxu1  ;;  %v4395_v41 = vpop.permute.xlu0 %4394 }
 0x22a   : > { %v4578_v21 = vadd.f32 %v4577_v35, %v4543_v33  ;;  %v4430_v24 = vmul.f32 %v5927_v38, %v4365_v39  ;;  %v4501_v36 = vadd.f32 %v4500_v29, %v4429_v57  ;;  %v5889_v26 = vpop.f32.mrb[30].mxu0  ;;  %v2413_v46 = vpop.f32.mrb[31].mxu1 }
 0x22b   : > { %4467 = vst [vmem:[%s7202_s29 + $0xe8] sm:$0xff] %v4431_v32  ;;  %v5928_v58 = vadd.f32 %v5889_v26, %v5665_v48  ;;  %v4121_v30 = vpop.f32.mrb[31].mxu0  ;;  %v4546_v55 = vmul.f32 %v4431_v32, %v4431_v32 }
 0x22c   : > { %4466 = vst [vmem:[%s7202_s29 + $0xe0] sm:$0xff] %v4430_v24  ;;  %v4502_v61 = vadd.f32 %v4501_v36, %v4430_v24  ;;  %v4545_v56 = vmul.f32 %v4430_v24, %v4430_v24  ;;  %v4579_v34 = vadd.f32 %v4578_v21, %v4544_v17  ;;  %v5929_v59 = vadd.f32 %v4121_v30, %v2413_v46 }
 0x22d   : > { %v4433_v62 = vmul.f32 %v5928_v58, %v4380_v50  ;;  %v5668_v47 = vpop.f32.mrb[32].mxu1 }
 0x22e   : > { %v4580_v63 = vadd.f32 %v4579_v34, %v4545_v56  ;;  %v4432_v3 = vmul.f32 %v5929_v59, %v4375_v44  ;;  %v4503_v37 = vadd.f32 %v4502_v61, %v4431_v32  ;;  %v5892_v4 = vpop.f32.mrb[32].mxu0  ;;  %v2423_v60 = vpop.f32.mrb[33].mxu1 }
 0x22f   : > { %4469 = vst [vmem:[%s7202_s29 + $0xf8] sm:$0xff] %v4433_v62  ;;  %v5930_v13 = vadd.f32 %v5892_v4, %v5668_v47  ;;  %v4131_v7 = vpop.f32.mrb[33].mxu0  ;;  %v4548_v28 = vmul.f32 %v4433_v62, %v4433_v62 }
 0x230   : > { %4468 = vst [vmem:[%s7202_s29 + $0xf0] sm:$0xff] %v4432_v3  ;;  %v4504_v11 = vadd.f32 %v4503_v37, %v4432_v3  ;;  %v4547_v14 = vmul.f32 %v4432_v3, %v4432_v3  ;;  %v4581_v51 = vadd.f32 %v4580_v63, %v4546_v55  ;;  %v5931_v18 = vadd.f32 %v4131_v7, %v2423_v60 }
 0x231   : > { %v4435_v20 = vmul.f32 %v5930_v13, %v4390_v45  ;;  %v5671_v40 = vpop.f32.mrb[34].mxu1 }
 0x232   : > { %v4582_v52 = vadd.f32 %v4581_v51, %v4547_v14  ;;  %v4434_v15 = vmul.f32 %v5931_v18, %v4385_v6  ;;  %v4505_v1 = vadd.f32 %v4504_v11, %v4433_v62  ;;  %v5895_v0 = vpop.f32.mrb[34].mxu0  ;;  %v2433_v27 = vpop.f32.mrb[35].mxu1 }
 0x233   : > { %4471 = vst [vmem:[%s7202_s29 + $0x108] sm:$0xff] %v4435_v20  ;;  %v5932_v42 = vadd.f32 %v5895_v0, %v5671_v40  ;;  %v4141_v31 = vpop.f32.mrb[35].mxu0  ;;  %v4550_v12 = vmul.f32 %v4435_v20, %v4435_v20 }
 0x234   : > { %4470 = vst [vmem:[%s7202_s29 + $0x100] sm:$0xff] %v4434_v15  ;;  %v4506_v39 = vadd.f32 %v4505_v1, %v4434_v15  ;;  %v4549_v5 = vmul.f32 %v4434_v15, %v4434_v15  ;;  %v4583_v54 = vadd.f32 %v4582_v52, %v4548_v28  ;;  %v5933_v8 = vadd.f32 %v4141_v31, %v2433_v27 }
 0x235   : > { %v4437_v9 = vmul.f32 %v5932_v42, %v4400_v2 }
 0x236   : > { %v4584_v57 = vadd.f32 %v4583_v54, %v4549_v5  ;;  %v4436_v16 = vmul.f32 %v5933_v8, %v4395_v41  ;;  %v4507_v43 = vadd.f32 %v4506_v39, %v4435_v20 }
 0x237   : > { %4473 = vst [vmem:[%s7202_s29 + $0x118] sm:$0xff] %v4437_v9  ;;  %v4552_v25 = vmul.f32 %v4437_v9, %v4437_v9 }
 0x238   : > { %4472 = vst [vmem:[%s7202_s29 + $0x110] sm:$0xff] %v4436_v16  ;;  %v4508_v10 = vadd.f32 %v4507_v43, %v4436_v16  ;;  %v4551_v19 = vmul.f32 %v4436_v16, %v4436_v16  ;;  %v4585_v23 = vadd.f32 %v4584_v57, %v4550_v12 }
 0x23a   : > { %v4509_v22 = vadd.f32 %v4508_v10, %v4437_v9  ;;  %v4586_v50 = vadd.f32 %v4585_v23, %v4551_v19 }
 0x23c   : > { %v4510_v49 = vrot.slane %v4509_v22, 4  ;;  %v4587_v53 = vadd.f32 %v4586_v50, %v4552_v25 }
 0x23e   : > { %v4511_v29 = vadd.f32 %v4510_v49, %v4509_v22  ;;  %v4588_v33 = vrot.slane %v4587_v53, 4 }
 0x240   : > { %v4512_v35 = vrot.slane %v4511_v29, 2  ;;  %v4589_v38 = vadd.f32 %v4588_v33, %v4587_v53 }
 0x242   : > { %v4513_v44 = vadd.f32 %v4512_v35, %v4511_v29  ;;  %v4590_v32 = vrot.slane %v4589_v38, 2 }
 0x244   : > { %v4514_v48 = vrot.slane %v4513_v44, 1  ;;  %v4591_v17 = vadd.f32 %v4590_v32, %v4589_v38 }
 0x246   : > { %v4515_v21 = vadd.f32 %v4514_v48, %v4513_v44  ;;  %v4592_v24 = vrot.slane %v4591_v17, 1 }
 0x248   : > { %4516 = vst [vmem:[%s7163_s25] sm:$0x1] %v4515_v21  ;;  %v4593_v36 = vadd.f32 %v4592_v24, %v4591_v17 }
 0x24a   : > { %4594 = vst [vmem:[%s7163_s25 + $0x1] sm:$0x1] %v4593_v36 }
 0x24b PF: > { %s16_s20 = sadd.s32 1, %s6237_s20   ;;  %s7303_s18 = smov %s6233_s19 }
 0x24c   : > { %p13_p8 = scmp.ge.s32.totalorder %s16_s20, 4   ;;  %s7304_s19 = smov %s7306_s21 }
 0x24e   :  { %15 = sbr.rel (!%p13_p8) target bundleno = 2 (0x2), region = 89 }

</bundles_post_ra>
